<compile_context>
chip_gen: v6e
topology: v6e:2x2x1
jax: 0.10.0
libtpu: 0.0.40
codegen_flags: <defaults>
</compile_context>

<pallas_src>
import functools
import math

import jax
import jax.numpy as jnp
from jax.experimental import pallas as pl
from jax.experimental.pallas import tpu as pltpu

NUM_ACTIONS = 4
LANE = 128
SUBLANE = 8


def _round_up(x, m):
    return (x + m - 1) // m * m


# ----------------------------------------------------------------------------
# Pallas kernels.
# ----------------------------------------------------------------------------
def _matmul_bias_kernel(a_ref, b_ref, bias_ref, o_ref, *, relu):
    """out = relu?(A @ B + bias). A/B are bf16, accumulate + epilogue in f32."""
    acc = jnp.dot(a_ref[...], b_ref[...], preferred_element_type=jnp.float32)
    acc = acc + bias_ref[...]
    if relu:
        acc = jnp.maximum(acc, 0.0)
    o_ref[...] = acc.astype(o_ref.dtype)


def _fc_fused_kernel(x_ref, w1_ref, b1_ref, w2_ref, b2_ref, o_ref):
    """out = relu(x @ W1 + b1) @ W2 + b2  (fc1 + fc2 fused, one launch)."""
    h = jnp.dot(x_ref[...], w1_ref[...], preferred_element_type=jnp.float32)
    h = jnp.maximum(h + b1_ref[...], 0.0)          # f32 epilogue (v5e-friendly)
    o = jnp.dot(h.astype(jnp.bfloat16), w2_ref[...],
                preferred_element_type=jnp.float32)
    o_ref[...] = (o + b2_ref[...]).astype(o_ref.dtype)


_VMEM_SPEC = pl.BlockSpec(memory_space=pltpu.MemorySpace.VMEM)


def matmul_bias(a_bf16, b_bf16, bias_f32, *, relu):
    """a: (M, K) bf16, b: (K, Np) bf16, bias: (1, Np) f32 -> (M, Np) f32.

    Whole problem fits comfortably in VMEM at these sizes (worst case:
    conv1 A ~100 KB bf16, out ~400 KB f32) -> single grid-less call.
    NOTE(v7x): if M (= batch * Ho * Wo) ever grows large, add an M-tiled grid
    with dimension_semantics=("parallel",) to use the second TensorCore.
    """
    M, K = a_bf16.shape
    K2, Np = b_bf16.shape
    assert K == K2 and bias_f32.shape == (1, Np)
    ce = pl.CostEstimate(
        flops=2 * M * K * Np,
        transcendentals=0,
        bytes_accessed=(a_bf16.size + b_bf16.size) * 2
        + bias_f32.size * 4 + M * Np * 4,
    )
    return pl.pallas_call(
        functools.partial(_matmul_bias_kernel, relu=relu),
        out_shape=jax.ShapeDtypeStruct((M, Np), jnp.float32),
        in_specs=[_VMEM_SPEC, _VMEM_SPEC, _VMEM_SPEC],
        out_specs=_VMEM_SPEC,
        cost_estimate=ce,
    )(a_bf16, b_bf16, bias_f32)


def fc_fused(x_f32, w1_bf16, b1_f32, w2_bf16, b2_f32):
    """x: (B, 3136) f32 -> (B, Np) f32 where Np = padded NUM_ACTIONS."""
    M, K = x_f32.shape
    Mp = max(SUBLANE, _round_up(M, SUBLANE))
    if Mp != M:
        x_f32 = jnp.pad(x_f32, ((0, Mp - M), (0, 0)))
    x = x_f32.astype(jnp.bfloat16)
    H = w1_bf16.shape[1]
    Np = w2_bf16.shape[1]
    ce = pl.CostEstimate(
        flops=2 * Mp * K * H + 2 * Mp * H * Np,
        transcendentals=0,
        bytes_accessed=(x.size + w1_bf16.size + w2_bf16.size) * 2
        + (b1_f32.size + b2_f32.size) * 4 + Mp * Np * 4,
    )
    out = pl.pallas_call(
        _fc_fused_kernel,
        out_shape=jax.ShapeDtypeStruct((Mp, Np), jnp.float32),
        in_specs=[_VMEM_SPEC] * 5,
        out_specs=_VMEM_SPEC,
        cost_estimate=ce,
    )(x, w1_bf16, b1_f32, w2_bf16, b2_f32)
    return out[:M]


# ----------------------------------------------------------------------------
# JAX glue: NHWC im2col (pure data movement) so conv becomes a Pallas matmul.
# ----------------------------------------------------------------------------
def im2col_nhwc(x, kh, kw, stride, pad):
    """x: (N, H, W, C) -> (N*Ho*Wo, kh*kw*C), plus Ho, Wo. Column order (i,j,c)."""
    N, H, W, C = x.shape
    xp = jnp.pad(x, ((0, 0), (pad, pad), (pad, pad), (0, 0)))
    Ho = (H + 2 * pad - kh) // stride + 1
    Wo = (W + 2 * pad - kw) // stride + 1
    cols = []
    for i in range(kh):
        for j in range(kw):
            patch = xp[:, i:i + stride * Ho:stride, j:j + stride * Wo:stride, :]
            cols.append(patch)                        # (N, Ho, Wo, C)
    col = jnp.stack(cols, axis=3)                     # (N, Ho, Wo, kh*kw, C)
    col = col.reshape(N, Ho, Wo, kh * kw * C)
    return col.reshape(N * Ho * Wo, kh * kw * C), Ho, Wo


def conv2d_pallas(x_nhwc, wmat_bf16, bias_f32, kh, kw, stride, pad, out_c, relu):
    """x: (N, H, W, C) f32, wmat: (kh*kw*C, Op) bf16 (Op lane-padded),
    bias: (1, Op) f32 -> (N, Ho, Wo, out_c) f32 (NHWC)."""
    Nb = x_nhwc.shape[0]
    a, Ho, Wo = im2col_nhwc(x_nhwc, kh, kw, stride, pad)
    M = a.shape[0]
    Mp = _round_up(M, SUBLANE)
    if Mp != M:
        a = jnp.pad(a, ((0, Mp - M), (0, 0)))         # sublane-aligned rows
    a = a.astype(jnp.bfloat16)
    y = matmul_bias(a, wmat_bf16, bias_f32, relu=relu)   # (Mp, Op) f32
    y = y[:M, :out_c]                                  # drop pad rows / lanes
    return y.reshape(Nb, Ho, Wo, out_c)


# ----------------------------------------------------------------------------
# DQN parameters (deterministic, PyTorch-style uniform init) + kernel prep.
# ----------------------------------------------------------------------------
def init_params(key):
    def u(key, shape, fan_in):
        bound = 1.0 / math.sqrt(fan_in)
        return jax.random.uniform(key, shape, jnp.float32, -bound, bound)

    keys = jax.random.split(key, 10)
    return {
        "w1": u(keys[0], (32, 1, 8, 8), 1 * 8 * 8),
        "b1": u(keys[1], (32,), 1 * 8 * 8),
        "w2": u(keys[2], (64, 32, 4, 4), 32 * 4 * 4),
        "b2": u(keys[3], (64,), 32 * 4 * 4),
        "w3": u(keys[4], (64, 64, 3, 3), 64 * 3 * 3),
        "b3": u(keys[5], (64,), 64 * 3 * 3),
        "wf1": u(keys[6], (512, 64 * 7 * 7), 64 * 7 * 7),
        "bf1": u(keys[7], (512,), 64 * 7 * 7),
        "wf2": u(keys[8], (NUM_ACTIONS, 512), 512),
        "bf2": u(keys[9], (NUM_ACTIONS,), 512),
    }


def prepare_params(p):
    """One-time weight prep: NHWC-ordered matmul weights, lane-padded to 128,
    cast to bf16 (biases stay f32)."""
    def conv_w(w):
        O, C, kh, kw = w.shape
        wm = w.transpose(2, 3, 1, 0).reshape(kh * kw * C, O)     # (i,j,c) rows
        Op = _round_up(O, LANE)
        wm = jnp.pad(wm, ((0, 0), (0, Op - O)))
        return wm.astype(jnp.bfloat16)

    def conv_b(b):
        O = b.shape[0]
        Op = _round_up(O, LANE)
        return jnp.pad(b, (0, Op - O)).reshape(1, Op).astype(jnp.float32)

    # fc1: permute columns from NCHW (c,h,w) flatten order to NHWC (h,w,c).
    wf1 = p["wf1"].reshape(512, 64, 7, 7).transpose(0, 2, 3, 1).reshape(512, -1)
    wf1 = wf1.T.astype(jnp.bfloat16)                              # (3136, 512)
    bf1 = p["bf1"].reshape(1, 512).astype(jnp.float32)

    # fc2: pad NUM_ACTIONS -> 128 output lanes with zeros.
    Np = _round_up(NUM_ACTIONS, LANE)
    wf2 = jnp.pad(p["wf2"].T, ((0, 0), (0, Np - NUM_ACTIONS))).astype(jnp.bfloat16)
    bf2 = jnp.pad(p["bf2"], (0, Np - NUM_ACTIONS)).reshape(1, Np).astype(jnp.float32)

    return {
        "w1": conv_w(p["w1"]), "b1": conv_b(p["b1"]),
        "w2": conv_w(p["w2"]), "b2": conv_b(p["b2"]),
        "w3": conv_w(p["w3"]), "b3": conv_b(p["b3"]),
        "wf1": wf1, "bf1": bf1, "wf2": wf2, "bf2": bf2,
    }


# ----------------------------------------------------------------------------
# Forward pass (Pallas) and pure-JAX f32 reference.
# ----------------------------------------------------------------------------
def dqn_forward(prep, x):
    if x.ndim == 3:                       # matches torch `x.expand(1,-1,-1,-1)`
        x = x[None]
    x = jnp.transpose(x, (0, 2, 3, 1))    # NCHW -> NHWC once, at the boundary
    x = conv2d_pallas(x, prep["w1"], prep["b1"], 8, 8, 4, 1, out_c=32, relu=True)
    x = conv2d_pallas(x, prep["w2"], prep["b2"], 4, 4, 3, 1, out_c=64, relu=True)
    x = conv2d_pallas(x, prep["w3"], prep["b3"], 3, 3, 1, 1, out_c=64, relu=True)
    N = x.shape[0]
    x = x.reshape(N, 7 * 7 * 64)          # NHWC flatten; wf1 permuted to match
    out = fc_fused(x, prep["wf1"], prep["bf1"], prep["wf2"], prep["bf2"])
    return out[:, :NUM_ACTIONS]           # drop padded output lanes


def dqn_reference(params, x):
    def conv(x, w, b, stride, pad):
        y = jax.lax.conv_general_dilated(
            x, w, (stride, stride), [(pad, pad), (pad, pad)],
            dimension_numbers=("NCHW", "OIHW", "NCHW"))
        return y + b[None, :, None, None]

    if x.ndim == 3:
        x = x[None]
    x = jax.nn.relu(conv(x, params["w1"], params["b1"], 4, 1))
    x = jax.nn.relu(conv(x, params["w2"], params["b2"], 3, 1))
    x = jax.nn.relu(conv(x, params["w3"], params["b3"], 1, 1))
    x = x.reshape(x.shape[0], -1)
    x = jax.nn.relu(x @ params["wf1"].T + params["bf1"])
    return x @ params["wf2"].T + params["bf2"]


if __name__ == "__main__":
    key = jax.random.PRNGKey(0)
    pkey, xkey = jax.random.split(key)
    params = init_params(pkey)
    prep = prepare_params(params)         # pad/cast/permutation paid once

    # Input geometry is fixed by fc1 (64*7*7): 84x84 single-channel frames.
    batch = 2
    x = jax.random.uniform(xkey, (batch, 1, 84, 84), jnp.float32)

    out = jax.jit(dqn_forward)(prep, x)
    out = jax.block_until_ready(out)
    assert out.shape == (batch, NUM_ACTIONS), out.shape

    ref = jax.block_until_ready(jax.jit(dqn_reference)(params, x))
    # Slightly looser tolerance than before: bf16 MXU operands, f32 accumulate.
    assert jnp.allclose(out, ref, rtol=2e-2, atol=2e-2), (out, ref)

    print("KERNEL_OK")
</pallas_src>

<mosaic_0001>
module attributes {stable_mosaic.version = 11 : i64} {
  func.func @_matmul_bias_kernel(%arg0: memref<800x64xbf16, #tpu.memory_space<vmem>>, %arg1: memref<64x128xbf16, #tpu.memory_space<vmem>>, %arg2: memref<1x128xf32, #tpu.memory_space<vmem>>, %arg3: memref<800x128xf32, #tpu.memory_space<vmem>>) attributes {dimension_semantics = [], scalar_prefetch = 0 : i64, scratch_operands = 0 : i64, tpu.core_type = #tpu.core_type<tc>} {
    %c0 = arith.constant 0 : index
    %c0_0 = arith.constant 0 : index
    %0 = vector.load %arg0[%c0, %c0_0] : memref<800x64xbf16, #tpu.memory_space<vmem>>, vector<800x64xbf16>
    %c0_1 = arith.constant 0 : index
    %c0_2 = arith.constant 0 : index
    %1 = vector.load %arg1[%c0_1, %c0_2] : memref<64x128xbf16, #tpu.memory_space<vmem>>, vector<64x128xbf16>
    %cst = arith.constant dense<0.000000e+00> : vector<800x128xf32>
    %2 = tpu.matmul %0, %1, %cst {dimension_numbers = #tpu.dot_dimension_numbers<[1], [0], [0], [1], [0, 0, 1, 1], [], []>} : vector<800x64xbf16>, vector<64x128xbf16>, vector<800x128xf32> -> vector<800x128xf32>
    %c0_3 = arith.constant 0 : index
    %c0_4 = arith.constant 0 : index
    %3 = vector.load %arg2[%c0_3, %c0_4] : memref<1x128xf32, #tpu.memory_space<vmem>>, vector<1x128xf32>
    %4 = vector.broadcast %3 : vector<1x128xf32> to vector<800x128xf32>
    %5 = arith.addf %2, %4 : vector<800x128xf32>
    %cst_5 = arith.constant 0.000000e+00 : f32
    %6 = vector.broadcast %cst_5 : f32 to vector<800x128xf32>
    %7 = arith.maximumf %5, %6 : vector<800x128xf32>
    %c0_6 = arith.constant 0 : index
    %c0_7 = arith.constant 0 : index
    %8 = vector.load %arg3[%c0_6, %c0_7] : memref<800x128xf32, #tpu.memory_space<vmem>>, vector<800x128xf32>
    tpu.vector_store %arg3[%c0_6, %c0_7], %7 {strides = array<i32>} : memref<800x128xf32, #tpu.memory_space<vmem>>, vector<800x128xf32>,
    return
  }
}

module attributes {stable_mosaic.version = 11 : i64} {
  func.func @_matmul_bias_kernel(%arg0: memref<104x512xbf16, #tpu.memory_space<vmem>>, %arg1: memref<512x128xbf16, #tpu.memory_space<vmem>>, %arg2: memref<1x128xf32, #tpu.memory_space<vmem>>, %arg3: memref<104x128xf32, #tpu.memory_space<vmem>>) attributes {dimension_semantics = [], scalar_prefetch = 0 : i64, scratch_operands = 0 : i64, tpu.core_type = #tpu.core_type<tc>} {
    %c0 = arith.constant 0 : index
    %c0_0 = arith.constant 0 : index
    %0 = vector.load %arg0[%c0, %c0_0] : memref<104x512xbf16, #tpu.memory_space<vmem>>, vector<104x512xbf16>
    %c0_1 = arith.constant 0 : index
    %c0_2 = arith.constant 0 : index
    %1 = vector.load %arg1[%c0_1, %c0_2] : memref<512x128xbf16, #tpu.memory_space<vmem>>, vector<512x128xbf16>
    %cst = arith.constant dense<0.000000e+00> : vector<104x128xf32>
    %2 = tpu.matmul %0, %1, %cst {dimension_numbers = #tpu.dot_dimension_numbers<[1], [0], [0], [1], [0, 0, 1, 1], [], []>} : vector<104x512xbf16>, vector<512x128xbf16>, vector<104x128xf32> -> vector<104x128xf32>
    %c0_3 = arith.constant 0 : index
    %c0_4 = arith.constant 0 : index
    %3 = vector.load %arg2[%c0_3, %c0_4] : memref<1x128xf32, #tpu.memory_space<vmem>>, vector<1x128xf32>
    %4 = vector.broadcast %3 : vector<1x128xf32> to vector<104x128xf32>
    %5 = arith.addf %2, %4 : vector<104x128xf32>
    %cst_5 = arith.constant 0.000000e+00 : f32
    %6 = vector.broadcast %cst_5 : f32 to vector<104x128xf32>
    %7 = arith.maximumf %5, %6 : vector<104x128xf32>
    %c0_6 = arith.constant 0 : index
    %c0_7 = arith.constant 0 : index
    %8 = vector.load %arg3[%c0_6, %c0_7] : memref<104x128xf32, #tpu.memory_space<vmem>>, vector<104x128xf32>
    tpu.vector_store %arg3[%c0_6, %c0_7], %7 {strides = array<i32>} : memref<104x128xf32, #tpu.memory_space<vmem>>, vector<104x128xf32>,
    return
  }
}

module attributes {stable_mosaic.version = 11 : i64} {
  func.func @_matmul_bias_kernel(%arg0: memref<104x576xbf16, #tpu.memory_space<vmem>>, %arg1: memref<576x128xbf16, #tpu.memory_space<vmem>>, %arg2: memref<1x128xf32, #tpu.memory_space<vmem>>, %arg3: memref<104x128xf32, #tpu.memory_space<vmem>>) attributes {dimension_semantics = [], scalar_prefetch = 0 : i64, scratch_operands = 0 : i64, tpu.core_type = #tpu.core_type<tc>} {
    %c0 = arith.constant 0 : index
    %c0_0 = arith.constant 0 : index
    %0 = vector.load %arg0[%c0, %c0_0] : memref<104x576xbf16, #tpu.memory_space<vmem>>, vector<104x576xbf16>
    %c0_1 = arith.constant 0 : index
    %c0_2 = arith.constant 0 : index
    %1 = vector.load %arg1[%c0_1, %c0_2] : memref<576x128xbf16, #tpu.memory_space<vmem>>, vector<576x128xbf16>
    %cst = arith.constant dense<0.000000e+00> : vector<104x128xf32>
    %2 = tpu.matmul %0, %1, %cst {dimension_numbers = #tpu.dot_dimension_numbers<[1], [0], [0], [1], [0, 0, 1, 1], [], []>} : vector<104x576xbf16>, vector<576x128xbf16>, vector<104x128xf32> -> vector<104x128xf32>
    %c0_3 = arith.constant 0 : index
    %c0_4 = arith.constant 0 : index
    %3 = vector.load %arg2[%c0_3, %c0_4] : memref<1x128xf32, #tpu.memory_space<vmem>>, vector<1x128xf32>
    %4 = vector.broadcast %3 : vector<1x128xf32> to vector<104x128xf32>
    %5 = arith.addf %2, %4 : vector<104x128xf32>
    %cst_5 = arith.constant 0.000000e+00 : f32
    %6 = vector.broadcast %cst_5 : f32 to vector<104x128xf32>
    %7 = arith.maximumf %5, %6 : vector<104x128xf32>
    %c0_6 = arith.constant 0 : index
    %c0_7 = arith.constant 0 : index
    %8 = vector.load %arg3[%c0_6, %c0_7] : memref<104x128xf32, #tpu.memory_space<vmem>>, vector<104x128xf32>
    tpu.vector_store %arg3[%c0_6, %c0_7], %7 {strides = array<i32>} : memref<104x128xf32, #tpu.memory_space<vmem>>, vector<104x128xf32>,
    return
  }
}

module attributes {stable_mosaic.version = 11 : i64} {
  func.func @_fc_fused_kernel(%arg0: memref<8x3136xbf16, #tpu.memory_space<vmem>>, %arg1: memref<3136x512xbf16, #tpu.memory_space<vmem>>, %arg2: memref<1x512xf32, #tpu.memory_space<vmem>>, %arg3: memref<512x128xbf16, #tpu.memory_space<vmem>>, %arg4: memref<1x128xf32, #tpu.memory_space<vmem>>, %arg5: memref<8x128xf32, #tpu.memory_space<vmem>>) attributes {dimension_semantics = [], scalar_prefetch = 0 : i64, scratch_operands = 0 : i64, tpu.core_type = #tpu.core_type<tc>} {
    %c0 = arith.constant 0 : index
    %c0_0 = arith.constant 0 : index
    %0 = vector.load %arg0[%c0, %c0_0] : memref<8x3136xbf16, #tpu.memory_space<vmem>>, vector<8x3136xbf16>
    %c0_1 = arith.constant 0 : index
    %c0_2 = arith.constant 0 : index
    %1 = vector.load %arg1[%c0_1, %c0_2] : memref<3136x512xbf16, #tpu.memory_space<vmem>>, vector<3136x512xbf16>
    %cst = arith.constant dense<0.000000e+00> : vector<8x512xf32>
    %2 = tpu.matmul %0, %1, %cst {dimension_numbers = #tpu.dot_dimension_numbers<[1], [0], [0], [1], [0, 0, 1, 1], [], []>} : vector<8x3136xbf16>, vector<3136x512xbf16>, vector<8x512xf32> -> vector<8x512xf32>
    %c0_3 = arith.constant 0 : index
    %c0_4 = arith.constant 0 : index
    %3 = vector.load %arg2[%c0_3, %c0_4] : memref<1x512xf32, #tpu.memory_space<vmem>>, vector<1x512xf32>
    %4 = vector.broadcast %3 : vector<1x512xf32> to vector<8x512xf32>
    %5 = arith.addf %2, %4 : vector<8x512xf32>
    %cst_5 = arith.constant 0.000000e+00 : f32
    %6 = vector.broadcast %cst_5 : f32 to vector<8x512xf32>
    %7 = arith.maximumf %5, %6 : vector<8x512xf32>
    %8 = arith.truncf %7 : vector<8x512xf32> to vector<8x512xbf16>
    %c0_6 = arith.constant 0 : index
    %c0_7 = arith.constant 0 : index
    %9 = vector.load %arg3[%c0_6, %c0_7] : memref<512x128xbf16, #tpu.memory_space<vmem>>, vector<512x128xbf16>
    %cst_8 = arith.constant dense<0.000000e+00> : vector<8x128xf32>
    %10 = tpu.matmul %8, %9, %cst_8 {dimension_numbers = #tpu.dot_dimension_numbers<[1], [0], [0], [1], [0, 0, 1, 1], [], []>} : vector<8x512xbf16>, vector<512x128xbf16>, vector<8x128xf32> -> vector<8x128xf32>
    %c0_9 = arith.constant 0 : index
    %c0_10 = arith.constant 0 : index
    %11 = vector.load %arg4[%c0_9, %c0_10] : memref<1x128xf32, #tpu.memory_space<vmem>>, vector<1x128xf32>
    %12 = vector.broadcast %11 : vector<1x128xf32> to vector<8x128xf32>
    %13 = arith.addf %10, %12 : vector<8x128xf32>
    %c0_11 = arith.constant 0 : index
    %c0_12 = arith.constant 0 : index
    %14 = vector.load %arg5[%c0_11, %c0_12] : memref<8x128xf32, #tpu.memory_space<vmem>>, vector<8x128xf32>
    tpu.vector_store %arg5[%c0_11, %c0_12], %13 {strides = array<i32>} : memref<8x128xf32, #tpu.memory_space<vmem>>, vector<8x128xf32>,
    return
  }
}

</mosaic_0001>

<bundles_post_ra>
// kernel: dqn_forward.4
= control target key start
LH: loop header
LB: loop body
LE: loop exit
PB: predicated region body
PF: predicated region fallthrough
CT: control target
= control target key end

     0   :  { %vm404_vm0 = vcmask 523264   ;;  %s2158_s1 = inlined_call_operand.vmem [shape: bf16[64,128], index: 1, kind: input, shape index: {}]   ;;  %s2159_s0 = inlined_call_operand.vmem [shape: bf16[800,64], index: 0, kind: input, shape index: {}]   ;;  %s2160_s2 = inlined_call_operand.vmem [shape: f32[1,128], index: 2, kind: input, shape index: {}]   ;;  %s2161_s3 = inlined_call_operand.vmem [shape: f32[800,128], index: 3, kind: output, shape index: {}]  }
   0x1   :  { %v1467_v0 = vld [vmem:[%s2158_s1 + $0x18] sm:$0xff]   ;;  %v1468_v1 = vld [vmem:[%s2158_s1 + $0x10] sm:$0xff]   ;;  %v1469_v2 = vld [vmem:[%s2158_s1 + $0x8] sm:$0xff]  }
   0x2   :  { %1351 = vmatprep.subr.bf16.mxu0 %v1467_v0  ;;  %1459 = vmatprep.subr.bf16.mxu1 %v1467_v0  ;;  %v1471_v3 = vld [vmem:[%s2159_s0] sm:$0xff]   ;;  %v1473_v4 = vld [vmem:[%s2159_s0 + $0xd0] sm:$0xff]   ;;  %v1472_v6 = vld [vmem:[%s2159_s0 + $0x8] sm:$0xff]  }
   0x3   :  { %1352 = vmatpush3.bf16.msra.mxu0 %v1467_v0  ;;  %1463 = vmatpush3.bf16.msra.mxu1 %v1467_v0  ;;  %v1470_v5 = vld [vmem:[%s2158_s1] sm:$0xff]   ;;  %v1474_v7 = vld [vmem:[%s2159_s0 + $0xd8] sm:$0xff]   ;;  %v1475_v8 = vld [vmem:[%s2159_s0 + $0x10] sm:$0xff]  }
   0x4   :  { %1353 = vmatprep.subr.bf16.mxu0 %v1468_v1  ;;  %1460 = vmatprep.subr.bf16.mxu1 %v1468_v1  ;;  %v1477_v9 = vld [vmem:[%s2159_s0 + $0xe0] sm:$0xff]   ;;  %v1476_v10 = vld [vmem:[%s2159_s0 + $0x18] sm:$0xff]   ;;  %v1478_v11 = vld [vmem:[%s2159_s0 + $0xe8] sm:$0xff]  }
   0x5   :  { %1359 = vmatprep.mubr.msk.bf16.mxu0 %vm404_vm0, %v1471_v3  ;;  %1411 = vmatprep.mubr.msk.bf16.mxu1 %vm404_vm0, %v1473_v4  ;;  %v1479_v12 = vld [vmem:[%s2159_s0 + $0x20] sm:$0xff]   ;;  %v1481_v13 = vld [vmem:[%s2159_s0 + $0xf0] sm:$0xff]   ;;  %v1480_v14 = vld [vmem:[%s2159_s0 + $0x28] sm:$0xff]  }
   0x6   :  { %v1482_v15 = vld [vmem:[%s2159_s0 + $0xf8] sm:$0xff]   ;;  %v1483_v16 = vld [vmem:[%s2159_s0 + $0x30] sm:$0xff]   ;;  %v1485_v17 = vld [vmem:[%s2159_s0 + $0x100] sm:$0xff]  }
   0x7   :  { %1354 = vmatpush3.bf16.msra.mxu0 %v1468_v1  ;;  %1464 = vmatpush3.bf16.msra.mxu1 %v1468_v1  ;;  %v1484_v18 = vld [vmem:[%s2159_s0 + $0x38] sm:$0xff]   ;;  %v1486_v19 = vld [vmem:[%s2159_s0 + $0x108] sm:$0xff]   ;;  %v1487_v20 = vld [vmem:[%s2159_s0 + $0x40] sm:$0xff]  }
   0x8   :  { %1355 = vmatprep.subr.bf16.mxu0 %v1469_v2  ;;  %1461 = vmatprep.subr.bf16.mxu1 %v1469_v2  ;;  %v1489_v21 = vld [vmem:[%s2159_s0 + $0x110] sm:$0xff]   ;;  %v1488_v22 = vld [vmem:[%s2159_s0 + $0x48] sm:$0xff]   ;;  %v1490_v23 = vld [vmem:[%s2159_s0 + $0x118] sm:$0xff]  }
   0x9   :  { %v1491_v24 = vld [vmem:[%s2159_s0 + $0x50] sm:$0xff]   ;;  %v1493_v25 = vld [vmem:[%s2159_s0 + $0x120] sm:$0xff]   ;;  %v1492_v26 = vld [vmem:[%s2159_s0 + $0x58] sm:$0xff]  }
   0xa   :  { %v1494_v27 = vld [vmem:[%s2159_s0 + $0x128] sm:$0xff]   ;;  %v1495_v28 = vld [vmem:[%s2159_s0 + $0x60] sm:$0xff]   ;;  %v1497_v29 = vld [vmem:[%s2159_s0 + $0x130] sm:$0xff]  }
   0xb   :  { %1356 = vmatpush3.bf16.msra.mxu0 %v1469_v2  ;;  %1465 = vmatpush3.bf16.msra.mxu1 %v1469_v2  ;;  %v1496_v30 = vld [vmem:[%s2159_s0 + $0x68] sm:$0xff]   ;;  %v1498_v31 = vld [vmem:[%s2159_s0 + $0x138] sm:$0xff]   ;;  %v1499_v32 = vld [vmem:[%s2159_s0 + $0x70] sm:$0xff]  }
   0xc   :  { %1357 = vmatprep.subr.bf16.mxu0 %v1470_v5  ;;  %1462 = vmatprep.subr.bf16.mxu1 %v1470_v5  ;;  %v1501_v33 = vld [vmem:[%s2159_s0 + $0x140] sm:$0xff]   ;;  %v1500_v34 = vld [vmem:[%s2159_s0 + $0x78] sm:$0xff]   ;;  %v1502_v35 = vld [vmem:[%s2159_s0 + $0x148] sm:$0xff]  }
   0xd   :  { %v1503_v36 = vld [vmem:[%s2159_s0 + $0x80] sm:$0xff]   ;;  %v1505_v37 = vld [vmem:[%s2159_s0 + $0x150] sm:$0xff]   ;;  %v1504_v38 = vld [vmem:[%s2159_s0 + $0x88] sm:$0xff]  }
   0xe   :  { %v1506_v39 = vld [vmem:[%s2159_s0 + $0x158] sm:$0xff]   ;;  %v1507_v40 = vld [vmem:[%s2159_s0 + $0x90] sm:$0xff]   ;;  %v1509_v41 = vld [vmem:[%s2159_s0 + $0x160] sm:$0xff]  }
   0xf   :  { %1358 = vmatpush3.bf16.msra.mxu0 %v1470_v5  ;;  %1466 = vmatpush3.bf16.msra.mxu1 %v1470_v5  ;;  %v1508_v42 = vld [vmem:[%s2159_s0 + $0x98] sm:$0xff]   ;;  %v1510_v43 = vld [vmem:[%s2159_s0 + $0x168] sm:$0xff]   ;;  %v1511_v44 = vld [vmem:[%s2159_s0 + $0xa0] sm:$0xff]  }
  0x10   :  { %v1513_v45 = vld [vmem:[%s2159_s0 + $0x170] sm:$0xff]   ;;  %v1512_v46 = vld [vmem:[%s2159_s0 + $0xa8] sm:$0xff]   ;;  %v1514_v47 = vld [vmem:[%s2159_s0 + $0x178] sm:$0xff]  }
  0x11   :  { %v1515_v48 = vld [vmem:[%s2159_s0 + $0xb0] sm:$0xff]   ;;  %v1517_v49 = vld [vmem:[%s2159_s0 + $0x180] sm:$0xff]   ;;  %v1516_v50 = vld [vmem:[%s2159_s0 + $0xb8] sm:$0xff]  }
  0x12   :  { %1360 = vmatmul.mubr.msk.bf16.vlgmr.msra.gmra.mxu0 %vm404_vm0, %v1472_v6  ;;  %1412 = vmatmul.mubr.msk.bf16.vlgmr.msra.gmra.mxu1 %vm404_vm0, %v1474_v7  ;;  %v1518_v51 = vld [vmem:[%s2159_s0 + $0x188] sm:$0xff]   ;;  %v1519_v52 = vld [vmem:[%s2159_s0 + $0xc0] sm:$0xff]  }
  0x13   :  { %1363 = vmatprep.mubr.msk.bf16.mxu0 %vm404_vm0, %v1475_v8  ;;  %1415 = vmatprep.mubr.msk.bf16.mxu1 %vm404_vm0, %v1477_v9  ;;  %v1520_v53 = vld [vmem:[%s2159_s0 + $0xc8] sm:$0xff]   ;;  %v1756_v54 = vld [vmem:[%s2160_s2] ss:$0 sm:$0xff] }
  0x1a   :  { %1364 = vmatmul.mubr.msk.bf16.gmra.mxu0 %vm404_vm0, %v1476_v10  ;;  %1416 = vmatmul.mubr.msk.bf16.gmra.mxu1 %vm404_vm0, %v1478_v11 }
  0x1b   :  { %1367 = vmatprep.mubr.msk.bf16.mxu0 %vm404_vm0, %v1479_v12  ;;  %1419 = vmatprep.mubr.msk.bf16.mxu1 %vm404_vm0, %v1481_v13 }
  0x22   :  { %1368 = vmatmul.mubr.msk.bf16.gmra.mxu0 %vm404_vm0, %v1480_v14  ;;  %1420 = vmatmul.mubr.msk.bf16.gmra.mxu1 %vm404_vm0, %v1482_v15 }
  0x23   :  { %1371 = vmatprep.mubr.msk.bf16.mxu0 %vm404_vm0, %v1483_v16  ;;  %1423 = vmatprep.mubr.msk.bf16.mxu1 %vm404_vm0, %v1485_v17 }
  0x2a   :  { %1372 = vmatmul.mubr.msk.bf16.gmra.mxu0 %vm404_vm0, %v1484_v18  ;;  %1424 = vmatmul.mubr.msk.bf16.gmra.mxu1 %vm404_vm0, %v1486_v19 }
  0x2b   :  { %1375 = vmatprep.mubr.msk.bf16.mxu0 %vm404_vm0, %v1487_v20  ;;  %1427 = vmatprep.mubr.msk.bf16.mxu1 %vm404_vm0, %v1489_v21 }
  0x32   :  { %1376 = vmatmul.mubr.msk.bf16.gmra.mxu0 %vm404_vm0, %v1488_v22  ;;  %1428 = vmatmul.mubr.msk.bf16.gmra.mxu1 %vm404_vm0, %v1490_v23 }
  0x33   :  { %1379 = vmatprep.mubr.msk.bf16.mxu0 %vm404_vm0, %v1491_v24  ;;  %1431 = vmatprep.mubr.msk.bf16.mxu1 %vm404_vm0, %v1493_v25 }
  0x3a   :  { %1380 = vmatmul.mubr.msk.bf16.gmra.mxu0 %vm404_vm0, %v1492_v26  ;;  %1432 = vmatmul.mubr.msk.bf16.gmra.mxu1 %vm404_vm0, %v1494_v27 }
  0x3b   :  { %1383 = vmatprep.mubr.msk.bf16.mxu0 %vm404_vm0, %v1495_v28  ;;  %1435 = vmatprep.mubr.msk.bf16.mxu1 %vm404_vm0, %v1497_v29 }
  0x42   :  { %1384 = vmatmul.mubr.msk.bf16.gmra.mxu0 %vm404_vm0, %v1496_v30  ;;  %1436 = vmatmul.mubr.msk.bf16.gmra.mxu1 %vm404_vm0, %v1498_v31 }
  0x43   :  { %1387 = vmatprep.mubr.msk.bf16.mxu0 %vm404_vm0, %v1499_v32  ;;  %1439 = vmatprep.mubr.msk.bf16.mxu1 %vm404_vm0, %v1501_v33 }
  0x4a   :  { %1388 = vmatmul.mubr.msk.bf16.gmra.mxu0 %vm404_vm0, %v1500_v34  ;;  %1440 = vmatmul.mubr.msk.bf16.gmra.mxu1 %vm404_vm0, %v1502_v35 }
  0x4b   :  { %1391 = vmatprep.mubr.msk.bf16.mxu0 %vm404_vm0, %v1503_v36  ;;  %1443 = vmatprep.mubr.msk.bf16.mxu1 %vm404_vm0, %v1505_v37 }
  0x52   :  { %1392 = vmatmul.mubr.msk.bf16.gmra.mxu0 %vm404_vm0, %v1504_v38  ;;  %1444 = vmatmul.mubr.msk.bf16.gmra.mxu1 %vm404_vm0, %v1506_v39 }
  0x53   :  { %1395 = vmatprep.mubr.msk.bf16.mxu0 %vm404_vm0, %v1507_v40  ;;  %1447 = vmatprep.mubr.msk.bf16.mxu1 %vm404_vm0, %v1509_v41 }
  0x5a   :  { %1396 = vmatmul.mubr.msk.bf16.gmra.mxu0 %vm404_vm0, %v1508_v42  ;;  %1448 = vmatmul.mubr.msk.bf16.gmra.mxu1 %vm404_vm0, %v1510_v43 }
  0x5b   :  { %1399 = vmatprep.mubr.msk.bf16.mxu0 %vm404_vm0, %v1511_v44  ;;  %1451 = vmatprep.mubr.msk.bf16.mxu1 %vm404_vm0, %v1513_v45 }
  0x62   :  { %1400 = vmatmul.mubr.msk.bf16.gmra.mxu0 %vm404_vm0, %v1512_v46  ;;  %1452 = vmatmul.mubr.msk.bf16.gmra.mxu1 %vm404_vm0, %v1514_v47 }
  0x63   :  { %1403 = vmatprep.mubr.msk.bf16.mxu0 %vm404_vm0, %v1515_v48  ;;  %1455 = vmatprep.mubr.msk.bf16.mxu1 %vm404_vm0, %v1517_v49 }
  0x6a   :  { %1404 = vmatmul.mubr.msk.bf16.gmra.mxu0 %vm404_vm0, %v1516_v50  ;;  %1456 = vmatmul.mubr.msk.bf16.gmra.mxu1 %vm404_vm0, %v1518_v51 }
  0x6b   :  { %1407 = vmatprep.mubr.msk.bf16.mxu0 %vm404_vm0, %v1519_v52 }
  0x72   :  { %1408 = vmatmul.mubr.msk.bf16.gmra.mxu0 %vm404_vm0, %v1520_v53 }
  0xd2   :  { %v1361_v55 = vpop.f32.mrf.mxu0  ;;  %v1413_v56 = vpop.f32.mrf.mxu1 }
  0xd3   :  { %v598_v57 = vadd.f32 %v1361_v55, %v1756_v54  ;;  %v806_v58 = vadd.f32 %v1413_v56, %v1756_v54 }
  0xd4   :  { %v589_v59 = vpop.f32.mrf.mxu0  ;;  %v797_v60 = vpop.f32.mrf.mxu1 }
  0xd5   :  { %v990_v61 = vmax.f32 %v598_v57, 0.0  ;;  %v590_v62 = vadd.f32 %v1756_v54, %v589_v59  ;;  %v1042_v63 = vmax.f32 %v806_v58, 0.0  ;;  %v798_v0 = vadd.f32 %v1756_v54, %v797_v60 }
  0xd6   :  { %v1362_v1 = vpop.f32.mrf.mxu0  ;;  %v1414_v2 = vpop.f32.mrf.mxu1 }
  0xd7   :  { %1090 = vst [vmem:[%s2161_s3 + $0x10] sm:$0xff] %v990_v61  ;;  %v988_v3 = vmax.f32 %v590_v62, 0.0  ;;  %1142 = vst [vmem:[%s2161_s3 + $0x1b0] sm:$0xff] %v1042_v63  ;;  %v601_v4 = vadd.f32 %v1362_v1, %v1756_v54  ;;  %v1040_v5 = vmax.f32 %v798_v0, 0.0  ;;  %v809_v6 = vadd.f32 %v1414_v2, %v1756_v54 }
  0xd8   :  { %v592_v7 = vpop.f32.mrf.mxu0  ;;  %v800_v8 = vpop.f32.mrf.mxu1 }
  0xd9   :  { %1088 = vst [vmem:[%s2161_s3] sm:$0xff] %v988_v3  ;;  %v991_v9 = vmax.f32 %v601_v4, 0.0  ;;  %1140 = vst [vmem:[%s2161_s3 + $0x1a0] sm:$0xff] %v1040_v5  ;;  %v593_v10 = vadd.f32 %v1756_v54, %v592_v7  ;;  %v1043_v11 = vmax.f32 %v809_v6, 0.0  ;;  %v801_v12 = vadd.f32 %v1756_v54, %v800_v8 }
  0xda   :  { %v1365_v13 = vpop.f32.mrf.mxu0  ;;  %v1417_v14 = vpop.f32.mrf.mxu1 }
  0xdb   :  { %1091 = vst [vmem:[%s2161_s3 + $0x18] sm:$0xff] %v991_v9  ;;  %v989_v15 = vmax.f32 %v593_v10, 0.0  ;;  %1143 = vst [vmem:[%s2161_s3 + $0x1b8] sm:$0xff] %v1043_v11  ;;  %v614_v16 = vadd.f32 %v1365_v13, %v1756_v54  ;;  %v1041_v17 = vmax.f32 %v801_v12, 0.0  ;;  %v822_v18 = vadd.f32 %v1417_v14, %v1756_v54 }
  0xdc   :  { %v605_v19 = vpop.f32.mrf.mxu0  ;;  %v813_v20 = vpop.f32.mrf.mxu1 }
  0xdd   :  { %1089 = vst [vmem:[%s2161_s3 + $0x8] sm:$0xff] %v989_v15  ;;  %v994_v21 = vmax.f32 %v614_v16, 0.0  ;;  %1141 = vst [vmem:[%s2161_s3 + $0x1a8] sm:$0xff] %v1041_v17  ;;  %v606_v22 = vadd.f32 %v1756_v54, %v605_v19  ;;  %v1046_v23 = vmax.f32 %v822_v18, 0.0  ;;  %v814_v24 = vadd.f32 %v1756_v54, %v813_v20 }
  0xde   :  { %v1366_v25 = vpop.f32.mrf.mxu0  ;;  %v1418_v26 = vpop.f32.mrf.mxu1 }
  0xdf   :  { %1094 = vst [vmem:[%s2161_s3 + $0x30] sm:$0xff] %v994_v21  ;;  %v992_v27 = vmax.f32 %v606_v22, 0.0  ;;  %1146 = vst [vmem:[%s2161_s3 + $0x1d0] sm:$0xff] %v1046_v23  ;;  %v617_v28 = vadd.f32 %v1366_v25, %v1756_v54  ;;  %v1044_v29 = vmax.f32 %v814_v24, 0.0  ;;  %v825_v30 = vadd.f32 %v1418_v26, %v1756_v54 }
  0xe0   :  { %v608_v31 = vpop.f32.mrf.mxu0  ;;  %v816_v32 = vpop.f32.mrf.mxu1 }
  0xe1   :  { %1092 = vst [vmem:[%s2161_s3 + $0x20] sm:$0xff] %v992_v27  ;;  %v995_v33 = vmax.f32 %v617_v28, 0.0  ;;  %1144 = vst [vmem:[%s2161_s3 + $0x1c0] sm:$0xff] %v1044_v29  ;;  %v609_v34 = vadd.f32 %v1756_v54, %v608_v31  ;;  %v1047_v35 = vmax.f32 %v825_v30, 0.0  ;;  %v817_v36 = vadd.f32 %v1756_v54, %v816_v32 }
  0xe2   :  { %v1369_v37 = vpop.f32.mrf.mxu0  ;;  %v1421_v38 = vpop.f32.mrf.mxu1 }
  0xe3   :  { %1095 = vst [vmem:[%s2161_s3 + $0x38] sm:$0xff] %v995_v33  ;;  %v993_v39 = vmax.f32 %v609_v34, 0.0  ;;  %1147 = vst [vmem:[%s2161_s3 + $0x1d8] sm:$0xff] %v1047_v35  ;;  %v630_v40 = vadd.f32 %v1369_v37, %v1756_v54  ;;  %v1045_v41 = vmax.f32 %v817_v36, 0.0  ;;  %v838_v42 = vadd.f32 %v1421_v38, %v1756_v54 }
  0xe4   :  { %v621_v43 = vpop.f32.mrf.mxu0  ;;  %v829_v44 = vpop.f32.mrf.mxu1 }
  0xe5   :  { %1093 = vst [vmem:[%s2161_s3 + $0x28] sm:$0xff] %v993_v39  ;;  %v998_v45 = vmax.f32 %v630_v40, 0.0  ;;  %1145 = vst [vmem:[%s2161_s3 + $0x1c8] sm:$0xff] %v1045_v41  ;;  %v622_v46 = vadd.f32 %v1756_v54, %v621_v43  ;;  %v1050_v47 = vmax.f32 %v838_v42, 0.0  ;;  %v830_v48 = vadd.f32 %v1756_v54, %v829_v44 }
  0xe6   :  { %v1370_v49 = vpop.f32.mrf.mxu0  ;;  %v1422_v50 = vpop.f32.mrf.mxu1 }
  0xe7   :  { %1098 = vst [vmem:[%s2161_s3 + $0x50] sm:$0xff] %v998_v45  ;;  %v996_v51 = vmax.f32 %v622_v46, 0.0  ;;  %1150 = vst [vmem:[%s2161_s3 + $0x1f0] sm:$0xff] %v1050_v47  ;;  %v633_v52 = vadd.f32 %v1370_v49, %v1756_v54  ;;  %v1048_v53 = vmax.f32 %v830_v48, 0.0  ;;  %v841_v55 = vadd.f32 %v1422_v50, %v1756_v54 }
  0xe8   :  { %v624_v56 = vpop.f32.mrf.mxu0  ;;  %v832_v57 = vpop.f32.mrf.mxu1 }
  0xe9   :  { %1096 = vst [vmem:[%s2161_s3 + $0x40] sm:$0xff] %v996_v51  ;;  %v999_v58 = vmax.f32 %v633_v52, 0.0  ;;  %1148 = vst [vmem:[%s2161_s3 + $0x1e0] sm:$0xff] %v1048_v53  ;;  %v625_v59 = vadd.f32 %v1756_v54, %v624_v56  ;;  %v1051_v60 = vmax.f32 %v841_v55, 0.0  ;;  %v833_v61 = vadd.f32 %v1756_v54, %v832_v57 }
  0xea   :  { %v1373_v62 = vpop.f32.mrf.mxu0  ;;  %v1425_v63 = vpop.f32.mrf.mxu1 }
  0xeb   :  { %1099 = vst [vmem:[%s2161_s3 + $0x58] sm:$0xff] %v999_v58  ;;  %v997_v0 = vmax.f32 %v625_v59, 0.0  ;;  %1151 = vst [vmem:[%s2161_s3 + $0x1f8] sm:$0xff] %v1051_v60  ;;  %v646_v1 = vadd.f32 %v1373_v62, %v1756_v54  ;;  %v1049_v2 = vmax.f32 %v833_v61, 0.0  ;;  %v854_v3 = vadd.f32 %v1425_v63, %v1756_v54 }
  0xec   :  { %v637_v4 = vpop.f32.mrf.mxu0  ;;  %v845_v5 = vpop.f32.mrf.mxu1 }
  0xed   :  { %1097 = vst [vmem:[%s2161_s3 + $0x48] sm:$0xff] %v997_v0  ;;  %v1002_v6 = vmax.f32 %v646_v1, 0.0  ;;  %1149 = vst [vmem:[%s2161_s3 + $0x1e8] sm:$0xff] %v1049_v2  ;;  %v638_v7 = vadd.f32 %v1756_v54, %v637_v4  ;;  %v1054_v8 = vmax.f32 %v854_v3, 0.0  ;;  %v846_v9 = vadd.f32 %v1756_v54, %v845_v5 }
  0xee   :  { %v1374_v10 = vpop.f32.mrf.mxu0  ;;  %v1426_v11 = vpop.f32.mrf.mxu1 }
  0xef   :  { %1102 = vst [vmem:[%s2161_s3 + $0x70] sm:$0xff] %v1002_v6  ;;  %v1000_v12 = vmax.f32 %v638_v7, 0.0  ;;  %1154 = vst [vmem:[%s2161_s3 + $0x210] sm:$0xff] %v1054_v8  ;;  %v649_v13 = vadd.f32 %v1374_v10, %v1756_v54  ;;  %v1052_v14 = vmax.f32 %v846_v9, 0.0  ;;  %v857_v15 = vadd.f32 %v1426_v11, %v1756_v54 }
  0xf0   :  { %v640_v16 = vpop.f32.mrf.mxu0  ;;  %v848_v17 = vpop.f32.mrf.mxu1 }
  0xf1   :  { %1100 = vst [vmem:[%s2161_s3 + $0x60] sm:$0xff] %v1000_v12  ;;  %v1003_v18 = vmax.f32 %v649_v13, 0.0  ;;  %1152 = vst [vmem:[%s2161_s3 + $0x200] sm:$0xff] %v1052_v14  ;;  %v641_v19 = vadd.f32 %v1756_v54, %v640_v16  ;;  %v1055_v20 = vmax.f32 %v857_v15, 0.0  ;;  %v849_v21 = vadd.f32 %v1756_v54, %v848_v17 }
  0xf2   :  { %v1377_v22 = vpop.f32.mrf.mxu0  ;;  %v1429_v23 = vpop.f32.mrf.mxu1 }
  0xf3   :  { %1103 = vst [vmem:[%s2161_s3 + $0x78] sm:$0xff] %v1003_v18  ;;  %v1001_v24 = vmax.f32 %v641_v19, 0.0  ;;  %1155 = vst [vmem:[%s2161_s3 + $0x218] sm:$0xff] %v1055_v20  ;;  %v662_v25 = vadd.f32 %v1377_v22, %v1756_v54  ;;  %v1053_v26 = vmax.f32 %v849_v21, 0.0  ;;  %v870_v27 = vadd.f32 %v1429_v23, %v1756_v54 }
  0xf4   :  { %v653_v28 = vpop.f32.mrf.mxu0  ;;  %v861_v29 = vpop.f32.mrf.mxu1 }
  0xf5   :  { %1101 = vst [vmem:[%s2161_s3 + $0x68] sm:$0xff] %v1001_v24  ;;  %v1006_v30 = vmax.f32 %v662_v25, 0.0  ;;  %1153 = vst [vmem:[%s2161_s3 + $0x208] sm:$0xff] %v1053_v26  ;;  %v654_v31 = vadd.f32 %v1756_v54, %v653_v28  ;;  %v1058_v32 = vmax.f32 %v870_v27, 0.0  ;;  %v862_v33 = vadd.f32 %v1756_v54, %v861_v29 }
  0xf6   :  { %v1378_v34 = vpop.f32.mrf.mxu0  ;;  %v1430_v35 = vpop.f32.mrf.mxu1 }
  0xf7   :  { %1106 = vst [vmem:[%s2161_s3 + $0x90] sm:$0xff] %v1006_v30  ;;  %v1004_v36 = vmax.f32 %v654_v31, 0.0  ;;  %1158 = vst [vmem:[%s2161_s3 + $0x230] sm:$0xff] %v1058_v32  ;;  %v665_v37 = vadd.f32 %v1378_v34, %v1756_v54  ;;  %v1056_v38 = vmax.f32 %v862_v33, 0.0  ;;  %v873_v39 = vadd.f32 %v1430_v35, %v1756_v54 }
  0xf8   :  { %v656_v40 = vpop.f32.mrf.mxu0  ;;  %v864_v41 = vpop.f32.mrf.mxu1 }
  0xf9   :  { %1104 = vst [vmem:[%s2161_s3 + $0x80] sm:$0xff] %v1004_v36  ;;  %v1007_v42 = vmax.f32 %v665_v37, 0.0  ;;  %1156 = vst [vmem:[%s2161_s3 + $0x220] sm:$0xff] %v1056_v38  ;;  %v657_v43 = vadd.f32 %v1756_v54, %v656_v40  ;;  %v1059_v44 = vmax.f32 %v873_v39, 0.0  ;;  %v865_v45 = vadd.f32 %v1756_v54, %v864_v41 }
  0xfa   :  { %v1381_v46 = vpop.f32.mrf.mxu0  ;;  %v1433_v47 = vpop.f32.mrf.mxu1 }
  0xfb   :  { %1107 = vst [vmem:[%s2161_s3 + $0x98] sm:$0xff] %v1007_v42  ;;  %v1005_v48 = vmax.f32 %v657_v43, 0.0  ;;  %1159 = vst [vmem:[%s2161_s3 + $0x238] sm:$0xff] %v1059_v44  ;;  %v678_v49 = vadd.f32 %v1381_v46, %v1756_v54  ;;  %v1057_v50 = vmax.f32 %v865_v45, 0.0  ;;  %v886_v51 = vadd.f32 %v1433_v47, %v1756_v54 }
  0xfc   :  { %v669_v52 = vpop.f32.mrf.mxu0  ;;  %v877_v53 = vpop.f32.mrf.mxu1 }
  0xfd   :  { %1105 = vst [vmem:[%s2161_s3 + $0x88] sm:$0xff] %v1005_v48  ;;  %v1010_v55 = vmax.f32 %v678_v49, 0.0  ;;  %1157 = vst [vmem:[%s2161_s3 + $0x228] sm:$0xff] %v1057_v50  ;;  %v670_v56 = vadd.f32 %v1756_v54, %v669_v52  ;;  %v1062_v57 = vmax.f32 %v886_v51, 0.0  ;;  %v878_v58 = vadd.f32 %v1756_v54, %v877_v53 }
  0xfe   :  { %v1382_v59 = vpop.f32.mrf.mxu0  ;;  %v1434_v60 = vpop.f32.mrf.mxu1 }
  0xff   :  { %1110 = vst [vmem:[%s2161_s3 + $0xb0] sm:$0xff] %v1010_v55  ;;  %v1008_v61 = vmax.f32 %v670_v56, 0.0  ;;  %1162 = vst [vmem:[%s2161_s3 + $0x250] sm:$0xff] %v1062_v57  ;;  %v681_v62 = vadd.f32 %v1382_v59, %v1756_v54  ;;  %v1060_v63 = vmax.f32 %v878_v58, 0.0  ;;  %v889_v0 = vadd.f32 %v1434_v60, %v1756_v54 }
 0x100   :  { %v672_v1 = vpop.f32.mrf.mxu0  ;;  %v880_v2 = vpop.f32.mrf.mxu1 }
 0x101   :  { %1108 = vst [vmem:[%s2161_s3 + $0xa0] sm:$0xff] %v1008_v61  ;;  %v1011_v3 = vmax.f32 %v681_v62, 0.0  ;;  %1160 = vst [vmem:[%s2161_s3 + $0x240] sm:$0xff] %v1060_v63  ;;  %v673_v4 = vadd.f32 %v1756_v54, %v672_v1  ;;  %v1063_v5 = vmax.f32 %v889_v0, 0.0  ;;  %v881_v6 = vadd.f32 %v1756_v54, %v880_v2 }
 0x102   :  { %v1385_v7 = vpop.f32.mrf.mxu0  ;;  %v1437_v8 = vpop.f32.mrf.mxu1 }
 0x103   :  { %1111 = vst [vmem:[%s2161_s3 + $0xb8] sm:$0xff] %v1011_v3  ;;  %v1009_v9 = vmax.f32 %v673_v4, 0.0  ;;  %1163 = vst [vmem:[%s2161_s3 + $0x258] sm:$0xff] %v1063_v5  ;;  %v694_v10 = vadd.f32 %v1385_v7, %v1756_v54  ;;  %v1061_v11 = vmax.f32 %v881_v6, 0.0  ;;  %v902_v12 = vadd.f32 %v1437_v8, %v1756_v54 }
 0x104   :  { %v685_v13 = vpop.f32.mrf.mxu0  ;;  %v893_v14 = vpop.f32.mrf.mxu1 }
 0x105   :  { %1109 = vst [vmem:[%s2161_s3 + $0xa8] sm:$0xff] %v1009_v9  ;;  %v1014_v15 = vmax.f32 %v694_v10, 0.0  ;;  %1161 = vst [vmem:[%s2161_s3 + $0x248] sm:$0xff] %v1061_v11  ;;  %v686_v16 = vadd.f32 %v1756_v54, %v685_v13  ;;  %v1066_v17 = vmax.f32 %v902_v12, 0.0  ;;  %v894_v18 = vadd.f32 %v1756_v54, %v893_v14 }
 0x106   :  { %v1386_v19 = vpop.f32.mrf.mxu0  ;;  %v1438_v20 = vpop.f32.mrf.mxu1 }
 0x107   :  { %1114 = vst [vmem:[%s2161_s3 + $0xd0] sm:$0xff] %v1014_v15  ;;  %v1012_v21 = vmax.f32 %v686_v16, 0.0  ;;  %1166 = vst [vmem:[%s2161_s3 + $0x270] sm:$0xff] %v1066_v17  ;;  %v697_v22 = vadd.f32 %v1386_v19, %v1756_v54  ;;  %v1064_v23 = vmax.f32 %v894_v18, 0.0  ;;  %v905_v24 = vadd.f32 %v1438_v20, %v1756_v54 }
 0x108   :  { %v688_v25 = vpop.f32.mrf.mxu0  ;;  %v896_v26 = vpop.f32.mrf.mxu1 }
 0x109   :  { %1112 = vst [vmem:[%s2161_s3 + $0xc0] sm:$0xff] %v1012_v21  ;;  %v1015_v27 = vmax.f32 %v697_v22, 0.0  ;;  %1164 = vst [vmem:[%s2161_s3 + $0x260] sm:$0xff] %v1064_v23  ;;  %v689_v28 = vadd.f32 %v1756_v54, %v688_v25  ;;  %v1067_v29 = vmax.f32 %v905_v24, 0.0  ;;  %v897_v30 = vadd.f32 %v1756_v54, %v896_v26 }
 0x10a   :  { %v1389_v31 = vpop.f32.mrf.mxu0  ;;  %v1441_v32 = vpop.f32.mrf.mxu1 }
 0x10b   :  { %1115 = vst [vmem:[%s2161_s3 + $0xd8] sm:$0xff] %v1015_v27  ;;  %v1013_v33 = vmax.f32 %v689_v28, 0.0  ;;  %1167 = vst [vmem:[%s2161_s3 + $0x278] sm:$0xff] %v1067_v29  ;;  %v710_v34 = vadd.f32 %v1389_v31, %v1756_v54  ;;  %v1065_v35 = vmax.f32 %v897_v30, 0.0  ;;  %v918_v36 = vadd.f32 %v1441_v32, %v1756_v54 }
 0x10c   :  { %v701_v37 = vpop.f32.mrf.mxu0  ;;  %v909_v38 = vpop.f32.mrf.mxu1 }
 0x10d   :  { %1113 = vst [vmem:[%s2161_s3 + $0xc8] sm:$0xff] %v1013_v33  ;;  %v1018_v39 = vmax.f32 %v710_v34, 0.0  ;;  %1165 = vst [vmem:[%s2161_s3 + $0x268] sm:$0xff] %v1065_v35  ;;  %v702_v40 = vadd.f32 %v1756_v54, %v701_v37  ;;  %v1070_v41 = vmax.f32 %v918_v36, 0.0  ;;  %v910_v42 = vadd.f32 %v1756_v54, %v909_v38 }
 0x10e   :  { %v1390_v43 = vpop.f32.mrf.mxu0  ;;  %v1442_v44 = vpop.f32.mrf.mxu1 }
 0x10f   :  { %1118 = vst [vmem:[%s2161_s3 + $0xf0] sm:$0xff] %v1018_v39  ;;  %v1016_v45 = vmax.f32 %v702_v40, 0.0  ;;  %1170 = vst [vmem:[%s2161_s3 + $0x290] sm:$0xff] %v1070_v41  ;;  %v713_v46 = vadd.f32 %v1390_v43, %v1756_v54  ;;  %v1068_v47 = vmax.f32 %v910_v42, 0.0  ;;  %v921_v48 = vadd.f32 %v1442_v44, %v1756_v54 }
 0x110   :  { %v704_v49 = vpop.f32.mrf.mxu0  ;;  %v912_v50 = vpop.f32.mrf.mxu1 }
 0x111   :  { %1116 = vst [vmem:[%s2161_s3 + $0xe0] sm:$0xff] %v1016_v45  ;;  %v1019_v51 = vmax.f32 %v713_v46, 0.0  ;;  %1168 = vst [vmem:[%s2161_s3 + $0x280] sm:$0xff] %v1068_v47  ;;  %v705_v52 = vadd.f32 %v1756_v54, %v704_v49  ;;  %v1071_v53 = vmax.f32 %v921_v48, 0.0  ;;  %v913_v55 = vadd.f32 %v1756_v54, %v912_v50 }
 0x112   :  { %v1393_v56 = vpop.f32.mrf.mxu0  ;;  %v1445_v57 = vpop.f32.mrf.mxu1 }
 0x113   :  { %1119 = vst [vmem:[%s2161_s3 + $0xf8] sm:$0xff] %v1019_v51  ;;  %v1017_v58 = vmax.f32 %v705_v52, 0.0  ;;  %1171 = vst [vmem:[%s2161_s3 + $0x298] sm:$0xff] %v1071_v53  ;;  %v726_v59 = vadd.f32 %v1393_v56, %v1756_v54  ;;  %v1069_v60 = vmax.f32 %v913_v55, 0.0  ;;  %v934_v61 = vadd.f32 %v1445_v57, %v1756_v54 }
 0x114   :  { %v717_v62 = vpop.f32.mrf.mxu0  ;;  %v925_v63 = vpop.f32.mrf.mxu1 }
 0x115   :  { %1117 = vst [vmem:[%s2161_s3 + $0xe8] sm:$0xff] %v1017_v58  ;;  %v1022_v0 = vmax.f32 %v726_v59, 0.0  ;;  %1169 = vst [vmem:[%s2161_s3 + $0x288] sm:$0xff] %v1069_v60  ;;  %v718_v1 = vadd.f32 %v1756_v54, %v717_v62  ;;  %v1074_v2 = vmax.f32 %v934_v61, 0.0  ;;  %v926_v3 = vadd.f32 %v1756_v54, %v925_v63 }
 0x116   :  { %v1394_v4 = vpop.f32.mrf.mxu0  ;;  %v1446_v5 = vpop.f32.mrf.mxu1 }
 0x117   :  { %1122 = vst [vmem:[%s2161_s3 + $0x110] sm:$0xff] %v1022_v0  ;;  %v1020_v6 = vmax.f32 %v718_v1, 0.0  ;;  %1174 = vst [vmem:[%s2161_s3 + $0x2b0] sm:$0xff] %v1074_v2  ;;  %v729_v7 = vadd.f32 %v1394_v4, %v1756_v54  ;;  %v1072_v8 = vmax.f32 %v926_v3, 0.0  ;;  %v937_v9 = vadd.f32 %v1446_v5, %v1756_v54 }
 0x118   :  { %v720_v10 = vpop.f32.mrf.mxu0  ;;  %v928_v11 = vpop.f32.mrf.mxu1 }
 0x119   :  { %1120 = vst [vmem:[%s2161_s3 + $0x100] sm:$0xff] %v1020_v6  ;;  %v1023_v12 = vmax.f32 %v729_v7, 0.0  ;;  %1172 = vst [vmem:[%s2161_s3 + $0x2a0] sm:$0xff] %v1072_v8  ;;  %v721_v13 = vadd.f32 %v1756_v54, %v720_v10  ;;  %v1075_v14 = vmax.f32 %v937_v9, 0.0  ;;  %v929_v15 = vadd.f32 %v1756_v54, %v928_v11 }
 0x11a   :  { %v1397_v16 = vpop.f32.mrf.mxu0  ;;  %v1449_v17 = vpop.f32.mrf.mxu1 }
 0x11b   :  { %1123 = vst [vmem:[%s2161_s3 + $0x118] sm:$0xff] %v1023_v12  ;;  %v1021_v18 = vmax.f32 %v721_v13, 0.0  ;;  %1175 = vst [vmem:[%s2161_s3 + $0x2b8] sm:$0xff] %v1075_v14  ;;  %v742_v19 = vadd.f32 %v1397_v16, %v1756_v54  ;;  %v1073_v20 = vmax.f32 %v929_v15, 0.0  ;;  %v950_v21 = vadd.f32 %v1449_v17, %v1756_v54 }
 0x11c   :  { %v733_v22 = vpop.f32.mrf.mxu0  ;;  %v941_v23 = vpop.f32.mrf.mxu1 }
 0x11d   :  { %1121 = vst [vmem:[%s2161_s3 + $0x108] sm:$0xff] %v1021_v18  ;;  %v1026_v24 = vmax.f32 %v742_v19, 0.0  ;;  %1173 = vst [vmem:[%s2161_s3 + $0x2a8] sm:$0xff] %v1073_v20  ;;  %v734_v25 = vadd.f32 %v1756_v54, %v733_v22  ;;  %v1078_v26 = vmax.f32 %v950_v21, 0.0  ;;  %v942_v27 = vadd.f32 %v1756_v54, %v941_v23 }
 0x11e   :  { %v1398_v28 = vpop.f32.mrf.mxu0  ;;  %v1450_v29 = vpop.f32.mrf.mxu1 }
 0x11f   :  { %1126 = vst [vmem:[%s2161_s3 + $0x130] sm:$0xff] %v1026_v24  ;;  %v1024_v30 = vmax.f32 %v734_v25, 0.0  ;;  %1178 = vst [vmem:[%s2161_s3 + $0x2d0] sm:$0xff] %v1078_v26  ;;  %v745_v31 = vadd.f32 %v1398_v28, %v1756_v54  ;;  %v1076_v32 = vmax.f32 %v942_v27, 0.0  ;;  %v953_v33 = vadd.f32 %v1450_v29, %v1756_v54 }
 0x120   :  { %v736_v34 = vpop.f32.mrf.mxu0  ;;  %v944_v35 = vpop.f32.mrf.mxu1 }
 0x121   :  { %1124 = vst [vmem:[%s2161_s3 + $0x120] sm:$0xff] %v1024_v30  ;;  %v1027_v36 = vmax.f32 %v745_v31, 0.0  ;;  %1176 = vst [vmem:[%s2161_s3 + $0x2c0] sm:$0xff] %v1076_v32  ;;  %v737_v37 = vadd.f32 %v1756_v54, %v736_v34  ;;  %v1079_v38 = vmax.f32 %v953_v33, 0.0  ;;  %v945_v39 = vadd.f32 %v1756_v54, %v944_v35 }
 0x122   :  { %v1401_v40 = vpop.f32.mrf.mxu0  ;;  %v1453_v41 = vpop.f32.mrf.mxu1 }
 0x123   :  { %1127 = vst [vmem:[%s2161_s3 + $0x138] sm:$0xff] %v1027_v36  ;;  %v1025_v42 = vmax.f32 %v737_v37, 0.0  ;;  %1179 = vst [vmem:[%s2161_s3 + $0x2d8] sm:$0xff] %v1079_v38  ;;  %v758_v43 = vadd.f32 %v1401_v40, %v1756_v54  ;;  %v1077_v44 = vmax.f32 %v945_v39, 0.0  ;;  %v966_v45 = vadd.f32 %v1453_v41, %v1756_v54 }
 0x124   :  { %v749_v46 = vpop.f32.mrf.mxu0  ;;  %v957_v47 = vpop.f32.mrf.mxu1 }
 0x125   :  { %1125 = vst [vmem:[%s2161_s3 + $0x128] sm:$0xff] %v1025_v42  ;;  %v1030_v48 = vmax.f32 %v758_v43, 0.0  ;;  %1177 = vst [vmem:[%s2161_s3 + $0x2c8] sm:$0xff] %v1077_v44  ;;  %v750_v49 = vadd.f32 %v1756_v54, %v749_v46  ;;  %v1082_v50 = vmax.f32 %v966_v45, 0.0  ;;  %v958_v51 = vadd.f32 %v1756_v54, %v957_v47 }
 0x126   :  { %v1402_v52 = vpop.f32.mrf.mxu0  ;;  %v1454_v53 = vpop.f32.mrf.mxu1 }
 0x127   :  { %1130 = vst [vmem:[%s2161_s3 + $0x150] sm:$0xff] %v1030_v48  ;;  %v1028_v55 = vmax.f32 %v750_v49, 0.0  ;;  %1182 = vst [vmem:[%s2161_s3 + $0x2f0] sm:$0xff] %v1082_v50  ;;  %v761_v56 = vadd.f32 %v1402_v52, %v1756_v54  ;;  %v1080_v57 = vmax.f32 %v958_v51, 0.0  ;;  %v969_v58 = vadd.f32 %v1454_v53, %v1756_v54 }
 0x128   :  { %v752_v59 = vpop.f32.mrf.mxu0  ;;  %v960_v60 = vpop.f32.mrf.mxu1 }
 0x129   :  { %1128 = vst [vmem:[%s2161_s3 + $0x140] sm:$0xff] %v1028_v55  ;;  %v1031_v61 = vmax.f32 %v761_v56, 0.0  ;;  %1180 = vst [vmem:[%s2161_s3 + $0x2e0] sm:$0xff] %v1080_v57  ;;  %v753_v62 = vadd.f32 %v1756_v54, %v752_v59  ;;  %v1083_v63 = vmax.f32 %v969_v58, 0.0  ;;  %v961_v0 = vadd.f32 %v1756_v54, %v960_v60 }
 0x12a   :  { %v1405_v1 = vpop.f32.mrf.mxu0  ;;  %v1457_v2 = vpop.f32.mrf.mxu1 }
 0x12b   :  { %1131 = vst [vmem:[%s2161_s3 + $0x158] sm:$0xff] %v1031_v61  ;;  %v1029_v3 = vmax.f32 %v753_v62, 0.0  ;;  %1183 = vst [vmem:[%s2161_s3 + $0x2f8] sm:$0xff] %v1083_v63  ;;  %v774_v4 = vadd.f32 %v1405_v1, %v1756_v54  ;;  %v1081_v5 = vmax.f32 %v961_v0, 0.0  ;;  %v982_v6 = vadd.f32 %v1457_v2, %v1756_v54 }
 0x12c   :  { %v765_v7 = vpop.f32.mrf.mxu0  ;;  %v973_v8 = vpop.f32.mrf.mxu1 }
 0x12d   :  { %1129 = vst [vmem:[%s2161_s3 + $0x148] sm:$0xff] %v1029_v3  ;;  %v1034_v9 = vmax.f32 %v774_v4, 0.0  ;;  %1181 = vst [vmem:[%s2161_s3 + $0x2e8] sm:$0xff] %v1081_v5  ;;  %v766_v10 = vadd.f32 %v1756_v54, %v765_v7  ;;  %v1086_v11 = vmax.f32 %v982_v6, 0.0  ;;  %v974_v12 = vadd.f32 %v1756_v54, %v973_v8 }
 0x12e   :  { %v1406_v13 = vpop.f32.mrf.mxu0  ;;  %v1458_v14 = vpop.f32.mrf.mxu1 }
 0x12f   :  { %1134 = vst [vmem:[%s2161_s3 + $0x170] sm:$0xff] %v1034_v9  ;;  %v1032_v15 = vmax.f32 %v766_v10, 0.0  ;;  %1186 = vst [vmem:[%s2161_s3 + $0x310] sm:$0xff] %v1086_v11  ;;  %v777_v16 = vadd.f32 %v1406_v13, %v1756_v54  ;;  %v1084_v17 = vmax.f32 %v974_v12, 0.0  ;;  %v985_v18 = vadd.f32 %v1458_v14, %v1756_v54 }
 0x130   :  { %v768_v19 = vpop.f32.mrf.mxu0  ;;  %v976_v20 = vpop.f32.mrf.mxu1 }
 0x131   :  { %1132 = vst [vmem:[%s2161_s3 + $0x160] sm:$0xff] %v1032_v15  ;;  %v1035_v21 = vmax.f32 %v777_v16, 0.0  ;;  %1184 = vst [vmem:[%s2161_s3 + $0x300] sm:$0xff] %v1084_v17  ;;  %v769_v22 = vadd.f32 %v1756_v54, %v768_v19  ;;  %v1087_v23 = vmax.f32 %v985_v18, 0.0  ;;  %v977_v24 = vadd.f32 %v1756_v54, %v976_v20 }
 0x132   :  { %v1409_v25 = vpop.f32.mrf.mxu0 }
 0x133   :  { %1135 = vst [vmem:[%s2161_s3 + $0x178] sm:$0xff] %v1035_v21  ;;  %v1033_v26 = vmax.f32 %v769_v22, 0.0  ;;  %1187 = vst [vmem:[%s2161_s3 + $0x318] sm:$0xff] %v1087_v23  ;;  %v790_v27 = vadd.f32 %v1409_v25, %v1756_v54  ;;  %v1085_v28 = vmax.f32 %v977_v24, 0.0 }
 0x134   :  { %v781_v29 = vpop.f32.mrf.mxu0 }
 0x135   :  { %1133 = vst [vmem:[%s2161_s3 + $0x168] sm:$0xff] %v1033_v26  ;;  %v1038_v30 = vmax.f32 %v790_v27, 0.0  ;;  %1185 = vst [vmem:[%s2161_s3 + $0x308] sm:$0xff] %v1085_v28  ;;  %v782_v31 = vadd.f32 %v1756_v54, %v781_v29 }
 0x136   :  { %v1410_v32 = vpop.f32.mrf.mxu0 }
 0x137   :  { %1138 = vst [vmem:[%s2161_s3 + $0x190] sm:$0xff] %v1038_v30  ;;  %v1036_v33 = vmax.f32 %v782_v31, 0.0  ;;  %v793_v34 = vadd.f32 %v1410_v32, %v1756_v54 }
 0x138   :  { %v784_v35 = vpop.f32.mrf.mxu0 }
 0x139   :  { %1136 = vst [vmem:[%s2161_s3 + $0x180] sm:$0xff] %v1036_v33  ;;  %v1039_v36 = vmax.f32 %v793_v34, 0.0  ;;  %v785_v37 = vadd.f32 %v1756_v54, %v784_v35 }
 0x13b   :  { %1139 = vst [vmem:[%s2161_s3 + $0x198] sm:$0xff] %v1039_v36  ;;  %v1037_v38 = vmax.f32 %v785_v37, 0.0 }
 0x13d   :  { %1137 = vst [vmem:[%s2161_s3 + $0x188] sm:$0xff] %v1037_v38 }

// kernel: dqn_forward.5
= control target key start
LH: loop header
LB: loop body
LE: loop exit
PB: predicated region body
PF: predicated region fallthrough
CT: control target
= control target key end

     0   :  { %s1144_s1 = inlined_call_operand.vmem [shape: bf16[512,128], index: 1, kind: input, shape index: {}]   ;;  %s1145_s0 = inlined_call_operand.vmem [shape: bf16[104,512], index: 0, kind: input, shape index: {}]   ;;  %s1146_s2 = inlined_call_operand.vmem [shape: f32[1,128], index: 2, kind: input, shape index: {}]   ;;  %s1147_s3 = inlined_call_operand.vmem [shape: f32[104,128], index: 3, kind: output, shape index: {}]  }
   0x1   :  { %v821_v0 = vld [vmem:[%s1144_s1 + $0x78] sm:$0xff]   ;;  %v825_v4 = vld [vmem:[%s1144_s1 + $0x70] sm:$0xff]   ;;  %v829_v8 = vld [vmem:[%s1144_s1 + $0x68] sm:$0xff]  }
   0x2   :  { %v822_v1 = vld [vmem:[%s1144_s1 + $0xf8] sm:$0xff]   ;;  %705 = vmatprep.subr.bf16.mxu0 %v821_v0  ;;  %v826_v5 = vld [vmem:[%s1144_s1 + $0xf0] sm:$0xff]   ;;  %v830_v9 = vld [vmem:[%s1144_s1 + $0xe8] sm:$0xff]  }
   0x3   :  { %v823_v2 = vld [vmem:[%s1144_s1 + $0x38] sm:$0xff]   ;;  %763 = vmatprep.subr.bf16.mxu1 %v822_v1  ;;  %v827_v6 = vld [vmem:[%s1144_s1 + $0x30] sm:$0xff]   ;;  %v831_v10 = vld [vmem:[%s1144_s1 + $0x28] sm:$0xff]  }
   0x4   :  { %v824_v3 = vld [vmem:[%s1144_s1 + $0xb8] sm:$0xff]   ;;  %706 = vmatpush3.bf16.msra.mxu0 %v823_v2  ;;  %v828_v7 = vld [vmem:[%s1144_s1 + $0xb0] sm:$0xff]   ;;  %v832_v11 = vld [vmem:[%s1144_s1 + $0xa8] sm:$0xff]  }
   0x5   :  { %764 = vmatpush3.bf16.msra.mxu1 %v824_v3  ;;  %707 = vmatprep.subr.bf16.mxu0 %v825_v4  ;;  %v833_v12 = vld [vmem:[%s1144_s1 + $0x60] sm:$0xff]   ;;  %v837_v16 = vld [vmem:[%s1144_s1 + $0x58] sm:$0xff]   ;;  %v841_v20 = vld [vmem:[%s1144_s1 + $0x50] sm:$0xff]  }
   0x6   :  { %765 = vmatprep.subr.bf16.mxu1 %v826_v5  ;;  %v834_v13 = vld [vmem:[%s1144_s1 + $0xe0] sm:$0xff]   ;;  %v838_v17 = vld [vmem:[%s1144_s1 + $0xd8] sm:$0xff]   ;;  %v842_v21 = vld [vmem:[%s1144_s1 + $0xd0] sm:$0xff]  }
   0x7   :  { %v835_v14 = vld [vmem:[%s1144_s1 + $0x20] sm:$0xff]   ;;  %v839_v18 = vld [vmem:[%s1144_s1 + $0x18] sm:$0xff]   ;;  %v843_v22 = vld [vmem:[%s1144_s1 + $0x10] sm:$0xff]  }
   0x8   :  { %708 = vmatpush3.bf16.msra.mxu0 %v827_v6  ;;  %v836_v15 = vld [vmem:[%s1144_s1 + $0xa0] sm:$0xff]   ;;  %v840_v19 = vld [vmem:[%s1144_s1 + $0x98] sm:$0xff]   ;;  %v844_v23 = vld [vmem:[%s1144_s1 + $0x90] sm:$0xff]  }
   0x9   :  { %766 = vmatpush3.bf16.msra.mxu1 %v828_v7  ;;  %709 = vmatprep.subr.bf16.mxu0 %v829_v8  ;;  %v845_v24 = vld [vmem:[%s1144_s1 + $0x48] sm:$0xff]   ;;  %v849_v28 = vld [vmem:[%s1144_s1 + $0x40] sm:$0xff]  }
   0xa   :  { %767 = vmatprep.subr.bf16.mxu1 %v830_v9  ;;  %v846_v25 = vld [vmem:[%s1144_s1 + $0xc8] sm:$0xff]   ;;  %v850_v29 = vld [vmem:[%s1144_s1 + $0xc0] sm:$0xff]  }
   0xb   :  { %v847_v26 = vld [vmem:[%s1144_s1 + $0x8] sm:$0xff]   ;;  %v851_v30 = vld [vmem:[%s1144_s1] sm:$0xff]  }
   0xc   :  { %710 = vmatpush3.bf16.msra.mxu0 %v831_v10  ;;  %v848_v27 = vld [vmem:[%s1144_s1 + $0x88] sm:$0xff]   ;;  %v852_v31 = vld [vmem:[%s1144_s1 + $0x80] sm:$0xff]  }
   0xd   :  { %768 = vmatpush3.bf16.msra.mxu1 %v832_v11  ;;  %711 = vmatprep.subr.bf16.mxu0 %v833_v12  ;;  %v853_v32 = vld [vmem:[%s1145_s0] ss:$16 sps:$4 sm:$0xff]   ;;  %v855_v33 = vld [vmem:[%s1145_s0 + $0x4] ss:$16 sps:$4 sm:$0xff]   ;;  %v856_v34 = vld [vmem:[%s1145_s0 + $0x8] ss:$16 sps:$4 sm:$0xff]  }
   0xe   :  { %769 = vmatprep.subr.bf16.mxu1 %v834_v13  ;;  %v858_v35 = vld [vmem:[%s1145_s0 + $0xc] ss:$16 sps:$4 sm:$0xff]   ;;  %470 = vmatprep.mubr.bf16.mxu0 %v855_v33  ;;  %v859_v36 = vld [vmem:[%s1145_s0 + $0x24] ss:$16 sps:$4 sm:$0xff]   ;;  %v863_v38 = vld [vmem:[%s1145_s0 + $0x20] ss:$16 sps:$4 sm:$0xff]  }
   0xf   :  { %558 = vmatprep.mubr.bf16.mxu1 %v858_v35  ;;  %v861_v37 = vld [vmem:[%s1145_s0 + $0x2c] ss:$16 sps:$4 sm:$0xff]   ;;  %v864_v39 = vld [vmem:[%s1145_s0 + $0x28] ss:$16 sps:$4 sm:$0xff]   ;;  %v865_v40 = vld [vmem:[%s1145_s0 + $0x44] ss:$16 sps:$4 sm:$0xff]  }
  0x10   :  { %712 = vmatpush3.bf16.msra.mxu0 %v835_v14  ;;  %v867_v41 = vld [vmem:[%s1145_s0 + $0x4c] ss:$16 sps:$4 sm:$0xff]   ;;  %v869_v42 = vld [vmem:[%s1145_s0 + $0x40] ss:$16 sps:$4 sm:$0xff]   ;;  %v870_v43 = vld [vmem:[%s1145_s0 + $0x48] ss:$16 sps:$4 sm:$0xff]  }
  0x11   :  { %770 = vmatpush3.bf16.msra.mxu1 %v836_v15  ;;  %713 = vmatprep.subr.bf16.mxu0 %v837_v16  ;;  %v871_v44 = vld [vmem:[%s1145_s0 + $0x64] ss:$16 sps:$4 sm:$0xff]   ;;  %v873_v45 = vld [vmem:[%s1145_s0 + $0x6c] ss:$16 sps:$4 sm:$0xff]   ;;  %v875_v46 = vld [vmem:[%s1145_s0 + $0x60] ss:$16 sps:$4 sm:$0xff]  }
  0x12   :  { %771 = vmatprep.subr.bf16.mxu1 %v838_v17  ;;  %v876_v47 = vld [vmem:[%s1145_s0 + $0x68] ss:$16 sps:$4 sm:$0xff]   ;;  %v877_v48 = vld [vmem:[%s1145_s0 + $0x84] ss:$16 sps:$4 sm:$0xff]   ;;  %v879_v49 = vld [vmem:[%s1145_s0 + $0x8c] ss:$16 sps:$4 sm:$0xff]  }
  0x13   :  { %v881_v50 = vld [vmem:[%s1145_s0 + $0x80] ss:$16 sps:$4 sm:$0xff]   ;;  %v882_v51 = vld [vmem:[%s1145_s0 + $0x88] ss:$16 sps:$4 sm:$0xff]   ;;  %v883_v52 = vld [vmem:[%s1145_s0 + $0xa4] ss:$16 sps:$4 sm:$0xff]  }
  0x14   :  { %714 = vmatpush3.bf16.msra.mxu0 %v839_v18  ;;  %v885_v53 = vld [vmem:[%s1145_s0 + $0xac] ss:$16 sps:$4 sm:$0xff]   ;;  %v39_v54 = vld [vmem:[%s1145_s0 + $0xc0] sm:$0xff]  ;;  %v888_v57 = vld [vmem:[%s1145_s0 + $0xa8] ss:$16 sps:$4 sm:$0xff]  }
  0x15   :  { %772 = vmatpush3.bf16.msra.mxu1 %v840_v19  ;;  %715 = vmatprep.subr.bf16.mxu0 %v841_v20  ;;  %v40_v55 = vld [vmem:[%s1145_s0 + $0xc8] sm:$0xff]  ;;  %v887_v56 = vld [vmem:[%s1145_s0 + $0xa0] ss:$16 sps:$4 sm:$0xff]   ;;  %v670_v58 = vcombine.high %v39_v54, %v39_v54  ;;  %v669_v60 = vcombine.low %v39_v54, %v39_v54 }
  0x16   :  { %773 = vmatprep.subr.bf16.mxu1 %v842_v21  ;;  %v672_v59 = vcombine.high %v40_v55, %v40_v55  ;;  %v671_v61 = vcombine.low %v40_v55, %v40_v55  ;;  %v1090_v0 = vld [vmem:[%s1146_s2] ss:$0 sm:$0xff] }
  0x18   :  { %716 = vmatpush3.bf16.msra.mxu0 %v843_v22 }
  0x19   :  { %774 = vmatpush3.bf16.msra.mxu1 %v844_v23  ;;  %717 = vmatprep.subr.bf16.mxu0 %v845_v24 }
  0x1a   :  { %775 = vmatprep.subr.bf16.mxu1 %v846_v25 }
  0x1c   :  { %718 = vmatpush3.bf16.msra.mxu0 %v847_v26 }
  0x1d   :  { %776 = vmatpush3.bf16.msra.mxu1 %v848_v27  ;;  %719 = vmatprep.subr.bf16.mxu0 %v849_v28 }
  0x1e   :  { %777 = vmatprep.subr.bf16.mxu1 %v850_v29 }
  0x20   :  { %720 = vmatpush3.bf16.msra.mxu0 %v851_v30 }
  0x21   :  { %778 = vmatpush3.bf16.msra.mxu1 %v852_v31 }
  0x23   :  { %471 = vmatmul.mubr.bf16.vlgmr.msra.gmra.mxu0 %v853_v32 }
  0x24   :  { %559 = vmatmul.mubr.bf16.vlgmr.msra.gmra.mxu1 %v856_v34  ;;  %478 = vmatprep.mubr.bf16.mxu0 %v859_v36 }
  0x25   :  { %566 = vmatprep.mubr.bf16.mxu1 %v861_v37 }
  0x2b   :  { %479 = vmatmul.mubr.bf16.gmra.mxu0 %v863_v38 }
  0x2c   :  { %567 = vmatmul.mubr.bf16.gmra.mxu1 %v864_v39  ;;  %486 = vmatprep.mubr.bf16.mxu0 %v865_v40 }
  0x2d   :  { %574 = vmatprep.mubr.bf16.mxu1 %v867_v41 }
  0x33   :  { %487 = vmatmul.mubr.bf16.gmra.mxu0 %v869_v42 }
  0x34   :  { %575 = vmatmul.mubr.bf16.gmra.mxu1 %v870_v43  ;;  %494 = vmatprep.mubr.bf16.mxu0 %v871_v44 }
  0x35   :  { %582 = vmatprep.mubr.bf16.mxu1 %v873_v45 }
  0x3b   :  { %495 = vmatmul.mubr.bf16.gmra.mxu0 %v875_v46 }
  0x3c   :  { %583 = vmatmul.mubr.bf16.gmra.mxu1 %v876_v47  ;;  %502 = vmatprep.mubr.bf16.mxu0 %v877_v48 }
  0x3d   :  { %590 = vmatprep.mubr.bf16.mxu1 %v879_v49 }
  0x43   :  { %503 = vmatmul.mubr.bf16.gmra.mxu0 %v881_v50 }
  0x44   :  { %591 = vmatmul.mubr.bf16.gmra.mxu1 %v882_v51  ;;  %510 = vmatprep.mubr.bf16.mxu0 %v883_v52 }
  0x45   :  { %598 = vmatprep.mubr.bf16.mxu1 %v885_v53 }
  0x4b   :  { %511 = vmatmul.mubr.bf16.gmra.mxu0 %v887_v56 }
  0x4c   :  { %599 = vmatmul.mubr.bf16.gmra.mxu1 %v888_v57  ;;  %518 = vmatprep.mubr.bf16.mxu0 %v670_v58 }
  0x4d   :  { %606 = vmatprep.mubr.bf16.mxu1 %v672_v59 }
  0x53   :  { %519 = vmatmul.mubr.bf16.gmra.mxu0 %v669_v60 }
  0x54   :  { %607 = vmatmul.mubr.bf16.gmra.mxu1 %v671_v61 }
  0xe3   :  { %v721_v62 = vpop.f32.mrf.mxu0 }
  0xe4   :  { %v779_v63 = vpop.f32.mrf.mxu1 }
  0xe5   :  { %v722_v1 = vpop.f32.mrf.mxu0 }
  0xe6   :  { %v723_v2 = vadd.f32 %v722_v1, %v721_v62  ;;  %v780_v3 = vpop.f32.mrf.mxu1 }
  0xe7   :  { %v724_v4 = vpop.f32.mrf.mxu0  ;;  %v781_v6 = vadd.f32 %v780_v3, %v779_v63 }
  0xe8   :  { %v473_v5 = vadd.f32 %v723_v2, %v1090_v0  ;;  %v782_v7 = vpop.f32.mrf.mxu1 }
  0xe9   :  { %v725_v8 = vpop.f32.mrf.mxu0 }
  0xea   :  { %v561_v9 = vadd.f32 %v781_v6, %v473_v5  ;;  %v726_v10 = vadd.f32 %v725_v8, %v724_v4  ;;  %v783_v11 = vpop.f32.mrf.mxu1 }
  0xeb   :  { %v727_v12 = vpop.f32.mrf.mxu0  ;;  %v784_v15 = vadd.f32 %v783_v11, %v782_v7 }
  0xec   :  { %v614_v13 = vmax.f32 %v561_v9, 0.0  ;;  %v476_v14 = vadd.f32 %v726_v10, %v1090_v0  ;;  %v785_v16 = vpop.f32.mrf.mxu1 }
  0xed   :  { %v728_v17 = vpop.f32.mrf.mxu0 }
  0xee   :  { %627 = vst [vmem:[%s1147_s3] sm:$0xff] %v614_v13  ;;  %v564_v18 = vadd.f32 %v784_v15, %v476_v14  ;;  %v729_v19 = vadd.f32 %v728_v17, %v727_v12  ;;  %v786_v20 = vpop.f32.mrf.mxu1 }
  0xef   :  { %v730_v21 = vpop.f32.mrf.mxu0  ;;  %v787_v24 = vadd.f32 %v786_v20, %v785_v16 }
  0xf0   :  { %v615_v22 = vmax.f32 %v564_v18, 0.0  ;;  %v481_v23 = vadd.f32 %v729_v19, %v1090_v0  ;;  %v788_v25 = vpop.f32.mrf.mxu1 }
  0xf1   :  { %v731_v26 = vpop.f32.mrf.mxu0 }
  0xf2   :  { %628 = vst [vmem:[%s1147_s3 + $0x8] sm:$0xff] %v615_v22  ;;  %v569_v27 = vadd.f32 %v787_v24, %v481_v23  ;;  %v732_v28 = vadd.f32 %v731_v26, %v730_v21  ;;  %v789_v29 = vpop.f32.mrf.mxu1 }
  0xf3   :  { %v733_v30 = vpop.f32.mrf.mxu0  ;;  %v790_v33 = vadd.f32 %v789_v29, %v788_v25 }
  0xf4   :  { %v616_v31 = vmax.f32 %v569_v27, 0.0  ;;  %v484_v32 = vadd.f32 %v732_v28, %v1090_v0  ;;  %v791_v34 = vpop.f32.mrf.mxu1 }
  0xf5   :  { %v734_v35 = vpop.f32.mrf.mxu0 }
  0xf6   :  { %629 = vst [vmem:[%s1147_s3 + $0x10] sm:$0xff] %v616_v31  ;;  %v572_v36 = vadd.f32 %v790_v33, %v484_v32  ;;  %v735_v37 = vadd.f32 %v734_v35, %v733_v30  ;;  %v792_v38 = vpop.f32.mrf.mxu1 }
  0xf7   :  { %v736_v39 = vpop.f32.mrf.mxu0  ;;  %v793_v42 = vadd.f32 %v792_v38, %v791_v34 }
  0xf8   :  { %v617_v40 = vmax.f32 %v572_v36, 0.0  ;;  %v489_v41 = vadd.f32 %v735_v37, %v1090_v0  ;;  %v794_v43 = vpop.f32.mrf.mxu1 }
  0xf9   :  { %v737_v44 = vpop.f32.mrf.mxu0 }
  0xfa   :  { %630 = vst [vmem:[%s1147_s3 + $0x18] sm:$0xff] %v617_v40  ;;  %v577_v45 = vadd.f32 %v793_v42, %v489_v41  ;;  %v738_v46 = vadd.f32 %v737_v44, %v736_v39  ;;  %v795_v47 = vpop.f32.mrf.mxu1 }
  0xfb   :  { %v739_v48 = vpop.f32.mrf.mxu0  ;;  %v796_v51 = vadd.f32 %v795_v47, %v794_v43 }
  0xfc   :  { %v618_v49 = vmax.f32 %v577_v45, 0.0  ;;  %v492_v50 = vadd.f32 %v738_v46, %v1090_v0  ;;  %v797_v52 = vpop.f32.mrf.mxu1 }
  0xfd   :  { %v740_v53 = vpop.f32.mrf.mxu0 }
  0xfe   :  { %631 = vst [vmem:[%s1147_s3 + $0x20] sm:$0xff] %v618_v49  ;;  %v580_v54 = vadd.f32 %v796_v51, %v492_v50  ;;  %v741_v55 = vadd.f32 %v740_v53, %v739_v48  ;;  %v798_v56 = vpop.f32.mrf.mxu1 }
  0xff   :  { %v742_v57 = vpop.f32.mrf.mxu0  ;;  %v799_v60 = vadd.f32 %v798_v56, %v797_v52 }
 0x100   :  { %v619_v58 = vmax.f32 %v580_v54, 0.0  ;;  %v497_v59 = vadd.f32 %v741_v55, %v1090_v0  ;;  %v800_v61 = vpop.f32.mrf.mxu1 }
 0x101   :  { %v743_v62 = vpop.f32.mrf.mxu0 }
 0x102   :  { %632 = vst [vmem:[%s1147_s3 + $0x28] sm:$0xff] %v619_v58  ;;  %v585_v63 = vadd.f32 %v799_v60, %v497_v59  ;;  %v744_v1 = vadd.f32 %v743_v62, %v742_v57  ;;  %v801_v2 = vpop.f32.mrf.mxu1 }
 0x103   :  { %v745_v3 = vpop.f32.mrf.mxu0  ;;  %v802_v6 = vadd.f32 %v801_v2, %v800_v61 }
 0x104   :  { %v620_v4 = vmax.f32 %v585_v63, 0.0  ;;  %v500_v5 = vadd.f32 %v744_v1, %v1090_v0  ;;  %v803_v7 = vpop.f32.mrf.mxu1 }
 0x105   :  { %v746_v8 = vpop.f32.mrf.mxu0 }
 0x106   :  { %633 = vst [vmem:[%s1147_s3 + $0x30] sm:$0xff] %v620_v4  ;;  %v588_v9 = vadd.f32 %v802_v6, %v500_v5  ;;  %v747_v10 = vadd.f32 %v746_v8, %v745_v3  ;;  %v804_v11 = vpop.f32.mrf.mxu1 }
 0x107   :  { %v748_v12 = vpop.f32.mrf.mxu0  ;;  %v805_v15 = vadd.f32 %v804_v11, %v803_v7 }
 0x108   :  { %v621_v13 = vmax.f32 %v588_v9, 0.0  ;;  %v505_v14 = vadd.f32 %v747_v10, %v1090_v0  ;;  %v806_v16 = vpop.f32.mrf.mxu1 }
 0x109   :  { %v749_v17 = vpop.f32.mrf.mxu0 }
 0x10a   :  { %634 = vst [vmem:[%s1147_s3 + $0x38] sm:$0xff] %v621_v13  ;;  %v593_v18 = vadd.f32 %v805_v15, %v505_v14  ;;  %v750_v19 = vadd.f32 %v749_v17, %v748_v12  ;;  %v807_v20 = vpop.f32.mrf.mxu1 }
 0x10b   :  { %v751_v21 = vpop.f32.mrf.mxu0  ;;  %v808_v24 = vadd.f32 %v807_v20, %v806_v16 }
 0x10c   :  { %v622_v22 = vmax.f32 %v593_v18, 0.0  ;;  %v508_v23 = vadd.f32 %v750_v19, %v1090_v0  ;;  %v809_v25 = vpop.f32.mrf.mxu1 }
 0x10d   :  { %v752_v26 = vpop.f32.mrf.mxu0 }
 0x10e   :  { %635 = vst [vmem:[%s1147_s3 + $0x40] sm:$0xff] %v622_v22  ;;  %v596_v27 = vadd.f32 %v808_v24, %v508_v23  ;;  %v753_v28 = vadd.f32 %v752_v26, %v751_v21  ;;  %v810_v29 = vpop.f32.mrf.mxu1 }
 0x10f   :  { %v754_v30 = vpop.f32.mrf.mxu0  ;;  %v811_v33 = vadd.f32 %v810_v29, %v809_v25 }
 0x110   :  { %v623_v31 = vmax.f32 %v596_v27, 0.0  ;;  %v513_v32 = vadd.f32 %v753_v28, %v1090_v0  ;;  %v812_v34 = vpop.f32.mrf.mxu1 }
 0x111   :  { %v755_v35 = vpop.f32.mrf.mxu0 }
 0x112   :  { %636 = vst [vmem:[%s1147_s3 + $0x48] sm:$0xff] %v623_v31  ;;  %v601_v36 = vadd.f32 %v811_v33, %v513_v32  ;;  %v756_v37 = vadd.f32 %v755_v35, %v754_v30  ;;  %v813_v38 = vpop.f32.mrf.mxu1 }
 0x113   :  { %v757_v39 = vpop.f32.mrf.mxu0  ;;  %v814_v42 = vadd.f32 %v813_v38, %v812_v34 }
 0x114   :  { %v624_v40 = vmax.f32 %v601_v36, 0.0  ;;  %v516_v41 = vadd.f32 %v756_v37, %v1090_v0  ;;  %v815_v43 = vpop.f32.mrf.mxu1 }
 0x115   :  { %v758_v44 = vpop.f32.mrf.mxu0 }
 0x116   :  { %637 = vst [vmem:[%s1147_s3 + $0x50] sm:$0xff] %v624_v40  ;;  %v604_v45 = vadd.f32 %v814_v42, %v516_v41  ;;  %v759_v46 = vadd.f32 %v758_v44, %v757_v39  ;;  %v816_v47 = vpop.f32.mrf.mxu1 }
 0x117   :  { %v760_v48 = vpop.f32.mrf.mxu0  ;;  %v817_v51 = vadd.f32 %v816_v47, %v815_v43 }
 0x118   :  { %v625_v49 = vmax.f32 %v604_v45, 0.0  ;;  %v521_v50 = vadd.f32 %v759_v46, %v1090_v0  ;;  %v818_v52 = vpop.f32.mrf.mxu1 }
 0x119   :  { %v761_v53 = vpop.f32.mrf.mxu0 }
 0x11a   :  { %638 = vst [vmem:[%s1147_s3 + $0x58] sm:$0xff] %v625_v49  ;;  %v609_v54 = vadd.f32 %v817_v51, %v521_v50  ;;  %v819_v55 = vpop.f32.mrf.mxu1 }
 0x11c   :  { %v626_v56 = vmax.f32 %v609_v54, 0.0 }
 0x11e   :  { %639 = vst [vmem:[%s1147_s3 + $0x60] sm:$0xff] %v626_v56 }

// kernel: dqn_forward.6
= control target key start
LH: loop header
LB: loop body
LE: loop exit
PB: predicated region body
PF: predicated region fallthrough
CT: control target
= control target key end

     0   :  { %v1167_v34 = vmov 0.0   ;;  %vm1168_vm0 = vmmov 0   ;;  %vm516_vm1 = vcmask 523264   ;;  %s1554_s1 = inlined_call_operand.vmem [shape: bf16[576,128], index: 1, kind: input, shape index: {}]   ;;  %s1555_s0 = inlined_call_operand.vmem [shape: bf16[104,576], index: 0, kind: input, shape index: {}]   ;;  %s1556_s2 = inlined_call_operand.vmem [shape: f32[1,128], index: 2, kind: input, shape index: {}]   ;;  %s1557_s3 = inlined_call_operand.vmem [shape: f32[104,128], index: 3, kind: output, shape index: {}]  }
   0x1   :  { %v1084_v0 = vld [vmem:[%s1554_s1 + $0x78] sm:$0xff]   ;;  %v1088_v4 = vld [vmem:[%s1554_s1 + $0x70] sm:$0xff]   ;;  %v1092_v8 = vld [vmem:[%s1554_s1 + $0x68] sm:$0xff]  }
   0x2   :  { %v1085_v1 = vld [vmem:[%s1554_s1 + $0xf8] sm:$0xff]   ;;  %911 = vmatprep.subr.bf16.mxu0 %v1084_v0  ;;  %v1089_v5 = vld [vmem:[%s1554_s1 + $0xf0] sm:$0xff]   ;;  %v1093_v9 = vld [vmem:[%s1554_s1 + $0xe8] sm:$0xff]  }
   0x3   :  { %v1086_v2 = vld [vmem:[%s1554_s1 + $0x38] sm:$0xff]   ;;  %969 = vmatprep.subr.bf16.mxu1 %v1085_v1  ;;  %v1090_v6 = vld [vmem:[%s1554_s1 + $0x30] sm:$0xff]   ;;  %v1094_v10 = vld [vmem:[%s1554_s1 + $0x28] sm:$0xff]  }
   0x4   :  { %v1087_v3 = vld [vmem:[%s1554_s1 + $0xb8] sm:$0xff]   ;;  %912 = vmatpush3.bf16.msra.mxu0 %v1086_v2  ;;  %v1091_v7 = vld [vmem:[%s1554_s1 + $0xb0] sm:$0xff]   ;;  %v1095_v11 = vld [vmem:[%s1554_s1 + $0xa8] sm:$0xff]  }
   0x5   :  { %970 = vmatpush3.bf16.msra.mxu1 %v1087_v3  ;;  %913 = vmatprep.subr.bf16.mxu0 %v1088_v4  ;;  %v1096_v12 = vld [vmem:[%s1554_s1 + $0x60] sm:$0xff]   ;;  %v1100_v16 = vld [vmem:[%s1554_s1 + $0x58] sm:$0xff]   ;;  %v1104_v20 = vld [vmem:[%s1554_s1 + $0x50] sm:$0xff]  }
   0x6   :  { %971 = vmatprep.subr.bf16.mxu1 %v1089_v5  ;;  %v1097_v13 = vld [vmem:[%s1554_s1 + $0xe0] sm:$0xff]   ;;  %v1101_v17 = vld [vmem:[%s1554_s1 + $0xd8] sm:$0xff]   ;;  %v1105_v21 = vld [vmem:[%s1554_s1 + $0xd0] sm:$0xff]  }
   0x7   :  { %v1098_v14 = vld [vmem:[%s1554_s1 + $0x20] sm:$0xff]   ;;  %v1102_v18 = vld [vmem:[%s1554_s1 + $0x18] sm:$0xff]   ;;  %v1106_v22 = vld [vmem:[%s1554_s1 + $0x10] sm:$0xff]  }
   0x8   :  { %914 = vmatpush3.bf16.msra.mxu0 %v1090_v6  ;;  %v1099_v15 = vld [vmem:[%s1554_s1 + $0xa0] sm:$0xff]   ;;  %v1103_v19 = vld [vmem:[%s1554_s1 + $0x98] sm:$0xff]   ;;  %v1107_v23 = vld [vmem:[%s1554_s1 + $0x90] sm:$0xff]  }
   0x9   :  { %972 = vmatpush3.bf16.msra.mxu1 %v1091_v7  ;;  %915 = vmatprep.subr.bf16.mxu0 %v1092_v8  ;;  %v1108_v24 = vld [vmem:[%s1554_s1 + $0x48] sm:$0xff]   ;;  %v1112_v28 = vld [vmem:[%s1554_s1 + $0x40] sm:$0xff]   ;;  %v1122_v37 = vld [vmem:[%s1554_s1 + $0x118] sm:$0xff]  }
   0xa   :  { %973 = vmatprep.subr.bf16.mxu1 %v1093_v9  ;;  %v1109_v25 = vld [vmem:[%s1554_s1 + $0xc8] sm:$0xff]   ;;  %v1113_v29 = vld [vmem:[%s1554_s1 + $0xc0] sm:$0xff]   ;;  %v1133_v43 = vld [vmem:[%s1554_s1 + $0x110] sm:$0xff]  }
   0xb   :  { %v1110_v26 = vld [vmem:[%s1554_s1 + $0x8] sm:$0xff]   ;;  %v1114_v30 = vld [vmem:[%s1554_s1] sm:$0xff]   ;;  %v1131_v44 = vld [vmem:[%s1555_s0 + $0x5c] ss:$20 sps:$4 sm:$0xff]  }
   0xc   :  { %916 = vmatpush3.bf16.msra.mxu0 %v1094_v10  ;;  %v1111_v27 = vld [vmem:[%s1554_s1 + $0x88] sm:$0xff]   ;;  %v1115_v31 = vld [vmem:[%s1554_s1 + $0x80] sm:$0xff]   ;;  %v1136_v48 = vld [vmem:[%s1555_s0 + $0x7c] ss:$20 sps:$4 sm:$0xff]  }
   0xd   :  { %974 = vmatpush3.bf16.msra.mxu1 %v1095_v11  ;;  %917 = vmatprep.subr.bf16.mxu0 %v1096_v12  ;;  %v1116_v32 = vld [vmem:[%s1555_s0] ss:$20 sps:$4 sm:$0xff]   ;;  %v1118_v33 = vld [vmem:[%s1555_s0 + $0x4] ss:$20 sps:$4 sm:$0xff]   ;;  %v1119_v35 = vld [vmem:[%s1555_s0 + $0x8] ss:$20 sps:$4 sm:$0xff]  }
   0xe   :  { %975 = vmatprep.subr.bf16.mxu1 %v1097_v13  ;;  %v1121_v36 = vld [vmem:[%s1555_s0 + $0xc] ss:$20 sps:$4 sm:$0xff]   ;;  %570 = vmatprep.mubr.bf16.mxu0 %v1118_v33  ;;  %v1125_v39 = vld [vmem:[%s1555_s0 + $0x34] ss:$20 sps:$4 sm:$0xff]   ;;  %v1128_v41 = vld [vmem:[%s1555_s0 + $0x30] ss:$20 sps:$4 sm:$0xff]  }
   0xf   :  { %658 = vmatprep.mubr.bf16.mxu1 %v1121_v36  ;;  %v1123_v38 = vld [vmem:[%s1555_s0 + $0x2c] ss:$20 sps:$4 sm:$0xff]   ;;  %v1127_v40 = vld [vmem:[%s1555_s0 + $0x28] ss:$20 sps:$4 sm:$0xff]   ;;  %v1134_v46 = vld [vmem:[%s1555_s0 + $0x50] ss:$20 sps:$4 sm:$0xff]  }
  0x10   :  { %918 = vmatpush3.bf16.msra.mxu0 %v1098_v14  ;;  %v1129_v42 = vld [vmem:[%s1555_s0 + $0x54] ss:$20 sps:$4 sm:$0xff]   ;;  %v1135_v47 = vld [vmem:[%s1555_s0 + $0x58] ss:$20 sps:$4 sm:$0xff]   ;;  %v1155_v50 = vld [vmem:[%s1554_s1 + $0x100] sm:$0xff]  }
  0x11   :  { %976 = vmatpush3.bf16.msra.mxu1 %v1099_v15  ;;  %919 = vmatprep.subr.bf16.mxu0 %v1100_v16  ;;  %v1142_v45 = vld [vmem:[%s1554_s1 + $0x108] sm:$0xff]   ;;  %v1138_v49 = vld [vmem:[%s1555_s0 + $0x84] ss:$20 sps:$4 sm:$0xff]   ;;  %v1141_v52 = vld [vmem:[%s1555_s0 + $0x80] ss:$20 sps:$4 sm:$0xff]  }
  0x12   :  { %977 = vmatprep.subr.bf16.mxu1 %v1101_v17  ;;  %v1140_v51 = vld [vmem:[%s1555_s0 + $0x78] ss:$20 sps:$4 sm:$0xff]   ;;  %v1147_v55 = vld [vmem:[%s1555_s0 + $0xa0] ss:$20 sps:$4 sm:$0xff]   ;;  %v1148_v56 = vld [vmem:[%s1555_s0 + $0xa8] ss:$20 sps:$4 sm:$0xff]  }
  0x13   :  { %v1143_v53 = vld [vmem:[%s1555_s0 + $0xa4] ss:$20 sps:$4 sm:$0xff]   ;;  %v1145_v54 = vld [vmem:[%s1555_s0 + $0xac] ss:$20 sps:$4 sm:$0xff]   ;;  %v1151_v58 = vld [vmem:[%s1555_s0 + $0xd4] ss:$20 sps:$4 sm:$0xff]  }
  0x14   :  { %920 = vmatpush3.bf16.msra.mxu0 %v1102_v18  ;;  %v1149_v57 = vld [vmem:[%s1555_s0 + $0xcc] ss:$20 sps:$4 sm:$0xff]   ;;  %v51_v59 = vld [vmem:[%s1555_s0 + $0xf0] sm:$0xff]  ;;  %v52_v60 = vld [vmem:[%s1555_s0 + $0xf8] sm:$0xff] }
  0x15   :  { %978 = vmatpush3.bf16.msra.mxu1 %v1103_v19  ;;  %921 = vmatprep.subr.bf16.mxu0 %v1104_v20  ;;  %v1153_v61 = vld [vmem:[%s1555_s0 + $0xc8] ss:$20 sps:$4 sm:$0xff]   ;;  %v1154_v62 = vld [vmem:[%s1555_s0 + $0xd0] ss:$20 sps:$4 sm:$0xff]   ;;  %v864_v63 = vcombine.high %v51_v59, %v51_v59  ;;  %v866_v0 = vcombine.high %v52_v60, %v52_v60  ;;  %v863_v1 = vcombine.low %v51_v59, %v51_v59  ;;  %v1162_v5 = vld [vmem:[%s1555_s0 + $0x38] ss:$20 sps:$4 sm:$0xff]  }
  0x16   :  { %979 = vmatprep.subr.bf16.mxu1 %v1105_v21  ;;  %v865_v2 = vcombine.low %v52_v60, %v52_v60  ;;  %v1160_v3 = vld [vmem:[%s1555_s0 + $0x10] ss:$20 sps:$4 sm:$0xff]   ;;  %v1163_v6 = vld [vmem:[%s1555_s0 + $0xd8] ss:$20 sps:$4 sm:$0xff]   ;;  %v1164_v7 = vld [vmem:[%s1555_s0 + $0x60] ss:$20 sps:$4 sm:$0xff]  }
  0x17   :  { %v1161_v4 = vld [vmem:[%s1555_s0 + $0xb0] ss:$20 sps:$4 sm:$0xff]   ;;  %v1165_v8 = vld [vmem:[%s1555_s0 + $0x100] ss:$0 sps:$4 sm:$0xff]   ;;  %v1166_v9 = vld [vmem:[%s1555_s0 + $0x88] ss:$20 sps:$4 sm:$0xff]  }
  0x18   :  { %922 = vmatpush3.bf16.msra.mxu0 %v1106_v22  ;;  %v1472_v59 = vld [vmem:[%s1556_s2] ss:$0 sm:$0xff] }
  0x19   :  { %980 = vmatpush3.bf16.msra.mxu1 %v1107_v23  ;;  %923 = vmatprep.subr.bf16.mxu0 %v1108_v24 }
  0x1a   :  { %981 = vmatprep.subr.bf16.mxu1 %v1109_v25 }
  0x1c   :  { %924 = vmatpush3.bf16.msra.mxu0 %v1110_v26 }
  0x1d   :  { %982 = vmatpush3.bf16.msra.mxu1 %v1111_v27  ;;  %925 = vmatprep.subr.bf16.mxu0 %v1112_v28 }
  0x1e   :  { %983 = vmatprep.subr.bf16.mxu1 %v1113_v29 }
  0x20   :  { %926 = vmatpush3.bf16.msra.mxu0 %v1114_v30 }
  0x21   :  { %984 = vmatpush3.bf16.msra.mxu1 %v1115_v31  ;;  %1038 = vmatprep.subr.bf16.mxu0 %v1167_v34 }
  0x22   :  { %1074 = vmatprep.subr.bf16.mxu1 %v1167_v34 }
  0x23   :  { %571 = vmatmul.mubr.bf16.vlgmr.msra.gmra.mxu0 %v1116_v32 }
  0x24   :  { %659 = vmatmul.mubr.bf16.vlgmr.msra.gmra.mxu1 %v1119_v35  ;;  %1039 = vmatpush3.bf16.msra.mxu0 %v1122_v37 }
  0x25   :  { %578 = vmatprep.mubr.bf16.mxu0 %v1123_v38  ;;  %1078 = vmatpush3.bf16.msra.mxu1 %v1122_v37 }
  0x26   :  { %666 = vmatprep.mubr.bf16.mxu1 %v1125_v39  ;;  %1040 = vmatprep.subr.bf16.mxu0 %v1167_v34 }
  0x27   :  { %1075 = vmatprep.subr.bf16.mxu1 %v1167_v34 }
  0x28   :  { %1041 = vmatpush3.bf16.msra.mxu0 %v1133_v43 }
  0x29   :  { %1079 = vmatpush3.bf16.msra.mxu1 %v1133_v43  ;;  %1042 = vmatprep.subr.bf16.mxu0 %v1167_v34 }
  0x2a   :  { %1076 = vmatprep.subr.bf16.mxu1 %v1167_v34 }
  0x2b   :  { %579 = vmatmul.mubr.bf16.gmra.mxu0 %v1127_v40 }
  0x2c   :  { %667 = vmatmul.mubr.bf16.gmra.mxu1 %v1128_v41  ;;  %586 = vmatprep.mubr.bf16.mxu0 %v1129_v42 }
  0x2d   :  { %674 = vmatprep.mubr.bf16.mxu1 %v1131_v44  ;;  %1043 = vmatpush3.bf16.msra.mxu0 %v1142_v45 }
  0x2e   :  { %1080 = vmatpush3.bf16.msra.mxu1 %v1142_v45  ;;  %1044 = vmatprep.subr.bf16.mxu0 %v1167_v34 }
  0x2f   :  { %1077 = vmatprep.subr.bf16.mxu1 %v1167_v34 }
  0x31   :  { %1045 = vmatpush3.bf16.msra.mxu0 %v1155_v50 }
  0x32   :  { %1081 = vmatpush3.bf16.msra.mxu1 %v1155_v50 }
  0x33   :  { %587 = vmatmul.mubr.bf16.gmra.mxu0 %v1134_v46 }
  0x34   :  { %675 = vmatmul.mubr.bf16.gmra.mxu1 %v1135_v47  ;;  %594 = vmatprep.mubr.bf16.mxu0 %v1136_v48 }
  0x35   :  { %682 = vmatprep.mubr.bf16.mxu1 %v1138_v49 }
  0x3b   :  { %595 = vmatmul.mubr.bf16.gmra.mxu0 %v1140_v51 }
  0x3c   :  { %683 = vmatmul.mubr.bf16.gmra.mxu1 %v1141_v52  ;;  %602 = vmatprep.mubr.bf16.mxu0 %v1143_v53 }
  0x3d   :  { %690 = vmatprep.mubr.bf16.mxu1 %v1145_v54 }
  0x43   :  { %603 = vmatmul.mubr.bf16.gmra.mxu0 %v1147_v55 }
  0x44   :  { %691 = vmatmul.mubr.bf16.gmra.mxu1 %v1148_v56  ;;  %610 = vmatprep.mubr.bf16.mxu0 %v1149_v57 }
  0x45   :  { %698 = vmatprep.mubr.bf16.mxu1 %v1151_v58 }
  0x4b   :  { %611 = vmatmul.mubr.bf16.gmra.mxu0 %v1153_v61 }
  0x4c   :  { %699 = vmatmul.mubr.bf16.gmra.mxu1 %v1154_v62  ;;  %618 = vmatprep.mubr.bf16.mxu0 %v864_v63 }
  0x4d   :  { %706 = vmatprep.mubr.bf16.mxu1 %v866_v0 }
  0x53   :  { %619 = vmatmul.mubr.bf16.gmra.mxu0 %v863_v1 }
  0x54   :  { %707 = vmatmul.mubr.bf16.gmra.mxu1 %v865_v2  ;;  %1046 = vmatprep.mubr.msk.bf16.mxu0 %vm1168_vm0, %v1167_v34 }
  0x55   :  { %1062 = vmatprep.mubr.msk.bf16.mxu1 %vm1168_vm0, %v1167_v34 }
  0x5b   :  { %1047 = vmatmul.mubr.msk.bf16.vlgmr.msra.gmra.mxu0 %vm516_vm1, %v1160_v3 }
  0x5c   :  { %1063 = vmatmul.mubr.msk.bf16.vlgmr.msra.gmra.mxu1 %vm516_vm1, %v1161_v4  ;;  %1050 = vmatprep.mubr.msk.bf16.mxu0 %vm1168_vm0, %v1167_v34 }
  0x5d   :  { %1066 = vmatprep.mubr.msk.bf16.mxu1 %vm1168_vm0, %v1167_v34 }
  0x63   :  { %1051 = vmatmul.mubr.msk.bf16.gmra.mxu0 %vm516_vm1, %v1162_v5 }
  0x64   :  { %1067 = vmatmul.mubr.msk.bf16.gmra.mxu1 %vm516_vm1, %v1163_v6  ;;  %1054 = vmatprep.mubr.msk.bf16.mxu0 %vm1168_vm0, %v1167_v34 }
  0x65   :  { %1070 = vmatprep.mubr.msk.bf16.mxu1 %vm1168_vm0, %v1167_v34 }
  0x6b   :  { %1055 = vmatmul.mubr.msk.bf16.gmra.mxu0 %vm516_vm1, %v1164_v7 }
  0x6c   :  { %1071 = vmatmul.mubr.msk.bf16.gmra.mxu1 %vm516_vm1, %v1165_v8  ;;  %1058 = vmatprep.mubr.msk.bf16.mxu0 %vm1168_vm0, %v1167_v34 }
  0x73   :  { %1059 = vmatmul.mubr.msk.bf16.gmra.mxu0 %vm516_vm1, %v1166_v9 }
  0xe3   :  { %v927_v10 = vpop.f32.mrf.mxu0 }
  0xe4   :  { %v985_v11 = vpop.f32.mrf.mxu1 }
  0xe5   :  { %v928_v12 = vpop.f32.mrf.mxu0 }
  0xe6   :  { %v986_v13 = vpop.f32.mrf.mxu1  ;;  %v929_v57 = vadd.f32 %v928_v12, %v927_v10 }
  0xe7   :  { %v930_v14 = vpop.f32.mrf.mxu0  ;;  %v987_v2 = vadd.f32 %v986_v13, %v985_v11 }
  0xe8   :  { %v988_v15 = vpop.f32.mrf.mxu1  ;;  %v573_v1 = vadd.f32 %v929_v57, %v1472_v59 }
  0xe9   :  { %v931_v16 = vpop.f32.mrf.mxu0 }
  0xea   :  { %v989_v17 = vpop.f32.mrf.mxu1  ;;  %v932_v63 = vadd.f32 %v931_v16, %v930_v14  ;;  %v661_v14 = vadd.f32 %v987_v2, %v573_v1 }
  0xeb   :  { %v933_v18 = vpop.f32.mrf.mxu0  ;;  %v990_v10 = vadd.f32 %v989_v17, %v988_v15 }
  0xec   :  { %v1425_v19 = vpop.f32.mrf.mxu1  ;;  %v576_v9 = vadd.f32 %v932_v63, %v1472_v59 }
  0xed   :  { %v934_v20 = vpop.f32.mrf.mxu0 }
  0xee   :  { %v1427_v21 = vpop.f32.mrf.mxu1  ;;  %v935_v12 = vadd.f32 %v934_v20, %v933_v18  ;;  %v664_v15 = vadd.f32 %v990_v10, %v576_v9 }
  0xef   :  { %v1429_v22 = vpop.f32.mrf.mxu0 }
  0xf0   :  { %v1431_v23 = vpop.f32.mrf.mxu1 }
  0xf1   :  { %v1433_v24 = vpop.f32.mrf.mxu0 }
  0xf2   :  { %v1435_v25 = vpop.f32.mrf.mxu1  ;;  %v938_v17 = vadd.f32 %v1433_v24, %v1429_v22 }
  0xf3   :  { %v1437_v26 = vpop.f32.mrf.mxu0 }
  0xf4   :  { %v1439_v27 = vpop.f32.mrf.mxu1 }
  0xf5   :  { %v1441_v28 = vpop.f32.mrf.mxu0 }
  0xf6   :  { %v1443_v29 = vpop.f32.mrf.mxu1 }
  0xf7   :  { %v1445_v30 = vpop.f32.mrf.mxu0 }
  0xf8   :  { %v1447_v31 = vpop.f32.mrf.mxu1 }
  0xf9   :  { %v1449_v32 = vpop.f32.mrf.mxu0 }
  0xfa   :  { %v1451_v33 = vpop.f32.mrf.mxu1 }
  0xfb   :  { %v1453_v34 = vpop.f32.mrf.mxu0 }
  0xfc   :  { %v1455_v35 = vpop.f32.mrf.mxu1 }
  0xfd   :  { %v1457_v36 = vpop.f32.mrf.mxu0 }
  0xfe   :  { %v1459_v37 = vpop.f32.mrf.mxu1 }
  0xff   :  { %v1461_v38 = vpop.f32.mrf.mxu0 }
 0x100   :  { %v1463_v39 = vpop.f32.mrf.mxu1 }
 0x101   :  { %1558 = vst [vmem:[#allocation2_spill] sm:$0xff] %v1463_v39  ;;  %v1465_v40 = vpop.f32.mrf.mxu0 }
 0x102   :  { %1559 = vst [vmem:[#allocation3_spill] sm:$0xff] %v1465_v40  ;;  %v1467_v41 = vpop.f32.mrf.mxu1 }
 0x103   :  { %1560 = vst [vmem:[#allocation4_spill] sm:$0xff] %v1467_v41  ;;  %v951_v42 = vpop.f32.mrf.mxu0 }
 0x104   :  { %v1009_v43 = vpop.f32.mrf.mxu1 }
 0x105   :  { %v952_v44 = vpop.f32.mrf.mxu0 }
 0x106   :  { %v1010_v45 = vpop.f32.mrf.mxu1  ;;  %v953_v60 = vadd.f32 %v952_v44, %v951_v42 }
 0x107   :  { %v954_v46 = vpop.f32.mrf.mxu0  ;;  %v1011_v5 = vadd.f32 %v1010_v45, %v1009_v43  ;;  %v581_v43 = vadd.f32 %v935_v12, %v1472_v59  ;;  %v993_v45 = vadd.f32 %v1427_v21, %v1425_v19 }
 0x108   :  { %v1012_v47 = vpop.f32.mrf.mxu1  ;;  %v605_v4 = vadd.f32 %v953_v60, %v1472_v59 }
 0x109   :  { %v955_v48 = vpop.f32.mrf.mxu0 }
 0x10a   :  { %v1013_v49 = vpop.f32.mrf.mxu1  ;;  %v956_v6 = vadd.f32 %v955_v48, %v954_v46  ;;  %v693_v13 = vadd.f32 %v1011_v5, %v605_v4 }
 0x10b   :  { %v957_v50 = vpop.f32.mrf.mxu0  ;;  %v1014_v57 = vadd.f32 %v1013_v49, %v1012_v47 }
 0x10c   :  { %v1015_v51 = vpop.f32.mrf.mxu1  ;;  %v608_v16 = vadd.f32 %v956_v6, %v1472_v59 }
 0x10d   :  { %v958_v52 = vpop.f32.mrf.mxu0 }
 0x10e   :  { %v1016_v53 = vpop.f32.mrf.mxu1  ;;  %v959_v44 = vadd.f32 %v958_v52, %v957_v50  ;;  %v696_v60 = vadd.f32 %v1014_v57, %v608_v16 }
 0x10f   :  { %v960_v54 = vpop.f32.mrf.mxu0  ;;  %v1017_v20 = vadd.f32 %v1016_v53, %v1015_v51  ;;  %v584_v51 = vadd.f32 %v938_v17, %v1472_v59  ;;  %v941_v53 = vadd.f32 %v1441_v28, %v1437_v26  ;;  %v1561_v17 = vld [vmem:[#allocation3_spill] sm:$0xff] }
 0x110   :  { %v1018_v55 = vpop.f32.mrf.mxu1  ;;  %v613_v18 = vadd.f32 %v959_v44, %v1472_v59 }
 0x111   :  { %v961_v56 = vpop.f32.mrf.mxu0 }
 0x112   :  { %v1019_v58 = vpop.f32.mrf.mxu1  ;;  %v962_v49 = vadd.f32 %v961_v56, %v960_v54  ;;  %v701_v63 = vadd.f32 %v1017_v20, %v613_v18  ;;  %v950_v18 = vadd.f32 %v1561_v17, %v1461_v38 }
 0x113   :  { %v963_v61 = vpop.f32.mrf.mxu0  ;;  %v1020_v2 = vadd.f32 %v1019_v58, %v1018_v55  ;;  %v589_v55 = vadd.f32 %v941_v53, %v1472_v59  ;;  %v999_v58 = vadd.f32 %v1443_v29, %v1439_v27  ;;  %v1002_v27 = vadd.f32 %v1451_v33, %v1447_v31 }
 0x114   :  { %v1474_v62 = vpop.f32.mrf.mxu1  ;;  %v616_v1 = vadd.f32 %v962_v49, %v1472_v59 }
 0x115   :  { %v964_v0 = vpop.f32.mrf.mxu0 }
 0x116   :  { %v1477_v3 = vpop.f32.mrf.mxu1  ;;  %v965_v4 = vadd.f32 %v964_v0, %v963_v61  ;;  %v704_v12 = vadd.f32 %v1020_v2, %v616_v1 }
 0x117   :  { %v966_v7 = vpop.f32.mrf.mxu0  ;;  %v1023_v10 = vadd.f32 %v1477_v3, %v1474_v62  ;;  %v947_v3 = vadd.f32 %v1457_v36, %v1453_v34  ;;  %v1005_v36 = vadd.f32 %v1459_v37, %v1455_v35  ;;  %v600_v35 = vadd.f32 %v950_v18, %v1472_v59  ;;  %v1562_v37 = vld [vmem:[#allocation2_spill] sm:$0xff] }
 0x118   :  { %v1024_v8 = vpop.f32.mrf.mxu1  ;;  %v944_v7 = vadd.f32 %v1449_v32, %v1445_v30  ;;  %v621_v9 = vadd.f32 %v965_v4, %v1472_v59 }
 0x119   :  { %v967_v42 = vpop.f32.mrf.mxu0  ;;  %v597_v34 = vadd.f32 %v947_v3, %v1472_v59 }
 0x11a   :  { %v1025_v41 = vpop.f32.mrf.mxu1 }
 0x11b   :  { %v748_v11 = vpop.f32.mrf.mxu0 }
 0x11c   :  { %v749_v39 = vadd.f32 %v748_v11, %v661_v14  ;;  %v780_v40 = vpop.f32.mrf.mxu1  ;;  %v592_v14 = vadd.f32 %v944_v7, %v1472_v59  ;;  %v677_v11 = vadd.f32 %v999_v58, %v589_v55 }
 0x11d   :  { %v781_v46 = vadd.f32 %v780_v40, %v693_v13  ;;  %v1048_v48 = vpop.f32.mrf.mxu0  ;;  %v996_v40 = vadd.f32 %v1435_v25, %v1431_v23 }
 0x11e   :  { %v802_v41 = vmax.f32 %v749_v39, 0.0  ;;  %v1064_v47 = vpop.f32.mrf.mxu1  ;;  %v669_v39 = vadd.f32 %v993_v45, %v581_v43  ;;  %v709_v45 = vadd.f32 %v1023_v10, %v621_v9 }
 0x11f   :  { %v810_v50 = vmax.f32 %v781_v46, 0.0  ;;  %v751_v52 = vpop.f32.mrf.mxu0  ;;  %v672_v8 = vadd.f32 %v996_v40, %v584_v51  ;;  %v685_v40 = vadd.f32 %v1005_v36, %v597_v34 }
 0x120   :  { %815 = vst [vmem:[%s1557_s3] sm:$0xff] %v802_v41  ;;  %v752_v19 = vadd.f32 %v751_v52, %v664_v15  ;;  %v783_v21 = vpop.f32.mrf.mxu1  ;;  %v680_v15 = vadd.f32 %v1002_v27, %v592_v14 }
 0x121   :  { %823 = vst [vmem:[%s1557_s3 + $0x40] sm:$0xff] %v810_v50  ;;  %v784_v22 = vadd.f32 %v783_v21, %v696_v60  ;;  %v1049_v24 = vpop.f32.mrf.mxu0 }
 0x122   :  { %v803_v54 = vmax.f32 %v752_v19, 0.0  ;;  %v1065_v56 = vpop.f32.mrf.mxu1  ;;  %v1563_v19 = vld [vmem:[#allocation4_spill] sm:$0xff] }
 0x123   :  { %v811_v23 = vmax.f32 %v784_v22, 0.0  ;;  %v756_v25 = vpop.f32.mrf.mxu0  ;;  %v1008_v38 = vadd.f32 %v1563_v19, %v1562_v37 }
 0x124   :  { %816 = vst [vmem:[%s1557_s3 + $0x8] sm:$0xff] %v803_v54  ;;  %v757_v5 = vadd.f32 %v756_v25, %v669_v39  ;;  %v788_v6 = vpop.f32.mrf.mxu1 }
 0x125   :  { %824 = vst [vmem:[%s1557_s3 + $0x48] sm:$0xff] %v811_v23  ;;  %v789_v26 = vadd.f32 %v788_v6, %v701_v63  ;;  %v1052_v28 = vpop.f32.mrf.mxu0  ;;  %v688_v54 = vadd.f32 %v1008_v38, %v600_v35 }
 0x126   :  { %v804_v61 = vmax.f32 %v757_v5, 0.0  ;;  %v1068_v0 = vpop.f32.mrf.mxu1 }
 0x127   :  { %v812_v30 = vmax.f32 %v789_v26, 0.0  ;;  %v759_v32 = vpop.f32.mrf.mxu0 }
 0x128   :  { %817 = vst [vmem:[%s1557_s3 + $0x10] sm:$0xff] %v804_v61  ;;  %v760_v42 = vadd.f32 %v759_v32, %v672_v8  ;;  %v791_v44 = vpop.f32.mrf.mxu1 }
 0x129   :  { %825 = vst [vmem:[%s1557_s3 + $0x50] sm:$0xff] %v812_v30  ;;  %v792_v29 = vadd.f32 %v791_v44, %v704_v12  ;;  %v1053_v62 = vpop.f32.mrf.mxu0 }
 0x12a   :  { %v805_v16 = vmax.f32 %v760_v42, 0.0  ;;  %v1069_v57 = vpop.f32.mrf.mxu1 }
 0x12b   :  { %v813_v13 = vmax.f32 %v792_v29, 0.0  ;;  %v764_v43 = vpop.f32.mrf.mxu0 }
 0x12c   :  { %818 = vst [vmem:[%s1557_s3 + $0x18] sm:$0xff] %v805_v16  ;;  %v765_v31 = vadd.f32 %v764_v43, %v677_v11  ;;  %v796_v33 = vpop.f32.mrf.mxu1 }
 0x12d   :  { %826 = vst [vmem:[%s1557_s3 + $0x58] sm:$0xff] %v813_v13  ;;  %v797_v46 = vadd.f32 %v796_v33, %v709_v45  ;;  %v1056_v48 = vpop.f32.mrf.mxu0 }
 0x12e   :  { %v806_v20 = vmax.f32 %v765_v31, 0.0  ;;  %v1072_v41 = vpop.f32.mrf.mxu1 }
 0x12f   :  { %v814_v47 = vmax.f32 %v797_v46, 0.0  ;;  %v767_v49 = vpop.f32.mrf.mxu0 }
 0x130   :  { %819 = vst [vmem:[%s1557_s3 + $0x20] sm:$0xff] %v806_v20  ;;  %v768_v50 = vadd.f32 %v767_v49, %v680_v15  ;;  %v799_v52 = vpop.f32.mrf.mxu1 }
 0x131   :  { %827 = vst [vmem:[%s1557_s3 + $0x60] sm:$0xff] %v814_v47  ;;  %v1057_v60 = vpop.f32.mrf.mxu0 }
 0x132   :  { %v807_v21 = vmax.f32 %v768_v50, 0.0  ;;  %v1073_v22 = vpop.f32.mrf.mxu1 }
 0x133   :  { %v772_v24 = vpop.f32.mrf.mxu0 }
 0x134   :  { %820 = vst [vmem:[%s1557_s3 + $0x28] sm:$0xff] %v807_v21  ;;  %v773_v39 = vadd.f32 %v772_v24, %v685_v40 }
 0x135   :  { %v1060_v51 = vpop.f32.mrf.mxu0 }
 0x136   :  { %v808_v53 = vmax.f32 %v773_v39, 0.0 }
 0x137   :  { %v775_v56 = vpop.f32.mrf.mxu0 }
 0x138   :  { %821 = vst [vmem:[%s1557_s3 + $0x30] sm:$0xff] %v808_v53  ;;  %v776_v59 = vadd.f32 %v775_v56, %v688_v54 }
 0x139   :  { %v1061_v63 = vpop.f32.mrf.mxu0 }
 0x13a   :  { %v809_v1 = vmax.f32 %v776_v59, 0.0 }
 0x13c   :  { %822 = vst [vmem:[%s1557_s3 + $0x38] sm:$0xff] %v809_v1 }

// kernel: dqn_forward.7
= control target key start
LH: loop header
LB: loop body
LE: loop exit
PB: predicated region body
PF: predicated region fallthrough
CT: control target
= control target key end

     0   :  { %vm4847_vm0 = vcmask 523264   ;;  %s11144_s1 = inlined_call_operand.vmem [shape: bf16[3136,512], index: 1, kind: input, shape index: {}]   ;;  %s11145_s0 = inlined_call_operand.vmem [shape: bf16[8,3136], index: 0, kind: input, shape index: {}]   ;;  %s11146_s2 = inlined_call_operand.vmem [shape: f32[1,512], index: 2, kind: input, shape index: {}]   ;;  %s11147_s3 = inlined_call_operand.vmem [shape: bf16[512,128], index: 3, kind: input, shape index: {}]   ;;  %s11148_s4 = inlined_call_operand.vmem [shape: f32[1,128], index: 4, kind: input, shape index: {}]   ;;  %s11149_s5 = inlined_call_operand.vmem [shape: f32[8,128], index: 5, kind: output, shape index: {}]  }
   0x1   :  { %v7162_v0 = vld [vmem:[%s11144_s1 + $0xe4] ss:$16 sps:$4 sm:$0xff]   ;;  %v7166_v2 = vld [vmem:[%s11144_s1 + $0xe0] ss:$16 sps:$4 sm:$0xff]   ;;  %v22_v48 = vld [vmem:[%s11145_s0 + $0x8] sm:$0xff] }
   0x2   :  { %v7164_v1 = vld [vmem:[%s11144_s1 + $0x2e4] ss:$16 sps:$4 sm:$0xff]   ;;  %4851 = vmatprep.subr.bf16.mxu0 %v7162_v0  ;;  %v7167_v3 = vld [vmem:[%s11144_s1 + $0x2e0] ss:$16 sps:$4 sm:$0xff]   ;;  %v8580_v51 = vcombine.high %v22_v48, %v22_v48 }
   0x3   :  { %4892 = vmatprep.subr.bf16.mxu1 %v7164_v1  ;;  %v7168_v4 = vld [vmem:[%s11144_s1 + $0xc4] ss:$16 sps:$4 sm:$0xff]   ;;  %4852 = vmatpush1.bf16.msra.mxu0 %v7166_v2  ;;  %v7172_v6 = vld [vmem:[%s11144_s1 + $0xc0] ss:$16 sps:$4 sm:$0xff]  }
   0x4   :  { %4893 = vmatpush1.bf16.msra.mxu1 %v7167_v3  ;;  %v7170_v5 = vld [vmem:[%s11144_s1 + $0x2c4] ss:$16 sps:$4 sm:$0xff]   ;;  %4853 = vmatprep.subr.bf16.mxu0 %v7168_v4  ;;  %v7173_v7 = vld [vmem:[%s11144_s1 + $0x2c0] ss:$16 sps:$4 sm:$0xff]  }
   0x5   :  { %4894 = vmatprep.subr.bf16.mxu1 %v7170_v5  ;;  %v7174_v8 = vld [vmem:[%s11144_s1 + $0xa4] ss:$16 sps:$4 sm:$0xff]   ;;  %v7178_v10 = vld [vmem:[%s11144_s1 + $0xa0] ss:$16 sps:$4 sm:$0xff]   ;;  %4924 = vmatprep.mubr.bf16.mxu1 %v8580_v51 }
   0x6   :  { %v7176_v9 = vld [vmem:[%s11144_s1 + $0x2a4] ss:$16 sps:$4 sm:$0xff]   ;;  %v7179_v11 = vld [vmem:[%s11144_s1 + $0x2a0] ss:$16 sps:$4 sm:$0xff]  }
   0x7   :  { %4854 = vmatpush1.bf16.msra.mxu0 %v7172_v6  ;;  %v7180_v12 = vld [vmem:[%s11144_s1 + $0x84] ss:$16 sps:$4 sm:$0xff]   ;;  %v7184_v14 = vld [vmem:[%s11144_s1 + $0x80] ss:$16 sps:$4 sm:$0xff]  }
   0x8   :  { %4895 = vmatpush1.bf16.msra.mxu1 %v7173_v7  ;;  %4855 = vmatprep.subr.bf16.mxu0 %v7174_v8  ;;  %v7182_v13 = vld [vmem:[%s11144_s1 + $0x284] ss:$16 sps:$4 sm:$0xff]   ;;  %v7185_v15 = vld [vmem:[%s11144_s1 + $0x280] ss:$16 sps:$4 sm:$0xff]   ;;  %v8640_v7 = vcombine.low %v22_v48, %v22_v48 }
   0x9   :  { %4896 = vmatprep.subr.bf16.mxu1 %v7176_v9  ;;  %v7186_v16 = vld [vmem:[%s11144_s1 + $0x64] ss:$16 sps:$4 sm:$0xff]   ;;  %v7190_v18 = vld [vmem:[%s11144_s1 + $0x60] ss:$16 sps:$4 sm:$0xff]  }
   0xa   :  { %v7188_v17 = vld [vmem:[%s11144_s1 + $0x264] ss:$16 sps:$4 sm:$0xff]   ;;  %v7191_v19 = vld [vmem:[%s11144_s1 + $0x260] ss:$16 sps:$4 sm:$0xff]  }
   0xb   :  { %4856 = vmatpush1.bf16.msra.mxu0 %v7178_v10  ;;  %v7192_v20 = vld [vmem:[%s11144_s1 + $0x44] ss:$16 sps:$4 sm:$0xff]   ;;  %v7196_v22 = vld [vmem:[%s11144_s1 + $0x40] ss:$16 sps:$4 sm:$0xff]  }
   0xc   :  { %4897 = vmatpush1.bf16.msra.mxu1 %v7179_v11  ;;  %4857 = vmatprep.subr.bf16.mxu0 %v7180_v12  ;;  %v7194_v21 = vld [vmem:[%s11144_s1 + $0x244] ss:$16 sps:$4 sm:$0xff]   ;;  %v7197_v23 = vld [vmem:[%s11144_s1 + $0x240] ss:$16 sps:$4 sm:$0xff]  }
   0xd   :  { %4898 = vmatprep.subr.bf16.mxu1 %v7182_v13  ;;  %v7198_v24 = vld [vmem:[%s11144_s1 + $0x24] ss:$16 sps:$4 sm:$0xff]   ;;  %v7202_v26 = vld [vmem:[%s11144_s1 + $0x20] ss:$16 sps:$4 sm:$0xff]  }
   0xe   :  { %v7200_v25 = vld [vmem:[%s11144_s1 + $0x224] ss:$16 sps:$4 sm:$0xff]   ;;  %v7203_v27 = vld [vmem:[%s11144_s1 + $0x220] ss:$16 sps:$4 sm:$0xff]  }
   0xf   :  { %4858 = vmatpush1.bf16.msra.mxu0 %v7184_v14  ;;  %v7204_v28 = vld [vmem:[%s11144_s1 + $0x4] ss:$16 sps:$4 sm:$0xff]   ;;  %v7208_v30 = vld [vmem:[%s11144_s1] ss:$16 sps:$4 sm:$0xff]  }
  0x10   :  { %4899 = vmatpush1.bf16.msra.mxu1 %v7185_v15  ;;  %4859 = vmatprep.subr.bf16.mxu0 %v7186_v16  ;;  %v7206_v29 = vld [vmem:[%s11144_s1 + $0x204] ss:$16 sps:$4 sm:$0xff]   ;;  %v7209_v31 = vld [vmem:[%s11144_s1 + $0x200] ss:$16 sps:$4 sm:$0xff]  }
  0x11   :  { %4900 = vmatprep.subr.bf16.mxu1 %v7188_v17  ;;  %v7210_v32 = vld [vmem:[%s11144_s1 + $0x1e4] ss:$16 sps:$4 sm:$0xff]   ;;  %v7214_v34 = vld [vmem:[%s11144_s1 + $0x1e0] ss:$16 sps:$4 sm:$0xff]  }
  0x12   :  { %v7212_v33 = vld [vmem:[%s11144_s1 + $0x3e4] ss:$16 sps:$4 sm:$0xff]   ;;  %v7215_v35 = vld [vmem:[%s11144_s1 + $0x3e0] ss:$16 sps:$4 sm:$0xff]  }
  0x13   :  { %4860 = vmatpush1.bf16.msra.mxu0 %v7190_v18  ;;  %v7216_v36 = vld [vmem:[%s11144_s1 + $0x1c4] ss:$16 sps:$4 sm:$0xff]   ;;  %v7220_v38 = vld [vmem:[%s11144_s1 + $0x1c0] ss:$16 sps:$4 sm:$0xff]  }
  0x14   :  { %4901 = vmatpush1.bf16.msra.mxu1 %v7191_v19  ;;  %4861 = vmatprep.subr.bf16.mxu0 %v7192_v20  ;;  %v7218_v37 = vld [vmem:[%s11144_s1 + $0x3c4] ss:$16 sps:$4 sm:$0xff]   ;;  %v7221_v39 = vld [vmem:[%s11144_s1 + $0x3c0] ss:$16 sps:$4 sm:$0xff]  }
  0x15   :  { %4902 = vmatprep.subr.bf16.mxu1 %v7194_v21  ;;  %v7222_v40 = vld [vmem:[%s11144_s1 + $0x1a4] ss:$16 sps:$4 sm:$0xff]   ;;  %v7226_v42 = vld [vmem:[%s11144_s1 + $0x1a0] ss:$16 sps:$4 sm:$0xff]  }
  0x16   :  { %v7224_v41 = vld [vmem:[%s11144_s1 + $0x3a4] ss:$16 sps:$4 sm:$0xff]   ;;  %v7227_v43 = vld [vmem:[%s11144_s1 + $0x3a0] ss:$16 sps:$4 sm:$0xff]  }
  0x17   :  { %4862 = vmatpush1.bf16.msra.mxu0 %v7196_v22  ;;  %v7228_v44 = vld [vmem:[%s11144_s1 + $0x184] ss:$16 sps:$4 sm:$0xff]   ;;  %v7232_v49 = vld [vmem:[%s11144_s1 + $0x180] ss:$16 sps:$4 sm:$0xff]  }
  0x18   :  { %4903 = vmatpush1.bf16.msra.mxu1 %v7197_v23  ;;  %4863 = vmatprep.subr.bf16.mxu0 %v7198_v24  ;;  %v7230_v45 = vld [vmem:[%s11144_s1 + $0x384] ss:$16 sps:$4 sm:$0xff]   ;;  %v7233_v50 = vld [vmem:[%s11144_s1 + $0x380] ss:$16 sps:$4 sm:$0xff]  }
  0x19   :  { %4904 = vmatprep.subr.bf16.mxu1 %v7200_v25  ;;  %v21_v46 = vld [vmem:[%s11145_s0] sm:$0xff] }
  0x1a   :  { %v8569_v47 = vcombine.high %v21_v46, %v21_v46  ;;  %v7234_v52 = vld [vmem:[%s11144_s1 + $0x164] ss:$16 sps:$4 sm:$0xff]   ;;  %v7238_v54 = vld [vmem:[%s11144_s1 + $0x160] ss:$16 sps:$4 sm:$0xff]   ;;  %v8638_v6 = vcombine.low %v21_v46, %v21_v46 }
  0x1b   :  { %4864 = vmatpush1.bf16.msra.mxu0 %v7202_v26  ;;  %v7236_v53 = vld [vmem:[%s11144_s1 + $0x364] ss:$16 sps:$4 sm:$0xff]   ;;  %v7239_v55 = vld [vmem:[%s11144_s1 + $0x360] ss:$16 sps:$4 sm:$0xff]  }
  0x1c   :  { %4905 = vmatpush1.bf16.msra.mxu1 %v7203_v27  ;;  %4865 = vmatprep.subr.bf16.mxu0 %v7204_v28  ;;  %v7240_v56 = vld [vmem:[%s11144_s1 + $0x144] ss:$16 sps:$4 sm:$0xff]   ;;  %v7244_v58 = vld [vmem:[%s11144_s1 + $0x140] ss:$16 sps:$4 sm:$0xff]  }
  0x1d   :  { %4906 = vmatprep.subr.bf16.mxu1 %v7206_v29  ;;  %4883 = vmatprep.mubr.bf16.mxu0 %v8569_v47  ;;  %v7242_v57 = vld [vmem:[%s11144_s1 + $0x344] ss:$16 sps:$4 sm:$0xff]   ;;  %v7245_v59 = vld [vmem:[%s11144_s1 + $0x340] ss:$16 sps:$4 sm:$0xff]  }
  0x1e   :  { %v7246_v60 = vld [vmem:[%s11144_s1 + $0x124] ss:$16 sps:$4 sm:$0xff]   ;;  %v7250_v62 = vld [vmem:[%s11144_s1 + $0x120] ss:$16 sps:$4 sm:$0xff]  }
  0x1f   :  { %4866 = vmatpush1.bf16.msra.mxu0 %v7208_v30  ;;  %v7248_v61 = vld [vmem:[%s11144_s1 + $0x324] ss:$16 sps:$4 sm:$0xff]   ;;  %v7251_v63 = vld [vmem:[%s11144_s1 + $0x320] ss:$16 sps:$4 sm:$0xff]  }
  0x20   :  { %4907 = vmatpush1.bf16.msra.mxu1 %v7209_v31  ;;  %4867 = vmatprep.subr.bf16.mxu0 %v7210_v32  ;;  %v7252_v0 = vld [vmem:[%s11144_s1 + $0x104] ss:$16 sps:$4 sm:$0xff]   ;;  %v7256_v2 = vld [vmem:[%s11144_s1 + $0x100] ss:$16 sps:$4 sm:$0xff]  }
  0x21   :  { %4908 = vmatprep.subr.bf16.mxu1 %v7212_v33  ;;  %v7254_v1 = vld [vmem:[%s11144_s1 + $0x304] ss:$16 sps:$4 sm:$0xff]   ;;  %v7257_v3 = vld [vmem:[%s11144_s1 + $0x300] ss:$16 sps:$4 sm:$0xff]   ;;  %v8724_v33 = vld [vmem:[%s11145_s0 + $0x18] sm:$0xff] }
  0x22   :  { %v7264_v4 = vld [vmem:[%s11144_s1 + $0x4e4] ss:$16 sps:$4 sm:$0xff]   ;;  %v7262_v8 = vld [vmem:[%s11144_s1 + $0x4e0] ss:$16 sps:$4 sm:$0xff]  }
  0x23   :  { %4868 = vmatpush2.bf16.msra.mxu0 %v7214_v34  ;;  %v7267_v5 = vld [vmem:[%s11144_s1 + $0x6e4] ss:$16 sps:$4 sm:$0xff]   ;;  %v7265_v9 = vld [vmem:[%s11144_s1 + $0x6e0] ss:$16 sps:$4 sm:$0xff]  }
  0x24   :  { %4909 = vmatpush2.bf16.msra.mxu1 %v7215_v35  ;;  %4869 = vmatprep.subr.bf16.mxu0 %v7216_v36  ;;  %v7270_v10 = vld [vmem:[%s11144_s1 + $0x4c4] ss:$16 sps:$4 sm:$0xff]   ;;  %v7268_v12 = vld [vmem:[%s11144_s1 + $0x4c0] ss:$16 sps:$4 sm:$0xff]  }
  0x25   :  { %4910 = vmatprep.subr.bf16.mxu1 %v7218_v37  ;;  %v7273_v11 = vld [vmem:[%s11144_s1 + $0x6c4] ss:$16 sps:$4 sm:$0xff]   ;;  %v7271_v13 = vld [vmem:[%s11144_s1 + $0x6c0] ss:$16 sps:$4 sm:$0xff]   ;;  %v8738_v37 = vcombine.high %v8724_v33, %v8724_v33 }
  0x26   :  { %v7276_v14 = vld [vmem:[%s11144_s1 + $0x4a4] ss:$16 sps:$4 sm:$0xff]   ;;  %v7274_v16 = vld [vmem:[%s11144_s1 + $0x4a0] ss:$16 sps:$4 sm:$0xff]  }
  0x27   :  { %4870 = vmatpush2.bf16.msra.mxu0 %v7220_v38  ;;  %v7279_v15 = vld [vmem:[%s11144_s1 + $0x6a4] ss:$16 sps:$4 sm:$0xff]   ;;  %v7277_v17 = vld [vmem:[%s11144_s1 + $0x6a0] ss:$16 sps:$4 sm:$0xff]  }
  0x28   :  { %4911 = vmatpush2.bf16.msra.mxu1 %v7221_v39  ;;  %4871 = vmatprep.subr.bf16.mxu0 %v7222_v40  ;;  %v7282_v18 = vld [vmem:[%s11144_s1 + $0x484] ss:$16 sps:$4 sm:$0xff]   ;;  %v7280_v20 = vld [vmem:[%s11144_s1 + $0x480] ss:$16 sps:$4 sm:$0xff]  }
  0x29   :  { %4912 = vmatprep.subr.bf16.mxu1 %v7224_v41  ;;  %v7285_v19 = vld [vmem:[%s11144_s1 + $0x684] ss:$16 sps:$4 sm:$0xff]   ;;  %v7283_v21 = vld [vmem:[%s11144_s1 + $0x680] ss:$16 sps:$4 sm:$0xff]  }
  0x2a   :  { %v7288_v22 = vld [vmem:[%s11144_s1 + $0x464] ss:$16 sps:$4 sm:$0xff]   ;;  %v7286_v24 = vld [vmem:[%s11144_s1 + $0x460] ss:$16 sps:$4 sm:$0xff]  }
  0x2b   :  { %4872 = vmatpush2.bf16.msra.mxu0 %v7226_v42  ;;  %v7291_v23 = vld [vmem:[%s11144_s1 + $0x664] ss:$16 sps:$4 sm:$0xff]   ;;  %v7289_v25 = vld [vmem:[%s11144_s1 + $0x660] ss:$16 sps:$4 sm:$0xff]  }
  0x2c   :  { %4913 = vmatpush2.bf16.msra.mxu1 %v7227_v43  ;;  %4873 = vmatprep.subr.bf16.mxu0 %v7228_v44  ;;  %v7294_v26 = vld [vmem:[%s11144_s1 + $0x444] ss:$16 sps:$4 sm:$0xff]   ;;  %v7292_v28 = vld [vmem:[%s11144_s1 + $0x440] ss:$16 sps:$4 sm:$0xff]  }
  0x2d   :  { %4914 = vmatprep.subr.bf16.mxu1 %v7230_v45  ;;  %v7297_v27 = vld [vmem:[%s11144_s1 + $0x644] ss:$16 sps:$4 sm:$0xff]   ;;  %v7295_v29 = vld [vmem:[%s11144_s1 + $0x640] ss:$16 sps:$4 sm:$0xff]  }
  0x2e   :  { %v7300_v30 = vld [vmem:[%s11144_s1 + $0x424] ss:$16 sps:$4 sm:$0xff]   ;;  %v7298_v34 = vld [vmem:[%s11144_s1 + $0x420] ss:$16 sps:$4 sm:$0xff]  }
  0x2f   :  { %4874 = vmatpush2.bf16.msra.mxu0 %v7232_v49  ;;  %v7303_v31 = vld [vmem:[%s11144_s1 + $0x624] ss:$16 sps:$4 sm:$0xff]   ;;  %v7301_v35 = vld [vmem:[%s11144_s1 + $0x620] ss:$16 sps:$4 sm:$0xff]  }
  0x30   :  { %4915 = vmatpush2.bf16.msra.mxu1 %v7233_v50  ;;  %4875 = vmatprep.subr.bf16.mxu0 %v7234_v52  ;;  %v8719_v32 = vld [vmem:[%s11145_s0 + $0x10] sm:$0xff] }
  0x31   :  { %4916 = vmatprep.subr.bf16.mxu1 %v7236_v53  ;;  %v8734_v36 = vcombine.high %v8719_v32, %v8719_v32  ;;  %v7306_v38 = vld [vmem:[%s11144_s1 + $0x404] ss:$16 sps:$4 sm:$0xff]   ;;  %v7304_v40 = vld [vmem:[%s11144_s1 + $0x400] ss:$16 sps:$4 sm:$0xff]  }
  0x32   :  { %v7309_v39 = vld [vmem:[%s11144_s1 + $0x604] ss:$16 sps:$4 sm:$0xff]   ;;  %v7307_v41 = vld [vmem:[%s11144_s1 + $0x600] ss:$16 sps:$4 sm:$0xff]  }
  0x33   :  { %4876 = vmatpush2.bf16.msra.mxu0 %v7238_v54  ;;  %v7312_v42 = vld [vmem:[%s11144_s1 + $0x5e4] ss:$16 sps:$4 sm:$0xff]   ;;  %v7310_v44 = vld [vmem:[%s11144_s1 + $0x5e0] ss:$16 sps:$4 sm:$0xff]  }
  0x34   :  { %4917 = vmatpush2.bf16.msra.mxu1 %v7239_v55  ;;  %4877 = vmatprep.subr.bf16.mxu0 %v7240_v56  ;;  %v7315_v43 = vld [vmem:[%s11144_s1 + $0x7e4] ss:$16 sps:$4 sm:$0xff]   ;;  %v7313_v45 = vld [vmem:[%s11144_s1 + $0x7e0] ss:$16 sps:$4 sm:$0xff]  }
  0x35   :  { %4918 = vmatprep.subr.bf16.mxu1 %v7242_v57  ;;  %v7318_v46 = vld [vmem:[%s11144_s1 + $0x5c4] ss:$16 sps:$4 sm:$0xff]   ;;  %v7316_v49 = vld [vmem:[%s11144_s1 + $0x5c0] ss:$16 sps:$4 sm:$0xff]  }
  0x36   :  { %v7321_v48 = vld [vmem:[%s11144_s1 + $0x7c4] ss:$16 sps:$4 sm:$0xff]   ;;  %v7319_v50 = vld [vmem:[%s11144_s1 + $0x7c0] ss:$16 sps:$4 sm:$0xff]  }
  0x37   :  { %4878 = vmatpush2.bf16.msra.mxu0 %v7244_v58  ;;  %v7324_v52 = vld [vmem:[%s11144_s1 + $0x5a4] ss:$16 sps:$4 sm:$0xff]   ;;  %v7322_v54 = vld [vmem:[%s11144_s1 + $0x5a0] ss:$16 sps:$4 sm:$0xff]  }
  0x38   :  { %4919 = vmatpush2.bf16.msra.mxu1 %v7245_v59  ;;  %4879 = vmatprep.subr.bf16.mxu0 %v7246_v60  ;;  %v7327_v53 = vld [vmem:[%s11144_s1 + $0x7a4] ss:$16 sps:$4 sm:$0xff]   ;;  %v7325_v55 = vld [vmem:[%s11144_s1 + $0x7a0] ss:$16 sps:$4 sm:$0xff]  }
  0x39   :  { %4920 = vmatprep.subr.bf16.mxu1 %v7248_v61  ;;  %v7330_v56 = vld [vmem:[%s11144_s1 + $0x584] ss:$16 sps:$4 sm:$0xff]   ;;  %v7328_v58 = vld [vmem:[%s11144_s1 + $0x580] ss:$16 sps:$4 sm:$0xff]  }
  0x3a   :  { %v7333_v57 = vld [vmem:[%s11144_s1 + $0x784] ss:$16 sps:$4 sm:$0xff]   ;;  %v7331_v59 = vld [vmem:[%s11144_s1 + $0x780] ss:$16 sps:$4 sm:$0xff]  }
  0x3b   :  { %4880 = vmatpush2.bf16.msra.mxu0 %v7250_v62  ;;  %v7336_v60 = vld [vmem:[%s11144_s1 + $0x564] ss:$16 sps:$4 sm:$0xff]   ;;  %v7334_v62 = vld [vmem:[%s11144_s1 + $0x560] ss:$16 sps:$4 sm:$0xff]  }
  0x3c   :  { %4921 = vmatpush2.bf16.msra.mxu1 %v7251_v63  ;;  %4881 = vmatprep.subr.bf16.mxu0 %v7252_v0  ;;  %v7339_v61 = vld [vmem:[%s11144_s1 + $0x764] ss:$16 sps:$4 sm:$0xff]   ;;  %v7337_v63 = vld [vmem:[%s11144_s1 + $0x760] ss:$16 sps:$4 sm:$0xff]  }
  0x3d   :  { %4922 = vmatprep.subr.bf16.mxu1 %v7254_v1  ;;  %v7342_v0 = vld [vmem:[%s11144_s1 + $0x544] ss:$16 sps:$4 sm:$0xff]  }
  0x3e   :  { %v7345_v1 = vld [vmem:[%s11144_s1 + $0x744] ss:$16 sps:$4 sm:$0xff]  }
  0x3f   :  { %4882 = vmatpush2.bf16.msra.mxu0 %v7256_v2  ;;  %v7340_v2 = vld [vmem:[%s11144_s1 + $0x540] ss:$16 sps:$4 sm:$0xff]  }
  0x40   :  { %4923 = vmatpush2.bf16.msra.mxu1 %v7257_v3  ;;  %4933 = vmatprep.subr.bf16.mxu0 %v7264_v4  ;;  %v7343_v3 = vld [vmem:[%s11144_s1 + $0x740] ss:$16 sps:$4 sm:$0xff]   ;;  %v7348_v4 = vld [vmem:[%s11144_s1 + $0x524] ss:$16 sps:$4 sm:$0xff]  }
  0x41   :  { %4974 = vmatprep.subr.bf16.mxu1 %v7267_v5  ;;  %v7351_v5 = vld [vmem:[%s11144_s1 + $0x724] ss:$16 sps:$4 sm:$0xff]  }
  0x42   :  { %4884 = vmatmul.mubr.bf16.vlgmr.msra.gmra.mxu0 %v8638_v6 }
  0x43   :  { %4925 = vmatmul.mubr.bf16.vlgmr.msra.gmra.mxu1 %v8640_v7  ;;  %4934 = vmatpush1.bf16.msra.mxu0 %v7262_v8  ;;  %v7346_v8 = vld [vmem:[%s11144_s1 + $0x520] ss:$16 sps:$4 sm:$0xff]  }
  0x44   :  { %4975 = vmatpush1.bf16.msra.mxu1 %v7265_v9  ;;  %4935 = vmatprep.subr.bf16.mxu0 %v7270_v10  ;;  %v7349_v9 = vld [vmem:[%s11144_s1 + $0x720] ss:$16 sps:$4 sm:$0xff]   ;;  %v7354_v10 = vld [vmem:[%s11144_s1 + $0x504] ss:$16 sps:$4 sm:$0xff]  }
  0x45   :  { %4976 = vmatprep.subr.bf16.mxu1 %v7273_v11  ;;  %4965 = vmatprep.mubr.bf16.mxu0 %v8734_v36  ;;  %v7357_v11 = vld [vmem:[%s11144_s1 + $0x704] ss:$16 sps:$4 sm:$0xff]  }
  0x46   :  { %5006 = vmatprep.mubr.bf16.mxu1 %v8738_v37 }
  0x47   :  { %4936 = vmatpush1.bf16.msra.mxu0 %v7268_v12  ;;  %v7352_v12 = vld [vmem:[%s11144_s1 + $0x500] ss:$16 sps:$4 sm:$0xff]  }
  0x48   :  { %4977 = vmatpush1.bf16.msra.mxu1 %v7271_v13  ;;  %4937 = vmatprep.subr.bf16.mxu0 %v7276_v14  ;;  %v7355_v13 = vld [vmem:[%s11144_s1 + $0x700] ss:$16 sps:$4 sm:$0xff]   ;;  %v7364_v14 = vld [vmem:[%s11144_s1 + $0x8e4] ss:$16 sps:$4 sm:$0xff]  }
  0x49   :  { %4978 = vmatprep.subr.bf16.mxu1 %v7279_v15  ;;  %v7367_v15 = vld [vmem:[%s11144_s1 + $0xae4] ss:$16 sps:$4 sm:$0xff]  }
  0x4b   :  { %4938 = vmatpush1.bf16.msra.mxu0 %v7274_v16  ;;  %v8858_v16 = vcombine.low %v8719_v32, %v8719_v32  ;;  %v7382_v32 = vld [vmem:[%s11144_s1 + $0x884] ss:$16 sps:$4 sm:$0xff]  }
  0x4c   :  { %4979 = vmatpush1.bf16.msra.mxu1 %v7277_v17  ;;  %4939 = vmatprep.subr.bf16.mxu0 %v7282_v18  ;;  %v8862_v17 = vcombine.low %v8724_v33, %v8724_v33  ;;  %v7362_v18 = vld [vmem:[%s11144_s1 + $0x8e0] ss:$16 sps:$4 sm:$0xff]   ;;  %v7385_v33 = vld [vmem:[%s11144_s1 + $0xa84] ss:$16 sps:$4 sm:$0xff]  }
  0x4d   :  { %4980 = vmatprep.subr.bf16.mxu1 %v7285_v19  ;;  %v7365_v19 = vld [vmem:[%s11144_s1 + $0xae0] ss:$16 sps:$4 sm:$0xff]  }
  0x4f   :  { %4940 = vmatpush1.bf16.msra.mxu0 %v7280_v20  ;;  %v7370_v20 = vld [vmem:[%s11144_s1 + $0x8c4] ss:$16 sps:$4 sm:$0xff]  }
  0x50   :  { %4981 = vmatpush1.bf16.msra.mxu1 %v7283_v21  ;;  %4941 = vmatprep.subr.bf16.mxu0 %v7288_v22  ;;  %v7373_v21 = vld [vmem:[%s11144_s1 + $0xac4] ss:$16 sps:$4 sm:$0xff]  }
  0x51   :  { %4982 = vmatprep.subr.bf16.mxu1 %v7291_v23  ;;  %v8879_v22 = vld [vmem:[%s11145_s0 + $0x20] sm:$0xff]  ;;  %v8884_v23 = vld [vmem:[%s11145_s0 + $0x28] sm:$0xff] }
  0x53   :  { %4942 = vmatpush1.bf16.msra.mxu0 %v7286_v24  ;;  %v8888_v24 = vcombine.high %v8879_v22, %v8879_v22 }
  0x54   :  { %4983 = vmatpush1.bf16.msra.mxu1 %v7289_v25  ;;  %4943 = vmatprep.subr.bf16.mxu0 %v7294_v26  ;;  %v8892_v25 = vcombine.high %v8884_v23, %v8884_v23  ;;  %v7368_v26 = vld [vmem:[%s11144_s1 + $0x8c0] ss:$16 sps:$4 sm:$0xff]  }
  0x55   :  { %4984 = vmatprep.subr.bf16.mxu1 %v7297_v27  ;;  %v7371_v27 = vld [vmem:[%s11144_s1 + $0xac0] ss:$16 sps:$4 sm:$0xff]  }
  0x57   :  { %4944 = vmatpush1.bf16.msra.mxu0 %v7292_v28  ;;  %v7376_v28 = vld [vmem:[%s11144_s1 + $0x8a4] ss:$16 sps:$4 sm:$0xff]  }
  0x58   :  { %4985 = vmatpush1.bf16.msra.mxu1 %v7295_v29  ;;  %4945 = vmatprep.subr.bf16.mxu0 %v7300_v30  ;;  %v7379_v29 = vld [vmem:[%s11144_s1 + $0xaa4] ss:$16 sps:$4 sm:$0xff]   ;;  %v7374_v30 = vld [vmem:[%s11144_s1 + $0x8a0] ss:$16 sps:$4 sm:$0xff]  }
  0x59   :  { %4986 = vmatprep.subr.bf16.mxu1 %v7303_v31  ;;  %v7377_v31 = vld [vmem:[%s11144_s1 + $0xaa0] ss:$16 sps:$4 sm:$0xff]  }
  0x5b   :  { %4946 = vmatpush1.bf16.msra.mxu0 %v7298_v34  ;;  %v7380_v34 = vld [vmem:[%s11144_s1 + $0x880] ss:$16 sps:$4 sm:$0xff]  }
  0x5c   :  { %4987 = vmatpush1.bf16.msra.mxu1 %v7301_v35  ;;  %4947 = vmatprep.subr.bf16.mxu0 %v7306_v38  ;;  %v7383_v35 = vld [vmem:[%s11144_s1 + $0xa80] ss:$16 sps:$4 sm:$0xff]   ;;  %v7388_v38 = vld [vmem:[%s11144_s1 + $0x864] ss:$16 sps:$4 sm:$0xff]  }
  0x5d   :  { %4988 = vmatprep.subr.bf16.mxu1 %v7309_v39  ;;  %v7391_v39 = vld [vmem:[%s11144_s1 + $0xa64] ss:$16 sps:$4 sm:$0xff]  }
  0x5f   :  { %4948 = vmatpush1.bf16.msra.mxu0 %v7304_v40  ;;  %v7386_v40 = vld [vmem:[%s11144_s1 + $0x860] ss:$16 sps:$4 sm:$0xff]  }
  0x60   :  { %4989 = vmatpush1.bf16.msra.mxu1 %v7307_v41  ;;  %4949 = vmatprep.subr.bf16.mxu0 %v7312_v42  ;;  %v7389_v41 = vld [vmem:[%s11144_s1 + $0xa60] ss:$16 sps:$4 sm:$0xff]   ;;  %v7394_v42 = vld [vmem:[%s11144_s1 + $0x844] ss:$16 sps:$4 sm:$0xff]  }
  0x61   :  { %4990 = vmatprep.subr.bf16.mxu1 %v7315_v43  ;;  %v7397_v43 = vld [vmem:[%s11144_s1 + $0xa44] ss:$16 sps:$4 sm:$0xff]  }
  0x63   :  { %4950 = vmatpush2.bf16.msra.mxu0 %v7310_v44  ;;  %v7392_v44 = vld [vmem:[%s11144_s1 + $0x840] ss:$16 sps:$4 sm:$0xff]  }
  0x64   :  { %4991 = vmatpush2.bf16.msra.mxu1 %v7313_v45  ;;  %4951 = vmatprep.subr.bf16.mxu0 %v7318_v46  ;;  %v7395_v45 = vld [vmem:[%s11144_s1 + $0xa40] ss:$16 sps:$4 sm:$0xff]   ;;  %v7400_v46 = vld [vmem:[%s11144_s1 + $0x824] ss:$16 sps:$4 sm:$0xff]  }
  0x65   :  { %4992 = vmatprep.subr.bf16.mxu1 %v7321_v48  ;;  %v7403_v48 = vld [vmem:[%s11144_s1 + $0xa24] ss:$16 sps:$4 sm:$0xff]  }
  0x67   :  { %4952 = vmatpush2.bf16.msra.mxu0 %v7316_v49  ;;  %v7398_v49 = vld [vmem:[%s11144_s1 + $0x820] ss:$16 sps:$4 sm:$0xff]  }
  0x68   :  { %4993 = vmatpush2.bf16.msra.mxu1 %v7319_v50  ;;  %4953 = vmatprep.subr.bf16.mxu0 %v7324_v52  ;;  %v7401_v50 = vld [vmem:[%s11144_s1 + $0xa20] ss:$16 sps:$4 sm:$0xff]   ;;  %v7406_v52 = vld [vmem:[%s11144_s1 + $0x804] ss:$16 sps:$4 sm:$0xff]  }
  0x69   :  { %4994 = vmatprep.subr.bf16.mxu1 %v7327_v53  ;;  %v7409_v53 = vld [vmem:[%s11144_s1 + $0xa04] ss:$16 sps:$4 sm:$0xff]  }
  0x6b   :  { %4954 = vmatpush2.bf16.msra.mxu0 %v7322_v54  ;;  %v7404_v54 = vld [vmem:[%s11144_s1 + $0x800] ss:$16 sps:$4 sm:$0xff]  }
  0x6c   :  { %4995 = vmatpush2.bf16.msra.mxu1 %v7325_v55  ;;  %4955 = vmatprep.subr.bf16.mxu0 %v7330_v56  ;;  %v7407_v55 = vld [vmem:[%s11144_s1 + $0xa00] ss:$16 sps:$4 sm:$0xff]   ;;  %v7412_v56 = vld [vmem:[%s11144_s1 + $0x9e4] ss:$16 sps:$4 sm:$0xff]  }
  0x6d   :  { %4996 = vmatprep.subr.bf16.mxu1 %v7333_v57  ;;  %v7415_v57 = vld [vmem:[%s11144_s1 + $0xbe4] ss:$16 sps:$4 sm:$0xff]  }
  0x6f   :  { %4956 = vmatpush2.bf16.msra.mxu0 %v7328_v58  ;;  %v7410_v58 = vld [vmem:[%s11144_s1 + $0x9e0] ss:$16 sps:$4 sm:$0xff]  }
  0x70   :  { %4997 = vmatpush2.bf16.msra.mxu1 %v7331_v59  ;;  %4957 = vmatprep.subr.bf16.mxu0 %v7336_v60  ;;  %v7413_v59 = vld [vmem:[%s11144_s1 + $0xbe0] ss:$16 sps:$4 sm:$0xff]   ;;  %v7418_v60 = vld [vmem:[%s11144_s1 + $0x9c4] ss:$16 sps:$4 sm:$0xff]  }
  0x71   :  { %4998 = vmatprep.subr.bf16.mxu1 %v7339_v61  ;;  %v7421_v61 = vld [vmem:[%s11144_s1 + $0xbc4] ss:$16 sps:$4 sm:$0xff]  }
  0x73   :  { %4958 = vmatpush2.bf16.msra.mxu0 %v7334_v62  ;;  %v7416_v62 = vld [vmem:[%s11144_s1 + $0x9c0] ss:$16 sps:$4 sm:$0xff]  }
  0x74   :  { %4999 = vmatpush2.bf16.msra.mxu1 %v7337_v63  ;;  %4959 = vmatprep.subr.bf16.mxu0 %v7342_v0  ;;  %v7419_v63 = vld [vmem:[%s11144_s1 + $0xbc0] ss:$16 sps:$4 sm:$0xff]   ;;  %v7424_v0 = vld [vmem:[%s11144_s1 + $0x9a4] ss:$16 sps:$4 sm:$0xff]  }
  0x75   :  { %5000 = vmatprep.subr.bf16.mxu1 %v7345_v1  ;;  %v7427_v1 = vld [vmem:[%s11144_s1 + $0xba4] ss:$16 sps:$4 sm:$0xff]  }
  0x77   :  { %4960 = vmatpush2.bf16.msra.mxu0 %v7340_v2  ;;  %v7422_v2 = vld [vmem:[%s11144_s1 + $0x9a0] ss:$16 sps:$4 sm:$0xff]  }
  0x78   :  { %5001 = vmatpush2.bf16.msra.mxu1 %v7343_v3  ;;  %4961 = vmatprep.subr.bf16.mxu0 %v7348_v4  ;;  %v7425_v3 = vld [vmem:[%s11144_s1 + $0xba0] ss:$16 sps:$4 sm:$0xff]   ;;  %v7430_v4 = vld [vmem:[%s11144_s1 + $0x984] ss:$16 sps:$4 sm:$0xff]  }
  0x79   :  { %5002 = vmatprep.subr.bf16.mxu1 %v7351_v5  ;;  %v7433_v5 = vld [vmem:[%s11144_s1 + $0xb84] ss:$16 sps:$4 sm:$0xff]  }
  0x7b   :  { %4962 = vmatpush2.bf16.msra.mxu0 %v7346_v8  ;;  %v7428_v8 = vld [vmem:[%s11144_s1 + $0x980] ss:$16 sps:$4 sm:$0xff]  }
  0x7c   :  { %5003 = vmatpush2.bf16.msra.mxu1 %v7349_v9  ;;  %4963 = vmatprep.subr.bf16.mxu0 %v7354_v10  ;;  %v7431_v9 = vld [vmem:[%s11144_s1 + $0xb80] ss:$16 sps:$4 sm:$0xff]   ;;  %v7436_v10 = vld [vmem:[%s11144_s1 + $0x964] ss:$16 sps:$4 sm:$0xff]  }
  0x7d   :  { %5004 = vmatprep.subr.bf16.mxu1 %v7357_v11  ;;  %v7439_v11 = vld [vmem:[%s11144_s1 + $0xb64] ss:$16 sps:$4 sm:$0xff]  }
  0x7f   :  { %4964 = vmatpush2.bf16.msra.mxu0 %v7352_v12  ;;  %v7434_v12 = vld [vmem:[%s11144_s1 + $0x960] ss:$16 sps:$4 sm:$0xff]  }
  0x80   :  { %5005 = vmatpush2.bf16.msra.mxu1 %v7355_v13  ;;  %5015 = vmatprep.subr.bf16.mxu0 %v7364_v14  ;;  %v7437_v13 = vld [vmem:[%s11144_s1 + $0xb60] ss:$16 sps:$4 sm:$0xff]   ;;  %v7442_v14 = vld [vmem:[%s11144_s1 + $0x944] ss:$16 sps:$4 sm:$0xff]  }
  0x81   :  { %5056 = vmatprep.subr.bf16.mxu1 %v7367_v15  ;;  %v7445_v15 = vld [vmem:[%s11144_s1 + $0xb44] ss:$16 sps:$4 sm:$0xff]  }
  0x82   :  { %4966 = vmatmul.mubr.bf16.vlgmr.msra.gmra.mxu0 %v8858_v16 }
  0x83   :  { %5007 = vmatmul.mubr.bf16.vlgmr.msra.gmra.mxu1 %v8862_v17  ;;  %5016 = vmatpush1.bf16.msra.mxu0 %v7362_v18  ;;  %v7440_v18 = vld [vmem:[%s11144_s1 + $0x940] ss:$16 sps:$4 sm:$0xff]  }
  0x84   :  { %5057 = vmatpush1.bf16.msra.mxu1 %v7365_v19  ;;  %5017 = vmatprep.subr.bf16.mxu0 %v7370_v20  ;;  %v7443_v19 = vld [vmem:[%s11144_s1 + $0xb40] ss:$16 sps:$4 sm:$0xff]   ;;  %v7448_v20 = vld [vmem:[%s11144_s1 + $0x924] ss:$16 sps:$4 sm:$0xff]  }
  0x85   :  { %5058 = vmatprep.subr.bf16.mxu1 %v7373_v21  ;;  %5047 = vmatprep.mubr.bf16.mxu0 %v8888_v24  ;;  %v7451_v21 = vld [vmem:[%s11144_s1 + $0xb24] ss:$16 sps:$4 sm:$0xff]  }
  0x86   :  { %5088 = vmatprep.mubr.bf16.mxu1 %v8892_v25 }
  0x87   :  { %5018 = vmatpush1.bf16.msra.mxu0 %v7368_v26  ;;  %v7446_v26 = vld [vmem:[%s11144_s1 + $0x920] ss:$16 sps:$4 sm:$0xff]  }
  0x88   :  { %5059 = vmatpush1.bf16.msra.mxu1 %v7371_v27  ;;  %5019 = vmatprep.subr.bf16.mxu0 %v7376_v28  ;;  %v7449_v27 = vld [vmem:[%s11144_s1 + $0xb20] ss:$16 sps:$4 sm:$0xff]   ;;  %v7454_v28 = vld [vmem:[%s11144_s1 + $0x904] ss:$16 sps:$4 sm:$0xff]  }
  0x89   :  { %5060 = vmatprep.subr.bf16.mxu1 %v7379_v29  ;;  %v7457_v29 = vld [vmem:[%s11144_s1 + $0xb04] ss:$16 sps:$4 sm:$0xff]  }
  0x8b   :  { %5020 = vmatpush1.bf16.msra.mxu0 %v7374_v30  ;;  %v7452_v30 = vld [vmem:[%s11144_s1 + $0x900] ss:$16 sps:$4 sm:$0xff]  }
  0x8c   :  { %5061 = vmatpush1.bf16.msra.mxu1 %v7377_v31  ;;  %5021 = vmatprep.subr.bf16.mxu0 %v7382_v32  ;;  %v7455_v31 = vld [vmem:[%s11144_s1 + $0xb00] ss:$16 sps:$4 sm:$0xff]   ;;  %v7464_v32 = vld [vmem:[%s11144_s1 + $0xce4] ss:$16 sps:$4 sm:$0xff]  }
  0x8d   :  { %5062 = vmatprep.subr.bf16.mxu1 %v7385_v33  ;;  %v7467_v33 = vld [vmem:[%s11144_s1 + $0xee4] ss:$16 sps:$4 sm:$0xff]  }
  0x8f   :  { %5022 = vmatpush1.bf16.msra.mxu0 %v7380_v34  ;;  %v7462_v34 = vld [vmem:[%s11144_s1 + $0xce0] ss:$16 sps:$4 sm:$0xff]  }
  0x90   :  { %5063 = vmatpush1.bf16.msra.mxu1 %v7383_v35  ;;  %5023 = vmatprep.subr.bf16.mxu0 %v7388_v38  ;;  %v9084_v35 = vld [vmem:[%s11145_s0 + $0x30] sm:$0xff]  ;;  %v9088_v38 = vcombine.low %v8879_v22, %v8879_v22 }
  0x91   :  { %5064 = vmatprep.subr.bf16.mxu1 %v7391_v39  ;;  %v9092_v39 = vcombine.low %v8884_v23, %v8884_v23  ;;  %v7470_v22 = vld [vmem:[%s11144_s1 + $0xcc4] ss:$16 sps:$4 sm:$0xff]  }
  0x92   :  { %v7473_v23 = vld [vmem:[%s11144_s1 + $0xec4] ss:$16 sps:$4 sm:$0xff]  }
  0x93   :  { %5024 = vmatpush1.bf16.msra.mxu0 %v7386_v40  ;;  %v9097_v40 = vld [vmem:[%s11145_s0 + $0x38] sm:$0xff] }
  0x94   :  { %5065 = vmatpush1.bf16.msra.mxu1 %v7389_v41  ;;  %5025 = vmatprep.subr.bf16.mxu0 %v7394_v42  ;;  %v7465_v41 = vld [vmem:[%s11144_s1 + $0xee0] ss:$16 sps:$4 sm:$0xff]   ;;  %v9110_v42 = vcombine.high %v9084_v35, %v9084_v35 }
  0x95   :  { %5066 = vmatprep.subr.bf16.mxu1 %v7397_v43  ;;  %v9114_v43 = vcombine.high %v9097_v40, %v9097_v40 }
  0x97   :  { %5026 = vmatpush1.bf16.msra.mxu0 %v7392_v44  ;;  %v7468_v44 = vld [vmem:[%s11144_s1 + $0xcc0] ss:$16 sps:$4 sm:$0xff]  }
  0x98   :  { %5067 = vmatpush1.bf16.msra.mxu1 %v7395_v45  ;;  %5027 = vmatprep.subr.bf16.mxu0 %v7400_v46  ;;  %v7471_v45 = vld [vmem:[%s11144_s1 + $0xec0] ss:$16 sps:$4 sm:$0xff]   ;;  %v7476_v46 = vld [vmem:[%s11144_s1 + $0xca4] ss:$16 sps:$4 sm:$0xff]  }
  0x99   :  { %5068 = vmatprep.subr.bf16.mxu1 %v7403_v48  ;;  %v7479_v48 = vld [vmem:[%s11144_s1 + $0xea4] ss:$16 sps:$4 sm:$0xff]  }
  0x9b   :  { %5028 = vmatpush1.bf16.msra.mxu0 %v7398_v49  ;;  %v7474_v49 = vld [vmem:[%s11144_s1 + $0xca0] ss:$16 sps:$4 sm:$0xff]  }
  0x9c   :  { %5069 = vmatpush1.bf16.msra.mxu1 %v7401_v50  ;;  %5029 = vmatprep.subr.bf16.mxu0 %v7406_v52  ;;  %v7477_v50 = vld [vmem:[%s11144_s1 + $0xea0] ss:$16 sps:$4 sm:$0xff]   ;;  %v7482_v52 = vld [vmem:[%s11144_s1 + $0xc84] ss:$16 sps:$4 sm:$0xff]  }
  0x9d   :  { %5070 = vmatprep.subr.bf16.mxu1 %v7409_v53  ;;  %v7485_v53 = vld [vmem:[%s11144_s1 + $0xe84] ss:$16 sps:$4 sm:$0xff]  }
  0x9f   :  { %5030 = vmatpush1.bf16.msra.mxu0 %v7404_v54  ;;  %v7480_v54 = vld [vmem:[%s11144_s1 + $0xc80] ss:$16 sps:$4 sm:$0xff]  }
  0xa0   :  { %5071 = vmatpush1.bf16.msra.mxu1 %v7407_v55  ;;  %5031 = vmatprep.subr.bf16.mxu0 %v7412_v56  ;;  %v7483_v55 = vld [vmem:[%s11144_s1 + $0xe80] ss:$16 sps:$4 sm:$0xff]   ;;  %v7488_v56 = vld [vmem:[%s11144_s1 + $0xc64] ss:$16 sps:$4 sm:$0xff]  }
  0xa1   :  { %5072 = vmatprep.subr.bf16.mxu1 %v7415_v57  ;;  %v7491_v57 = vld [vmem:[%s11144_s1 + $0xe64] ss:$16 sps:$4 sm:$0xff]  }
  0xa3   :  { %5032 = vmatpush2.bf16.msra.mxu0 %v7410_v58  ;;  %v7486_v58 = vld [vmem:[%s11144_s1 + $0xc60] ss:$16 sps:$4 sm:$0xff]  }
  0xa4   :  { %5073 = vmatpush2.bf16.msra.mxu1 %v7413_v59  ;;  %5033 = vmatprep.subr.bf16.mxu0 %v7418_v60  ;;  %v7489_v59 = vld [vmem:[%s11144_s1 + $0xe60] ss:$16 sps:$4 sm:$0xff]   ;;  %v7494_v60 = vld [vmem:[%s11144_s1 + $0xc44] ss:$16 sps:$4 sm:$0xff]  }
  0xa5   :  { %5074 = vmatprep.subr.bf16.mxu1 %v7421_v61  ;;  %v7497_v61 = vld [vmem:[%s11144_s1 + $0xe44] ss:$16 sps:$4 sm:$0xff]  }
  0xa7   :  { %5034 = vmatpush2.bf16.msra.mxu0 %v7416_v62  ;;  %v7492_v62 = vld [vmem:[%s11144_s1 + $0xc40] ss:$16 sps:$4 sm:$0xff]  }
  0xa8   :  { %5075 = vmatpush2.bf16.msra.mxu1 %v7419_v63  ;;  %5035 = vmatprep.subr.bf16.mxu0 %v7424_v0  ;;  %v7495_v63 = vld [vmem:[%s11144_s1 + $0xe40] ss:$16 sps:$4 sm:$0xff]   ;;  %v7500_v0 = vld [vmem:[%s11144_s1 + $0xc24] ss:$16 sps:$4 sm:$0xff]  }
  0xa9   :  { %5076 = vmatprep.subr.bf16.mxu1 %v7427_v1  ;;  %v7503_v1 = vld [vmem:[%s11144_s1 + $0xe24] ss:$16 sps:$4 sm:$0xff]  }
  0xab   :  { %5036 = vmatpush2.bf16.msra.mxu0 %v7422_v2  ;;  %v7498_v2 = vld [vmem:[%s11144_s1 + $0xc20] ss:$16 sps:$4 sm:$0xff]  }
  0xac   :  { %5077 = vmatpush2.bf16.msra.mxu1 %v7425_v3  ;;  %5037 = vmatprep.subr.bf16.mxu0 %v7430_v4  ;;  %v7501_v3 = vld [vmem:[%s11144_s1 + $0xe20] ss:$16 sps:$4 sm:$0xff]   ;;  %v7506_v4 = vld [vmem:[%s11144_s1 + $0xc04] ss:$16 sps:$4 sm:$0xff]  }
  0xad   :  { %5078 = vmatprep.subr.bf16.mxu1 %v7433_v5  ;;  %v7509_v5 = vld [vmem:[%s11144_s1 + $0xe04] ss:$16 sps:$4 sm:$0xff]  }
  0xaf   :  { %5038 = vmatpush2.bf16.msra.mxu0 %v7428_v8  ;;  %v7504_v8 = vld [vmem:[%s11144_s1 + $0xc00] ss:$16 sps:$4 sm:$0xff]  }
  0xb0   :  { %5079 = vmatpush2.bf16.msra.mxu1 %v7431_v9  ;;  %5039 = vmatprep.subr.bf16.mxu0 %v7436_v10  ;;  %v7507_v9 = vld [vmem:[%s11144_s1 + $0xe00] ss:$16 sps:$4 sm:$0xff]   ;;  %v7512_v10 = vld [vmem:[%s11144_s1 + $0xde4] ss:$16 sps:$4 sm:$0xff]  }
  0xb1   :  { %5080 = vmatprep.subr.bf16.mxu1 %v7439_v11  ;;  %v7515_v11 = vld [vmem:[%s11144_s1 + $0xfe4] ss:$16 sps:$4 sm:$0xff]  }
  0xb3   :  { %5040 = vmatpush2.bf16.msra.mxu0 %v7434_v12  ;;  %v7510_v12 = vld [vmem:[%s11144_s1 + $0xde0] ss:$16 sps:$4 sm:$0xff]  }
  0xb4   :  { %5081 = vmatpush2.bf16.msra.mxu1 %v7437_v13  ;;  %5041 = vmatprep.subr.bf16.mxu0 %v7442_v14  ;;  %v7513_v13 = vld [vmem:[%s11144_s1 + $0xfe0] ss:$16 sps:$4 sm:$0xff]   ;;  %v7518_v14 = vld [vmem:[%s11144_s1 + $0xdc4] ss:$16 sps:$4 sm:$0xff]  }
  0xb5   :  { %5082 = vmatprep.subr.bf16.mxu1 %v7445_v15  ;;  %v7521_v15 = vld [vmem:[%s11144_s1 + $0xfc4] ss:$16 sps:$4 sm:$0xff]  }
  0xb7   :  { %5042 = vmatpush2.bf16.msra.mxu0 %v7440_v18  ;;  %v7516_v18 = vld [vmem:[%s11144_s1 + $0xdc0] ss:$16 sps:$4 sm:$0xff]  }
  0xb8   :  { %5083 = vmatpush2.bf16.msra.mxu1 %v7443_v19  ;;  %5043 = vmatprep.subr.bf16.mxu0 %v7448_v20  ;;  %v7519_v19 = vld [vmem:[%s11144_s1 + $0xfc0] ss:$16 sps:$4 sm:$0xff]   ;;  %v7524_v20 = vld [vmem:[%s11144_s1 + $0xda4] ss:$16 sps:$4 sm:$0xff]  }
  0xb9   :  { %5084 = vmatprep.subr.bf16.mxu1 %v7451_v21  ;;  %v7527_v21 = vld [vmem:[%s11144_s1 + $0xfa4] ss:$16 sps:$4 sm:$0xff]  }
  0xbb   :  { %5044 = vmatpush2.bf16.msra.mxu0 %v7446_v26  ;;  %v7522_v26 = vld [vmem:[%s11144_s1 + $0xda0] ss:$16 sps:$4 sm:$0xff]  }
  0xbc   :  { %5085 = vmatpush2.bf16.msra.mxu1 %v7449_v27  ;;  %5045 = vmatprep.subr.bf16.mxu0 %v7454_v28  ;;  %v7525_v27 = vld [vmem:[%s11144_s1 + $0xfa0] ss:$16 sps:$4 sm:$0xff]   ;;  %v7530_v28 = vld [vmem:[%s11144_s1 + $0xd84] ss:$16 sps:$4 sm:$0xff]  }
  0xbd   :  { %5086 = vmatprep.subr.bf16.mxu1 %v7457_v29  ;;  %v7533_v29 = vld [vmem:[%s11144_s1 + $0xf84] ss:$16 sps:$4 sm:$0xff]  }
  0xbf   :  { %5046 = vmatpush2.bf16.msra.mxu0 %v7452_v30  ;;  %v7528_v30 = vld [vmem:[%s11144_s1 + $0xd80] ss:$16 sps:$4 sm:$0xff]  }
  0xc0   :  { %5087 = vmatpush2.bf16.msra.mxu1 %v7455_v31  ;;  %5097 = vmatprep.subr.bf16.mxu0 %v7464_v32  ;;  %v7531_v31 = vld [vmem:[%s11144_s1 + $0xf80] ss:$16 sps:$4 sm:$0xff]   ;;  %v7536_v32 = vld [vmem:[%s11144_s1 + $0xd64] ss:$16 sps:$4 sm:$0xff]  }
  0xc1   :  { %5138 = vmatprep.subr.bf16.mxu1 %v7467_v33  ;;  %v7539_v33 = vld [vmem:[%s11144_s1 + $0xf64] ss:$16 sps:$4 sm:$0xff]  }
  0xc2   :  { %5048 = vmatmul.mubr.bf16.vlgmr.msra.gmra.mxu0 %v9088_v38 }
  0xc3   :  { %5089 = vmatmul.mubr.bf16.vlgmr.msra.gmra.mxu1 %v9092_v39  ;;  %5098 = vmatpush1.bf16.msra.mxu0 %v7462_v34  ;;  %v7534_v34 = vld [vmem:[%s11144_s1 + $0xd60] ss:$16 sps:$4 sm:$0xff]  }
  0xc4   :  { %5139 = vmatpush1.bf16.msra.mxu1 %v7465_v41  ;;  %5099 = vmatprep.subr.bf16.mxu0 %v7470_v22  ;;  %v7537_v41 = vld [vmem:[%s11144_s1 + $0xf60] ss:$16 sps:$4 sm:$0xff]   ;;  %v7542_v22 = vld [vmem:[%s11144_s1 + $0xd44] ss:$16 sps:$4 sm:$0xff]  }
  0xc5   :  { %5140 = vmatprep.subr.bf16.mxu1 %v7473_v23  ;;  %5129 = vmatprep.mubr.bf16.mxu0 %v9110_v42  ;;  %v7545_v23 = vld [vmem:[%s11144_s1 + $0xf44] ss:$16 sps:$4 sm:$0xff]  }
  0xc6   :  { %5170 = vmatprep.mubr.bf16.mxu1 %v9114_v43 }
  0xc7   :  { %5100 = vmatpush1.bf16.msra.mxu0 %v7468_v44  ;;  %v7540_v44 = vld [vmem:[%s11144_s1 + $0xd40] ss:$16 sps:$4 sm:$0xff]  }
  0xc8   :  { %5141 = vmatpush1.bf16.msra.mxu1 %v7471_v45  ;;  %5101 = vmatprep.subr.bf16.mxu0 %v7476_v46  ;;  %v7543_v45 = vld [vmem:[%s11144_s1 + $0xf40] ss:$16 sps:$4 sm:$0xff]   ;;  %v7548_v46 = vld [vmem:[%s11144_s1 + $0xd24] ss:$16 sps:$4 sm:$0xff]  }
  0xc9   :  { %5142 = vmatprep.subr.bf16.mxu1 %v7479_v48  ;;  %v820_v48 = vlaneseq }
  0xcb   :  { %5102 = vmatpush1.bf16.msra.mxu0 %v7474_v49  ;;  %v7551_v49 = vld [vmem:[%s11144_s1 + $0xf24] ss:$16 sps:$4 sm:$0xff]  }
  0xcc   :  { %5143 = vmatpush1.bf16.msra.mxu1 %v7477_v50  ;;  %5103 = vmatprep.subr.bf16.mxu0 %v7482_v52  ;;  %v7546_v50 = vld [vmem:[%s11144_s1 + $0xd20] ss:$16 sps:$4 sm:$0xff]  }
  0xcd   :  { %5144 = vmatprep.subr.bf16.mxu1 %v7485_v53  ;;  %v7549_v52 = vld [vmem:[%s11144_s1 + $0xf20] ss:$16 sps:$4 sm:$0xff]   ;;  %v7554_v53 = vld [vmem:[%s11144_s1 + $0xd04] ss:$16 sps:$4 sm:$0xff]  }
  0xcf   :  { %5104 = vmatpush1.bf16.msra.mxu0 %v7480_v54  ;;  %v9285_v54 = vshrl.u32 %v820_v48, 7  ;;  %v7586_v48 = vld [vmem:[%s11144_s1 + $0x1060] ss:$16 sps:$4 sm:$0xff]  }
  0xd0   :  { %5145 = vmatpush1.bf16.msra.mxu1 %v7483_v55  ;;  %5105 = vmatprep.subr.bf16.mxu0 %v7488_v56  ;;  %v7557_v55 = vld [vmem:[%s11144_s1 + $0xf04] ss:$16 sps:$4 sm:$0xff]   ;;  %v7552_v56 = vld [vmem:[%s11144_s1 + $0xd00] ss:$16 sps:$4 sm:$0xff]  }
  0xd1   :  { %5146 = vmatprep.subr.bf16.mxu1 %v7491_v57  ;;  %v7555_v57 = vld [vmem:[%s11144_s1 + $0xf00] ss:$16 sps:$4 sm:$0xff]  }
  0xd3   :  { %5106 = vmatpush1.bf16.msra.mxu0 %v7486_v58  ;;  %v818_v58 = vld [vmem:[%s11146_s2] sm:$0xf] }
  0xd4   :  { %5147 = vmatpush1.bf16.msra.mxu1 %v7489_v59  ;;  %5107 = vmatprep.subr.bf16.mxu0 %v7494_v60  ;;  %v822_v59 = vsub.s32 0, %v9285_v54  ;;  %v7564_v60 = vld [vmem:[%s11144_s1 + $0x10e4] ss:$16 sps:$4 sm:$0xff]  }
  0xd5   :  { %5148 = vmatprep.subr.bf16.mxu1 %v7497_v61  ;;  %v7567_v61 = vld [vmem:[%s11144_s1 + $0x12e4] ss:$16 sps:$4 sm:$0xff]  }
  0xd7   :  { %5108 = vmatpush1.bf16.msra.mxu0 %v7492_v62  ;;  %v7562_v62 = vld [vmem:[%s11144_s1 + $0x10e0] ss:$16 sps:$4 sm:$0xff]  }
  0xd8   :  { %5149 = vmatpush1.bf16.msra.mxu1 %v7495_v63  ;;  %5109 = vmatprep.subr.bf16.mxu0 %v7500_v0  ;;  %v826_v63 = vsub.s32 1, %v9285_v54  ;;  %v9312_v0 = vcombine.low %v9084_v35, %v9084_v35  ;;  %v7565_v35 = vld [vmem:[%s11144_s1 + $0x12e0] ss:$16 sps:$4 sm:$0xff]  }
  0xd9   :  { %5150 = vmatprep.subr.bf16.mxu1 %v7503_v1  ;;  %v9316_v1 = vcombine.low %v9097_v40, %v9097_v40  ;;  %v7570_v40 = vld [vmem:[%s11144_s1 + $0x10c4] ss:$16 sps:$4 sm:$0xff]  }
  0xdb   :  { %5110 = vmatpush1.bf16.msra.mxu0 %v7498_v2  ;;  %v9321_v2 = vld [vmem:[%s11145_s0 + $0x40] sm:$0xff] }
  0xdc   :  { %5151 = vmatpush1.bf16.msra.mxu1 %v7501_v3  ;;  %5111 = vmatprep.subr.bf16.mxu0 %v7506_v4  ;;  %v9326_v3 = vld [vmem:[%s11145_s0 + $0x48] sm:$0xff]  ;;  %v823_v4 = vrot.slane %v818_v58, %v822_v59  ;;  %v7601_v59 = vld [vmem:[%s11144_s1 + $0x1220] ss:$16 sps:$4 sm:$0xff]  }
  0xdd   :  { %5152 = vmatprep.subr.bf16.mxu1 %v7509_v5  ;;  %v7573_v5 = vld [vmem:[%s11144_s1 + $0x12c4] ss:$16 sps:$4 sm:$0xff]  }
  0xdf   :  { %5112 = vmatpush1.bf16.msra.mxu0 %v7504_v8  ;;  %v827_v8 = vrot.slane %v818_v58, %v826_v63  ;;  %v7598_v58 = vld [vmem:[%s11144_s1 + $0x1020] ss:$16 sps:$4 sm:$0xff]  }
  0xe0   :  { %5153 = vmatpush1.bf16.msra.mxu1 %v7507_v9  ;;  %5113 = vmatprep.subr.bf16.mxu0 %v7512_v10  ;;  %v9339_v9 = vcombine.high %v9321_v2, %v9321_v2  ;;  %v9343_v10 = vcombine.high %v9326_v3, %v9326_v3  ;;  %v7607_v63 = vld [vmem:[%s11144_s1 + $0x1200] ss:$16 sps:$4 sm:$0xff]  }
  0xe1   :  { %5154 = vmatprep.subr.bf16.mxu1 %v7515_v11 }
  0xe3   :  { %5114 = vmatpush2.bf16.msra.mxu0 %v7510_v12 }
  0xe4   :  { %5155 = vmatpush2.bf16.msra.mxu1 %v7513_v13  ;;  %5115 = vmatprep.subr.bf16.mxu0 %v7518_v14  ;;  %v7568_v13 = vld [vmem:[%s11144_s1 + $0x10c0] ss:$16 sps:$4 sm:$0xff]  }
  0xe5   :  { %5156 = vmatprep.subr.bf16.mxu1 %v7521_v15  ;;  %v7571_v15 = vld [vmem:[%s11144_s1 + $0x12c0] ss:$16 sps:$4 sm:$0xff]  }
  0xe7   :  { %5116 = vmatpush2.bf16.msra.mxu0 %v7516_v18 }
  0xe8   :  { %5157 = vmatpush2.bf16.msra.mxu1 %v7519_v19  ;;  %5117 = vmatprep.subr.bf16.mxu0 %v7524_v20  ;;  %v7576_v20 = vld [vmem:[%s11144_s1 + $0x10a4] ss:$16 sps:$4 sm:$0xff]  }
  0xe9   :  { %5158 = vmatprep.subr.bf16.mxu1 %v7527_v21  ;;  %v7579_v21 = vld [vmem:[%s11144_s1 + $0x12a4] ss:$16 sps:$4 sm:$0xff]  }
  0xeb   :  { %5118 = vmatpush2.bf16.msra.mxu0 %v7522_v26 }
  0xec   :  { %5159 = vmatpush2.bf16.msra.mxu1 %v7525_v27  ;;  %5119 = vmatprep.subr.bf16.mxu0 %v7530_v28 }
  0xed   :  { %5160 = vmatprep.subr.bf16.mxu1 %v7533_v29 }
  0xef   :  { %5120 = vmatpush2.bf16.msra.mxu0 %v7528_v30  ;;  %v7574_v30 = vld [vmem:[%s11144_s1 + $0x10a0] ss:$16 sps:$4 sm:$0xff]  }
  0xf0   :  { %5161 = vmatpush2.bf16.msra.mxu1 %v7531_v31  ;;  %5121 = vmatprep.subr.bf16.mxu0 %v7536_v32  ;;  %v7577_v32 = vld [vmem:[%s11144_s1 + $0x12a0] ss:$16 sps:$4 sm:$0xff]  }
  0xf1   :  { %5162 = vmatprep.subr.bf16.mxu1 %v7539_v33 }
  0xf3   :  { %5122 = vmatpush2.bf16.msra.mxu0 %v7534_v34 }
  0xf4   :  { %5163 = vmatpush2.bf16.msra.mxu1 %v7537_v41  ;;  %5123 = vmatprep.subr.bf16.mxu0 %v7542_v22  ;;  %v7582_v41 = vld [vmem:[%s11144_s1 + $0x1084] ss:$16 sps:$4 sm:$0xff]  }
  0xf5   :  { %5164 = vmatprep.subr.bf16.mxu1 %v7545_v23  ;;  %v7585_v22 = vld [vmem:[%s11144_s1 + $0x1284] ss:$16 sps:$4 sm:$0xff]   ;;  %v7580_v23 = vld [vmem:[%s11144_s1 + $0x1080] ss:$16 sps:$4 sm:$0xff]  }
  0xf7   :  { %5124 = vmatpush2.bf16.msra.mxu0 %v7540_v44  ;;  %v7583_v44 = vld [vmem:[%s11144_s1 + $0x1280] ss:$16 sps:$4 sm:$0xff]  }
  0xf8   :  { %5165 = vmatpush2.bf16.msra.mxu1 %v7543_v45  ;;  %5125 = vmatprep.subr.bf16.mxu0 %v7548_v46  ;;  %v7588_v45 = vld [vmem:[%s11144_s1 + $0x1064] ss:$16 sps:$4 sm:$0xff]  }
  0xf9   :  { %5166 = vmatprep.subr.bf16.mxu1 %v7551_v49  ;;  %v7591_v46 = vld [vmem:[%s11144_s1 + $0x1264] ss:$16 sps:$4 sm:$0xff]   ;;  %v7589_v49 = vld [vmem:[%s11144_s1 + $0x1260] ss:$16 sps:$4 sm:$0xff]  }
  0xfb   :  { %5126 = vmatpush2.bf16.msra.mxu0 %v7546_v50  ;;  %v7594_v50 = vld [vmem:[%s11144_s1 + $0x1044] ss:$16 sps:$4 sm:$0xff]  }
  0xfc   :  { %5167 = vmatpush2.bf16.msra.mxu1 %v7549_v52  ;;  %5127 = vmatprep.subr.bf16.mxu0 %v7554_v53  ;;  %v7597_v52 = vld [vmem:[%s11144_s1 + $0x1244] ss:$16 sps:$4 sm:$0xff]   ;;  %v7592_v53 = vld [vmem:[%s11144_s1 + $0x1040] ss:$16 sps:$4 sm:$0xff]  }
  0xfd   :  { %5168 = vmatprep.subr.bf16.mxu1 %v7557_v55  ;;  %v7595_v55 = vld [vmem:[%s11144_s1 + $0x1240] ss:$16 sps:$4 sm:$0xff]  }
  0xff   :  { %5128 = vmatpush2.bf16.msra.mxu0 %v7552_v56  ;;  %v7600_v56 = vld [vmem:[%s11144_s1 + $0x1024] ss:$16 sps:$4 sm:$0xff]  }
 0x100   :  { %5169 = vmatpush2.bf16.msra.mxu1 %v7555_v57  ;;  %5179 = vmatprep.subr.bf16.mxu0 %v7564_v60  ;;  %v7603_v57 = vld [vmem:[%s11144_s1 + $0x1224] ss:$16 sps:$4 sm:$0xff]  }
 0x101   :  { %5220 = vmatprep.subr.bf16.mxu1 %v7567_v61  ;;  %v7606_v60 = vld [vmem:[%s11144_s1 + $0x1004] ss:$16 sps:$4 sm:$0xff]  }
 0x102   :  { %v4885_v11 = vpop.f32.mrf.mxu0  ;;  %5130 = vmatmul.mubr.bf16.vlgmr.msra.gmra.mxu0 %v9312_v0  ;;  %v7609_v61 = vld [vmem:[%s11144_s1 + $0x1204] ss:$16 sps:$4 sm:$0xff]  }
 0x103   :  { %v4926_v12 = vpop.f32.mrf.mxu1  ;;  %5171 = vmatmul.mubr.bf16.vlgmr.msra.gmra.mxu1 %v9316_v1  ;;  %v4886_v14 = vadd.f32 %v4885_v11, %v823_v4  ;;  %5180 = vmatpush1.bf16.msra.mxu0 %v7562_v62  ;;  %v7604_v62 = vld [vmem:[%s11144_s1 + $0x1000] ss:$16 sps:$4 sm:$0xff]   ;;  %v7612_v4 = vld [vmem:[%s11144_s1 + $0x11e4] ss:$16 sps:$4 sm:$0xff]  }
 0x104   :  { %5221 = vmatpush1.bf16.msra.mxu1 %v7565_v35  ;;  %v4887_v18 = vpop.f32.mrf.mxu0  ;;  %5181 = vmatprep.subr.bf16.mxu0 %v7570_v40  ;;  %v7615_v35 = vld [vmem:[%s11144_s1 + $0x13e4] ss:$16 sps:$4 sm:$0xff]   ;;  %v7610_v40 = vld [vmem:[%s11144_s1 + $0x11e0] ss:$16 sps:$4 sm:$0xff]  }
 0x105   :  { %v4928_v19 = vpop.f32.mrf.mxu1  ;;  %5222 = vmatprep.subr.bf16.mxu1 %v7573_v5  ;;  %v9359_v26 = vadd.f32 %v4926_v12, %v4886_v14  ;;  %v4888_v27 = vadd.f32 %v4887_v18, %v827_v8  ;;  %5211 = vmatprep.mubr.bf16.mxu0 %v9339_v9  ;;  %v7613_v5 = vld [vmem:[%s11144_s1 + $0x13e0] ss:$16 sps:$4 sm:$0xff]   ;;  %v7618_v8 = vld [vmem:[%s11144_s1 + $0x11c4] ss:$16 sps:$4 sm:$0xff]  }
 0x106   :  { %5252 = vmatprep.mubr.bf16.mxu1 %v9343_v10  ;;  %v4889_v28 = vpop.f32.mrf.mxu0  ;;  %v7621_v11 = vld [vmem:[%s11144_s1 + $0x13c4] ss:$16 sps:$4 sm:$0xff]   ;;  %v7616_v12 = vld [vmem:[%s11144_s1 + $0x11c0] ss:$16 sps:$4 sm:$0xff]  }
 0x107   :  { %v4930_v29 = vpop.f32.mrf.mxu1  ;;  %v9366_v31 = vadd.f32 %v4928_v19, %v4888_v27  ;;  %5182 = vmatpush1.bf16.msra.mxu0 %v7568_v13  ;;  %v7619_v13 = vld [vmem:[%s11144_s1 + $0x13c0] ss:$16 sps:$4 sm:$0xff]   ;;  %v7624_v14 = vld [vmem:[%s11144_s1 + $0x11a4] ss:$16 sps:$4 sm:$0xff]  }
 0x108   :  { %5223 = vmatpush1.bf16.msra.mxu1 %v7571_v15  ;;  %v4890_v33 = vpop.f32.mrf.mxu0  ;;  %5183 = vmatprep.subr.bf16.mxu0 %v7576_v20  ;;  %v7627_v15 = vld [vmem:[%s11144_s1 + $0x13a4] ss:$16 sps:$4 sm:$0xff]   ;;  %v7622_v18 = vld [vmem:[%s11144_s1 + $0x11a0] ss:$16 sps:$4 sm:$0xff]  }
 0x109   :  { %v4931_v34 = vpop.f32.mrf.mxu1  ;;  %5224 = vmatprep.subr.bf16.mxu1 %v7579_v21  ;;  %v7625_v19 = vld [vmem:[%s11144_s1 + $0x13a0] ss:$16 sps:$4 sm:$0xff]   ;;  %v7630_v20 = vld [vmem:[%s11144_s1 + $0x1184] ss:$16 sps:$4 sm:$0xff]  }
 0x10a   :  { %v7633_v21 = vld [vmem:[%s11144_s1 + $0x1384] ss:$16 sps:$4 sm:$0xff]   ;;  %v7628_v27 = vld [vmem:[%s11144_s1 + $0x1180] ss:$16 sps:$4 sm:$0xff]  }
 0x10b   :  { %5184 = vmatpush1.bf16.msra.mxu0 %v7574_v30  ;;  %v7631_v28 = vld [vmem:[%s11144_s1 + $0x1380] ss:$16 sps:$4 sm:$0xff]   ;;  %v7636_v29 = vld [vmem:[%s11144_s1 + $0x1164] ss:$16 sps:$4 sm:$0xff]  }
 0x10c   :  { %5225 = vmatpush1.bf16.msra.mxu1 %v7577_v32  ;;  %5185 = vmatprep.subr.bf16.mxu0 %v7582_v41  ;;  %v7639_v30 = vld [vmem:[%s11144_s1 + $0x1364] ss:$16 sps:$4 sm:$0xff]   ;;  %v7634_v32 = vld [vmem:[%s11144_s1 + $0x1160] ss:$16 sps:$4 sm:$0xff]  }
 0x10d   :  { %5226 = vmatprep.subr.bf16.mxu1 %v7585_v22  ;;  %v7637_v33 = vld [vmem:[%s11144_s1 + $0x1360] ss:$16 sps:$4 sm:$0xff]   ;;  %v7642_v34 = vld [vmem:[%s11144_s1 + $0x1144] ss:$16 sps:$4 sm:$0xff]  }
 0x10e   :  { %v7645_v41 = vld [vmem:[%s11144_s1 + $0x1344] ss:$16 sps:$4 sm:$0xff]   ;;  %v7640_v22 = vld [vmem:[%s11144_s1 + $0x1140] ss:$16 sps:$4 sm:$0xff]  }
 0x10f   :  { %5186 = vmatpush1.bf16.msra.mxu0 %v7580_v23  ;;  %v7643_v23 = vld [vmem:[%s11144_s1 + $0x1340] ss:$16 sps:$4 sm:$0xff]  }
 0x110   :  { %5227 = vmatpush1.bf16.msra.mxu1 %v7583_v44  ;;  %5187 = vmatprep.subr.bf16.mxu0 %v7588_v45  ;;  %v7648_v44 = vld [vmem:[%s11144_s1 + $0x1124] ss:$16 sps:$4 sm:$0xff]  }
 0x111   :  { %5228 = vmatprep.subr.bf16.mxu1 %v7591_v46  ;;  %v7651_v45 = vld [vmem:[%s11144_s1 + $0x1324] ss:$16 sps:$4 sm:$0xff]   ;;  %v7646_v46 = vld [vmem:[%s11144_s1 + $0x1120] ss:$16 sps:$4 sm:$0xff]  }
 0x113   :  { %5188 = vmatpush1.bf16.msra.mxu0 %v7586_v48  ;;  %v7649_v48 = vld [vmem:[%s11144_s1 + $0x1320] ss:$16 sps:$4 sm:$0xff]  }
 0x114   :  { %5229 = vmatpush1.bf16.msra.mxu1 %v7589_v49  ;;  %5189 = vmatprep.subr.bf16.mxu0 %v7594_v50  ;;  %v7654_v49 = vld [vmem:[%s11144_s1 + $0x1104] ss:$16 sps:$4 sm:$0xff]  }
 0x115   :  { %5230 = vmatprep.subr.bf16.mxu1 %v7597_v52  ;;  %v7657_v50 = vld [vmem:[%s11144_s1 + $0x1304] ss:$16 sps:$4 sm:$0xff]   ;;  %v7652_v52 = vld [vmem:[%s11144_s1 + $0x1100] ss:$16 sps:$4 sm:$0xff]  }
 0x117   :  { %5190 = vmatpush1.bf16.msra.mxu0 %v7592_v53  ;;  %v7655_v53 = vld [vmem:[%s11144_s1 + $0x1300] ss:$16 sps:$4 sm:$0xff]  }
 0x118   :  { %5231 = vmatpush1.bf16.msra.mxu1 %v7595_v55  ;;  %5191 = vmatprep.subr.bf16.mxu0 %v7600_v56  ;;  %v7664_v55 = vld [vmem:[%s11144_s1 + $0x14e4] ss:$16 sps:$4 sm:$0xff]  }
 0x119   :  { %5232 = vmatprep.subr.bf16.mxu1 %v7603_v57  ;;  %v7667_v56 = vld [vmem:[%s11144_s1 + $0x16e4] ss:$16 sps:$4 sm:$0xff]  }
 0x11a   :  { %v9536_v57 = vld [vmem:[%s11145_s0 + $0x50] sm:$0xff] }
 0x11b   :  { %5192 = vmatpush1.bf16.msra.mxu0 %v7598_v58  ;;  %v9541_v58 = vld [vmem:[%s11145_s0 + $0x58] sm:$0xff] }
 0x11c   :  { %5233 = vmatpush1.bf16.msra.mxu1 %v7601_v59  ;;  %5193 = vmatprep.subr.bf16.mxu0 %v7606_v60  ;;  %v7662_v59 = vld [vmem:[%s11144_s1 + $0x14e0] ss:$16 sps:$4 sm:$0xff]  }
 0x11d   :  { %5234 = vmatprep.subr.bf16.mxu1 %v7609_v61  ;;  %v7665_v60 = vld [vmem:[%s11144_s1 + $0x16e0] ss:$16 sps:$4 sm:$0xff]   ;;  %v9551_v61 = vcombine.low %v9321_v2, %v9321_v2 }
 0x11e   :  { %v7668_v2 = vld [vmem:[%s11144_s1 + $0x14c0] ss:$16 sps:$4 sm:$0xff]  }
 0x11f   :  { %5194 = vmatpush1.bf16.msra.mxu0 %v7604_v62  ;;  %v9555_v62 = vcombine.low %v9326_v3, %v9326_v3  ;;  %v7671_v3 = vld [vmem:[%s11144_s1 + $0x16c0] ss:$16 sps:$4 sm:$0xff]  }
 0x120   :  { %5235 = vmatpush1.bf16.msra.mxu1 %v7607_v63  ;;  %5195 = vmatprep.subr.bf16.mxu0 %v7612_v4  ;;  %v7670_v63 = vld [vmem:[%s11144_s1 + $0x14c4] ss:$16 sps:$4 sm:$0xff]  }
 0x121   :  { %5236 = vmatprep.subr.bf16.mxu1 %v7615_v35  ;;  %v7673_v4 = vld [vmem:[%s11144_s1 + $0x16c4] ss:$16 sps:$4 sm:$0xff]   ;;  %v9571_v35 = vcombine.high %v9536_v57, %v9536_v57 }
 0x123   :  { %5196 = vmatpush2.bf16.msra.mxu0 %v7610_v40  ;;  %v9575_v40 = vcombine.high %v9541_v58, %v9541_v58 }
 0x124   :  { %5237 = vmatpush2.bf16.msra.mxu1 %v7613_v5  ;;  %5197 = vmatprep.subr.bf16.mxu0 %v7618_v8 }
 0x125   :  { %5238 = vmatprep.subr.bf16.mxu1 %v7621_v11 }
 0x127   :  { %5198 = vmatpush2.bf16.msra.mxu0 %v7616_v12 }
 0x128   :  { %5239 = vmatpush2.bf16.msra.mxu1 %v7619_v13  ;;  %5199 = vmatprep.subr.bf16.mxu0 %v7624_v14  ;;  %v7676_v14 = vld [vmem:[%s11144_s1 + $0x14a4] ss:$16 sps:$4 sm:$0xff]  }
 0x129   :  { %5240 = vmatprep.subr.bf16.mxu1 %v7627_v15  ;;  %v7679_v15 = vld [vmem:[%s11144_s1 + $0x16a4] ss:$16 sps:$4 sm:$0xff]  }
 0x12b   :  { %5200 = vmatpush2.bf16.msra.mxu0 %v7622_v18 }
 0x12c   :  { %5241 = vmatpush2.bf16.msra.mxu1 %v7625_v19  ;;  %5201 = vmatprep.subr.bf16.mxu0 %v7630_v20  ;;  %v7677_v20 = vld [vmem:[%s11144_s1 + $0x16a0] ss:$16 sps:$4 sm:$0xff]  }
 0x12d   :  { %5242 = vmatprep.subr.bf16.mxu1 %v7633_v21 }
 0x12f   :  { %5202 = vmatpush2.bf16.msra.mxu0 %v7628_v27 }
 0x130   :  { %5243 = vmatpush2.bf16.msra.mxu1 %v7631_v28  ;;  %5203 = vmatprep.subr.bf16.mxu0 %v7636_v29 }
 0x131   :  { %5244 = vmatprep.subr.bf16.mxu1 %v7639_v30  ;;  %v7682_v30 = vld [vmem:[%s11144_s1 + $0x1484] ss:$16 sps:$4 sm:$0xff]  }
 0x133   :  { %5204 = vmatpush2.bf16.msra.mxu0 %v7634_v32  ;;  %v7685_v32 = vld [vmem:[%s11144_s1 + $0x1684] ss:$16 sps:$4 sm:$0xff]  }
 0x134   :  { %5245 = vmatpush2.bf16.msra.mxu1 %v7637_v33  ;;  %5205 = vmatprep.subr.bf16.mxu0 %v7642_v34  ;;  %v7680_v33 = vld [vmem:[%s11144_s1 + $0x1480] ss:$16 sps:$4 sm:$0xff]  }
 0x135   :  { %5246 = vmatprep.subr.bf16.mxu1 %v7645_v41  ;;  %v7683_v34 = vld [vmem:[%s11144_s1 + $0x1680] ss:$16 sps:$4 sm:$0xff]   ;;  %v7688_v41 = vld [vmem:[%s11144_s1 + $0x1464] ss:$16 sps:$4 sm:$0xff]  }
 0x137   :  { %5206 = vmatpush2.bf16.msra.mxu0 %v7640_v22  ;;  %v7691_v22 = vld [vmem:[%s11144_s1 + $0x1664] ss:$16 sps:$4 sm:$0xff]  }
 0x138   :  { %5247 = vmatpush2.bf16.msra.mxu1 %v7643_v23  ;;  %5207 = vmatprep.subr.bf16.mxu0 %v7648_v44  ;;  %v7686_v23 = vld [vmem:[%s11144_s1 + $0x1460] ss:$16 sps:$4 sm:$0xff]  }
 0x139   :  { %5248 = vmatprep.subr.bf16.mxu1 %v7651_v45  ;;  %v7689_v44 = vld [vmem:[%s11144_s1 + $0x1660] ss:$16 sps:$4 sm:$0xff]   ;;  %v7694_v45 = vld [vmem:[%s11144_s1 + $0x1444] ss:$16 sps:$4 sm:$0xff]  }
 0x13b   :  { %5208 = vmatpush2.bf16.msra.mxu0 %v7646_v46  ;;  %v7697_v46 = vld [vmem:[%s11144_s1 + $0x1644] ss:$16 sps:$4 sm:$0xff]  }
 0x13c   :  { %5249 = vmatpush2.bf16.msra.mxu1 %v7649_v48  ;;  %5209 = vmatprep.subr.bf16.mxu0 %v7654_v49  ;;  %v7692_v48 = vld [vmem:[%s11144_s1 + $0x1440] ss:$16 sps:$4 sm:$0xff]  }
 0x13d   :  { %5250 = vmatprep.subr.bf16.mxu1 %v7657_v50  ;;  %v7695_v49 = vld [vmem:[%s11144_s1 + $0x1640] ss:$16 sps:$4 sm:$0xff]   ;;  %v7700_v50 = vld [vmem:[%s11144_s1 + $0x1424] ss:$16 sps:$4 sm:$0xff]  }
 0x13f   :  { %5210 = vmatpush2.bf16.msra.mxu0 %v7652_v52  ;;  %v7703_v52 = vld [vmem:[%s11144_s1 + $0x1624] ss:$16 sps:$4 sm:$0xff]  }
 0x140   :  { %5251 = vmatpush2.bf16.msra.mxu1 %v7655_v53  ;;  %5261 = vmatprep.subr.bf16.mxu0 %v7664_v55  ;;  %v7698_v53 = vld [vmem:[%s11144_s1 + $0x1420] ss:$16 sps:$4 sm:$0xff]  }
 0x141   :  { %5302 = vmatprep.subr.bf16.mxu1 %v7667_v56  ;;  %v7701_v55 = vld [vmem:[%s11144_s1 + $0x1620] ss:$16 sps:$4 sm:$0xff]   ;;  %v7706_v56 = vld [vmem:[%s11144_s1 + $0x1404] ss:$16 sps:$4 sm:$0xff]  }
 0x142   :  { %v4967_v5 = vpop.f32.mrf.mxu0  ;;  %5212 = vmatmul.mubr.bf16.vlgmr.msra.gmra.mxu0 %v9551_v61 }
 0x143   :  { %v5008_v8 = vpop.f32.mrf.mxu1  ;;  %5253 = vmatmul.mubr.bf16.vlgmr.msra.gmra.mxu1 %v9555_v62  ;;  %v4968_v11 = vadd.f32 %v4967_v5, %v9359_v26  ;;  %5262 = vmatpush1.bf16.msra.mxu0 %v7662_v59  ;;  %v7674_v26 = vld [vmem:[%s11144_s1 + $0x14a0] ss:$16 sps:$4 sm:$0xff]   ;;  %v7709_v59 = vld [vmem:[%s11144_s1 + $0x1604] ss:$16 sps:$4 sm:$0xff]  }
 0x144   :  { %5303 = vmatpush1.bf16.msra.mxu1 %v7665_v60  ;;  %v4969_v12 = vpop.f32.mrf.mxu0  ;;  %5263 = vmatprep.subr.bf16.mxu0 %v7670_v63  ;;  %v7704_v60 = vld [vmem:[%s11144_s1 + $0x1400] ss:$16 sps:$4 sm:$0xff]  }
 0x145   :  { %v5010_v13 = vpop.f32.mrf.mxu1  ;;  %5304 = vmatprep.subr.bf16.mxu1 %v7673_v4  ;;  %v9586_v18 = vadd.f32 %v5008_v8, %v4968_v11  ;;  %v4970_v19 = vadd.f32 %v4969_v12, %v9366_v31  ;;  %5293 = vmatprep.mubr.bf16.mxu0 %v9571_v35  ;;  %v7707_v63 = vld [vmem:[%s11144_s1 + $0x1600] ss:$16 sps:$4 sm:$0xff]   ;;  %v7712_v4 = vld [vmem:[%s11144_s1 + $0x15e4] ss:$16 sps:$4 sm:$0xff]  }
 0x146   :  { %5334 = vmatprep.mubr.bf16.mxu1 %v9575_v40  ;;  %v4971_v21 = vpop.f32.mrf.mxu0  ;;  %v7713_v5 = vld [vmem:[%s11144_s1 + $0x17e0] ss:$16 sps:$4 sm:$0xff]   ;;  %v7718_v8 = vld [vmem:[%s11144_s1 + $0x15c4] ss:$16 sps:$4 sm:$0xff]  }
 0x147   :  { %v5012_v27 = vpop.f32.mrf.mxu1  ;;  %v9597_v28 = vadd.f32 %v5010_v13, %v4970_v19  ;;  %5264 = vmatpush1.bf16.msra.mxu0 %v7668_v2  ;;  %v7715_v2 = vld [vmem:[%s11144_s1 + $0x17e4] ss:$16 sps:$4 sm:$0xff]   ;;  %v7716_v12 = vld [vmem:[%s11144_s1 + $0x15c0] ss:$16 sps:$4 sm:$0xff]  }
 0x148   :  { %5305 = vmatpush1.bf16.msra.mxu1 %v7671_v3  ;;  %v4972_v29 = vpop.f32.mrf.mxu0  ;;  %5265 = vmatprep.subr.bf16.mxu0 %v7676_v14  ;;  %v7710_v3 = vld [vmem:[%s11144_s1 + $0x15e0] ss:$16 sps:$4 sm:$0xff]   ;;  %v7721_v11 = vld [vmem:[%s11144_s1 + $0x17c4] ss:$16 sps:$4 sm:$0xff]  }
 0x149   :  { %v5013_v31 = vpop.f32.mrf.mxu1  ;;  %5306 = vmatprep.subr.bf16.mxu1 %v7679_v15  ;;  %v7719_v13 = vld [vmem:[%s11144_s1 + $0x17c0] ss:$16 sps:$4 sm:$0xff]   ;;  %v7724_v14 = vld [vmem:[%s11144_s1 + $0x15a4] ss:$16 sps:$4 sm:$0xff]  }
 0x14a   :  { %v7727_v15 = vld [vmem:[%s11144_s1 + $0x17a4] ss:$16 sps:$4 sm:$0xff]   ;;  %v7722_v19 = vld [vmem:[%s11144_s1 + $0x15a0] ss:$16 sps:$4 sm:$0xff]  }
 0x14b   :  { %5266 = vmatpush1.bf16.msra.mxu0 %v7674_v26  ;;  %v7725_v26 = vld [vmem:[%s11144_s1 + $0x17a0] ss:$16 sps:$4 sm:$0xff]   ;;  %v7733_v21 = vld [vmem:[%s11144_s1 + $0x1784] ss:$16 sps:$4 sm:$0xff]  }
 0x14c   :  { %5307 = vmatpush1.bf16.msra.mxu1 %v7677_v20  ;;  %5267 = vmatprep.subr.bf16.mxu0 %v7682_v30  ;;  %v7730_v20 = vld [vmem:[%s11144_s1 + $0x1584] ss:$16 sps:$4 sm:$0xff]   ;;  %v7728_v27 = vld [vmem:[%s11144_s1 + $0x1580] ss:$16 sps:$4 sm:$0xff]  }
 0x14d   :  { %5308 = vmatprep.subr.bf16.mxu1 %v7685_v32  ;;  %v7731_v29 = vld [vmem:[%s11144_s1 + $0x1780] ss:$16 sps:$4 sm:$0xff]   ;;  %v7736_v31 = vld [vmem:[%s11144_s1 + $0x1564] ss:$16 sps:$4 sm:$0xff]  }
 0x14e   :  { %v7739_v30 = vld [vmem:[%s11144_s1 + $0x1764] ss:$16 sps:$4 sm:$0xff]   ;;  %v7734_v32 = vld [vmem:[%s11144_s1 + $0x1560] ss:$16 sps:$4 sm:$0xff]  }
 0x14f   :  { %5268 = vmatpush1.bf16.msra.mxu0 %v7680_v33  ;;  %v7737_v33 = vld [vmem:[%s11144_s1 + $0x1760] ss:$16 sps:$4 sm:$0xff]  }
 0x150   :  { %5309 = vmatpush1.bf16.msra.mxu1 %v7683_v34  ;;  %5269 = vmatprep.subr.bf16.mxu0 %v7688_v41  ;;  %v7742_v34 = vld [vmem:[%s11144_s1 + $0x1544] ss:$16 sps:$4 sm:$0xff]  }
 0x151   :  { %5310 = vmatprep.subr.bf16.mxu1 %v7691_v22  ;;  %v7745_v41 = vld [vmem:[%s11144_s1 + $0x1744] ss:$16 sps:$4 sm:$0xff]   ;;  %v7740_v22 = vld [vmem:[%s11144_s1 + $0x1540] ss:$16 sps:$4 sm:$0xff]  }
 0x153   :  { %5270 = vmatpush1.bf16.msra.mxu0 %v7686_v23  ;;  %v7743_v23 = vld [vmem:[%s11144_s1 + $0x1740] ss:$16 sps:$4 sm:$0xff]  }
 0x154   :  { %5311 = vmatpush1.bf16.msra.mxu1 %v7689_v44  ;;  %5271 = vmatprep.subr.bf16.mxu0 %v7694_v45  ;;  %v7748_v44 = vld [vmem:[%s11144_s1 + $0x1524] ss:$16 sps:$4 sm:$0xff]  }
 0x155   :  { %5312 = vmatprep.subr.bf16.mxu1 %v7697_v46  ;;  %v7751_v45 = vld [vmem:[%s11144_s1 + $0x1724] ss:$16 sps:$4 sm:$0xff]   ;;  %v7746_v46 = vld [vmem:[%s11144_s1 + $0x1520] ss:$16 sps:$4 sm:$0xff]  }
 0x157   :  { %5272 = vmatpush1.bf16.msra.mxu0 %v7692_v48  ;;  %v7749_v48 = vld [vmem:[%s11144_s1 + $0x1720] ss:$16 sps:$4 sm:$0xff]  }
 0x158   :  { %5313 = vmatpush1.bf16.msra.mxu1 %v7695_v49  ;;  %5273 = vmatprep.subr.bf16.mxu0 %v7700_v50  ;;  %v7754_v49 = vld [vmem:[%s11144_s1 + $0x1504] ss:$16 sps:$4 sm:$0xff]  }
 0x159   :  { %5314 = vmatprep.subr.bf16.mxu1 %v7703_v52  ;;  %v7757_v50 = vld [vmem:[%s11144_s1 + $0x1704] ss:$16 sps:$4 sm:$0xff]   ;;  %v7752_v52 = vld [vmem:[%s11144_s1 + $0x1500] ss:$16 sps:$4 sm:$0xff]  }
 0x15b   :  { %5274 = vmatpush1.bf16.msra.mxu0 %v7698_v53  ;;  %v7755_v53 = vld [vmem:[%s11144_s1 + $0x1700] ss:$16 sps:$4 sm:$0xff]  }
 0x15c   :  { %5315 = vmatpush1.bf16.msra.mxu1 %v7701_v55  ;;  %5275 = vmatprep.subr.bf16.mxu0 %v7706_v56  ;;  %v7764_v55 = vld [vmem:[%s11144_s1 + $0x1864] ss:$16 sps:$4 sm:$0xff]   ;;  %v7767_v56 = vld [vmem:[%s11144_s1 + $0xec] ss:$16 sps:$4 sm:$0xff]  }
 0x15d   :  { %5316 = vmatprep.subr.bf16.mxu1 %v7709_v59  ;;  %v7762_v59 = vld [vmem:[%s11144_s1 + $0x1860] ss:$16 sps:$4 sm:$0xff]  }
 0x15f   :  { %5276 = vmatpush1.bf16.msra.mxu0 %v7704_v60  ;;  %v7765_v60 = vld [vmem:[%s11144_s1 + $0xe8] ss:$16 sps:$4 sm:$0xff]  }
 0x160   :  { %5317 = vmatpush1.bf16.msra.mxu1 %v7707_v63  ;;  %5277 = vmatprep.subr.bf16.mxu0 %v7712_v4  ;;  %v9769_v63 = vcombine.low %v9536_v57, %v9536_v57  ;;  %v9773_v4 = vcombine.low %v9541_v58, %v9541_v58  ;;  %v7768_v57 = vld [vmem:[%s11144_s1 + $0x1840] ss:$16 sps:$4 sm:$0xff]   ;;  %v7771_v58 = vld [vmem:[%s11144_s1 + $0xc8] ss:$16 sps:$4 sm:$0xff]  }
 0x161   :  { %5318 = vmatprep.subr.bf16.mxu1 %v7715_v2  ;;  %v7770_v2 = vld [vmem:[%s11144_s1 + $0x1844] ss:$16 sps:$4 sm:$0xff]  }
 0x163   :  { %5278 = vmatpush2.bf16.msra.mxu0 %v7710_v3  ;;  %v7773_v3 = vld [vmem:[%s11144_s1 + $0xcc] ss:$16 sps:$4 sm:$0xff]  }
 0x164   :  { %5319 = vmatpush2.bf16.msra.mxu1 %v7713_v5  ;;  %5279 = vmatprep.subr.bf16.mxu0 %v7718_v8 }
 0x165   :  { %5320 = vmatprep.subr.bf16.mxu1 %v7721_v11 }
 0x167   :  { %5280 = vmatpush2.bf16.msra.mxu0 %v7716_v12 }
 0x168   :  { %5321 = vmatpush2.bf16.msra.mxu1 %v7719_v13  ;;  %5281 = vmatprep.subr.bf16.mxu0 %v7724_v14  ;;  %v7776_v14 = vld [vmem:[%s11144_s1 + $0x1824] ss:$16 sps:$4 sm:$0xff]  }
 0x169   :  { %5322 = vmatprep.subr.bf16.mxu1 %v7727_v15  ;;  %v7779_v15 = vld [vmem:[%s11144_s1 + $0xac] ss:$16 sps:$4 sm:$0xff]  }
 0x16b   :  { %5282 = vmatpush2.bf16.msra.mxu0 %v7722_v19 }
 0x16c   :  { %5323 = vmatpush2.bf16.msra.mxu1 %v7725_v26  ;;  %5283 = vmatprep.subr.bf16.mxu0 %v7730_v20  ;;  %v7777_v20 = vld [vmem:[%s11144_s1 + $0xa8] ss:$16 sps:$4 sm:$0xff]  }
 0x16d   :  { %5324 = vmatprep.subr.bf16.mxu1 %v7733_v21  ;;  %v8397_v21 = vmov 0  }
 0x16f   :  { %5284 = vmatpush2.bf16.msra.mxu0 %v7728_v27 }
 0x170   :  { %5325 = vmatpush2.bf16.msra.mxu1 %v7731_v29  ;;  %5285 = vmatprep.subr.bf16.mxu0 %v7736_v31 }
 0x171   :  { %5326 = vmatprep.subr.bf16.mxu1 %v7739_v30 }
 0x173   :  { %5286 = vmatpush2.bf16.msra.mxu0 %v7734_v32  ;;  %v7782_v32 = vld [vmem:[%s11144_s1 + $0x1804] ss:$16 sps:$4 sm:$0xff]  }
 0x174   :  { %5327 = vmatpush2.bf16.msra.mxu1 %v7737_v33  ;;  %5287 = vmatprep.subr.bf16.mxu0 %v7742_v34  ;;  %v7785_v33 = vld [vmem:[%s11144_s1 + $0x8c] ss:$16 sps:$4 sm:$0xff]   ;;  %v7783_v34 = vld [vmem:[%s11144_s1 + $0x88] ss:$16 sps:$4 sm:$0xff]  }
 0x175   :  { %5328 = vmatprep.subr.bf16.mxu1 %v7745_v41  ;;  %v7786_v41 = vld [vmem:[%s11145_s0 + $0x60] ss:$0 sps:$4 sm:$0xff]  }
 0x177   :  { %5288 = vmatpush2.bf16.msra.mxu0 %v7740_v22  ;;  %v7789_v22 = vld [vmem:[%s11144_s1 + $0x6c] ss:$16 sps:$4 sm:$0xff]  }
 0x178   :  { %5329 = vmatpush2.bf16.msra.mxu1 %v7743_v23  ;;  %5289 = vmatprep.subr.bf16.mxu0 %v7748_v44  ;;  %v7792_v23 = vld [vmem:[%s11144_s1 + $0x2ec] ss:$16 sps:$4 sm:$0xff]   ;;  %v7787_v44 = vld [vmem:[%s11144_s1 + $0x68] ss:$16 sps:$4 sm:$0xff]  }
 0x179   :  { %5330 = vmatprep.subr.bf16.mxu1 %v7751_v45  ;;  %v7790_v45 = vld [vmem:[%s11144_s1 + $0x2e8] ss:$16 sps:$4 sm:$0xff]  }
 0x17b   :  { %5290 = vmatpush2.bf16.msra.mxu0 %v7746_v46  ;;  %v7795_v46 = vld [vmem:[%s11144_s1 + $0x4c] ss:$16 sps:$4 sm:$0xff]  }
 0x17c   :  { %5331 = vmatpush2.bf16.msra.mxu1 %v7749_v48  ;;  %5291 = vmatprep.subr.bf16.mxu0 %v7754_v49  ;;  %v7798_v48 = vld [vmem:[%s11144_s1 + $0x2cc] ss:$16 sps:$4 sm:$0xff]   ;;  %v7793_v49 = vld [vmem:[%s11144_s1 + $0x48] ss:$16 sps:$4 sm:$0xff]  }
 0x17d   :  { %5332 = vmatprep.subr.bf16.mxu1 %v7757_v50  ;;  %v7796_v50 = vld [vmem:[%s11144_s1 + $0x2c8] ss:$16 sps:$4 sm:$0xff]  }
 0x17f   :  { %5292 = vmatpush2.bf16.msra.mxu0 %v7752_v52  ;;  %v7801_v52 = vld [vmem:[%s11144_s1 + $0x2c] ss:$16 sps:$4 sm:$0xff]  }
 0x180   :  { %5333 = vmatpush2.bf16.msra.mxu1 %v7755_v53  ;;  %5351 = vmatprep.subr.bf16.mxu0 %v7764_v55  ;;  %v7804_v53 = vld [vmem:[%s11144_s1 + $0x2ac] ss:$16 sps:$4 sm:$0xff]   ;;  %v7799_v55 = vld [vmem:[%s11144_s1 + $0x28] ss:$16 sps:$4 sm:$0xff]  }
 0x181   :  { %5384 = vmatprep.subr.bf16.mxu1 %v7767_v56  ;;  %v7802_v56 = vld [vmem:[%s11144_s1 + $0x2a8] ss:$16 sps:$4 sm:$0xff]  }
 0x182   :  { %v5049_v5 = vpop.f32.mrf.mxu0  ;;  %5294 = vmatmul.mubr.bf16.vlgmr.msra.gmra.mxu0 %v9769_v63 }
 0x183   :  { %v5090_v8 = vpop.f32.mrf.mxu1  ;;  %5335 = vmatmul.mubr.bf16.vlgmr.msra.gmra.mxu1 %v9773_v4  ;;  %v5050_v11 = vadd.f32 %v5049_v5, %v9586_v18  ;;  %5352 = vmatpush1.bf16.msra.mxu0 %v7762_v59  ;;  %v7774_v18 = vld [vmem:[%s11144_s1 + $0x1820] ss:$16 sps:$4 sm:$0xff]   ;;  %v7807_v59 = vld [vmem:[%s11144_s1 + $0xc] ss:$16 sps:$4 sm:$0xff]   ;;  %v7814_v5 = vld [vmem:[%s11144_s1 + $0x268] ss:$16 sps:$4 sm:$0xff]  }
 0x184   :  { %5385 = vmatpush1.bf16.msra.mxu1 %v7765_v60  ;;  %v5051_v12 = vpop.f32.mrf.mxu0  ;;  %5353 = vmatprep.subr.bf16.mxu0 %v7770_v2  ;;  %v7805_v60 = vld [vmem:[%s11144_s1 + $0x8] ss:$16 sps:$4 sm:$0xff]  }
 0x185   :  { %v5092_v13 = vpop.f32.mrf.mxu1  ;;  %5386 = vmatprep.subr.bf16.mxu1 %v7773_v3  ;;  %v9796_v19 = vadd.f32 %v5090_v8, %v5050_v11  ;;  %v5052_v26 = vadd.f32 %v5051_v12, %v9597_v28  ;;  %5375 = vmatprep.mubr.bf16.mxu0 %v8397_v21  ;;  %v7808_v2 = vld [vmem:[%s11144_s1 + $0x288] ss:$16 sps:$4 sm:$0xff]   ;;  %v7813_v3 = vld [vmem:[%s11144_s1 + $0x1ec] ss:$16 sps:$4 sm:$0xff]  }
 0x186   :  { %5416 = vmatprep.mubr.bf16.mxu1 %v8569_v47  ;;  %v5053_v27 = vpop.f32.mrf.mxu0  ;;  %v7780_v47 = vld [vmem:[%s11144_s1 + $0x1800] ss:$16 sps:$4 sm:$0xff]   ;;  %v7819_v8 = vld [vmem:[%s11144_s1 + $0x1cc] ss:$16 sps:$4 sm:$0xff]   ;;  %v7817_v12 = vld [vmem:[%s11144_s1 + $0x1c8] ss:$16 sps:$4 sm:$0xff]  }
 0x187   :  { %v5094_v29 = vpop.f32.mrf.mxu1  ;;  %v9807_v31 = vadd.f32 %v5092_v13, %v5052_v26  ;;  %5354 = vmatpush1.bf16.msra.mxu0 %v7768_v57  ;;  %v7816_v57 = vld [vmem:[%s11144_s1 + $0x26c] ss:$16 sps:$4 sm:$0xff]   ;;  %v7820_v13 = vld [vmem:[%s11144_s1 + $0x248] ss:$16 sps:$4 sm:$0xff]  }
 0x188   :  { %5387 = vmatpush1.bf16.msra.mxu1 %v7771_v58  ;;  %v5054_v28 = vpop.f32.mrf.mxu0  ;;  %5355 = vmatprep.subr.bf16.mxu0 %v7776_v14  ;;  %v7811_v58 = vld [vmem:[%s11144_s1 + $0x1e8] ss:$16 sps:$4 sm:$0xff]   ;;  %v7822_v11 = vld [vmem:[%s11144_s1 + $0x24c] ss:$16 sps:$4 sm:$0xff]  }
 0x189   :  { %v5095_v30 = vpop.f32.mrf.mxu1  ;;  %5388 = vmatprep.subr.bf16.mxu1 %v7779_v15  ;;  %v7825_v14 = vld [vmem:[%s11144_s1 + $0x1ac] ss:$16 sps:$4 sm:$0xff]   ;;  %v7823_v26 = vld [vmem:[%s11144_s1 + $0x1a8] ss:$16 sps:$4 sm:$0xff]  }
 0x18a   :  { %v7828_v15 = vld [vmem:[%s11144_s1 + $0x22c] ss:$16 sps:$4 sm:$0xff]   ;;  %v7829_v29 = vld [vmem:[%s11144_s1 + $0x188] ss:$16 sps:$4 sm:$0xff]  }
 0x18b   :  { %5356 = vmatpush1.bf16.msra.mxu0 %v7774_v18  ;;  %v7826_v18 = vld [vmem:[%s11144_s1 + $0x228] ss:$16 sps:$4 sm:$0xff]   ;;  %v7834_v27 = vld [vmem:[%s11144_s1 + $0x20c] ss:$16 sps:$4 sm:$0xff]  }
 0x18c   :  { %5389 = vmatpush1.bf16.msra.mxu1 %v7777_v20  ;;  %5357 = vmatprep.subr.bf16.mxu0 %v7782_v32  ;;  %v7831_v20 = vld [vmem:[%s11144_s1 + $0x18c] ss:$16 sps:$4 sm:$0xff]   ;;  %v7832_v28 = vld [vmem:[%s11144_s1 + $0x208] ss:$16 sps:$4 sm:$0xff]  }
 0x18d   :  { %5390 = vmatprep.subr.bf16.mxu1 %v7785_v33  ;;  %v7837_v30 = vld [vmem:[%s11144_s1 + $0x16c] ss:$16 sps:$4 sm:$0xff]   ;;  %v7835_v33 = vld [vmem:[%s11144_s1 + $0x168] ss:$16 sps:$4 sm:$0xff]  }
 0x18e   :  { %v7840_v32 = vld [vmem:[%s11144_s1 + $0x3ec] ss:$16 sps:$4 sm:$0xff]  }
 0x18f   :  { %5358 = vmatpush1.bf16.msra.mxu0 %v7780_v47  ;;  %v7838_v47 = vld [vmem:[%s11144_s1 + $0x3e8] ss:$16 sps:$4 sm:$0xff]  }
 0x190   :  { %5391 = vmatpush1.bf16.msra.mxu1 %v7783_v34  ;;  %5425 = vmatprep.subr.bf16.mxu0 %v7792_v23  ;;  %v7843_v34 = vld [vmem:[%s11144_s1 + $0x14c] ss:$16 sps:$4 sm:$0xff]   ;;  %v7844_v23 = vld [vmem:[%s11144_s1 + $0x3c8] ss:$16 sps:$4 sm:$0xff]  }
 0x191   :  { %5392 = vmatprep.subr.bf16.mxu1 %v7789_v22  ;;  %v7841_v22 = vld [vmem:[%s11144_s1 + $0x148] ss:$16 sps:$4 sm:$0xff]  }
 0x192   :  { %7082 = vmatmul.mubr.msk.bf16.vlgmr.msra.gmra.mxu0 %vm4847_vm0, %v7786_v41  ;;  %v7846_v41 = vld [vmem:[%s11144_s1 + $0x3cc] ss:$16 sps:$4 sm:$0xff]  }
 0x193   :  { %5426 = vmatpush1.bf16.msra.mxu0 %v7790_v45  ;;  %5457 = vmatprep.mubr.bf16.mxu0 %v8580_v51  ;;  %v7810_v51 = vld [vmem:[%s11144_s1 + $0x28c] ss:$16 sps:$4 sm:$0xff]  }
 0x194   :  { %5393 = vmatpush1.bf16.msra.mxu1 %v7787_v44  ;;  %5427 = vmatprep.subr.bf16.mxu0 %v7798_v48  ;;  %v7849_v44 = vld [vmem:[%s11144_s1 + $0x12c] ss:$16 sps:$4 sm:$0xff]   ;;  %v7850_v48 = vld [vmem:[%s11144_s1 + $0x3a8] ss:$16 sps:$4 sm:$0xff]  }
 0x195   :  { %5394 = vmatprep.subr.bf16.mxu1 %v7795_v46  ;;  %v7852_v45 = vld [vmem:[%s11144_s1 + $0x3ac] ss:$16 sps:$4 sm:$0xff]   ;;  %v7847_v46 = vld [vmem:[%s11144_s1 + $0x128] ss:$16 sps:$4 sm:$0xff]  }
 0x197   :  { %5428 = vmatpush1.bf16.msra.mxu0 %v7796_v50  ;;  %v7858_v50 = vld [vmem:[%s11144_s1 + $0x38c] ss:$16 sps:$4 sm:$0xff]  }
 0x198   :  { %5395 = vmatpush1.bf16.msra.mxu1 %v7793_v49  ;;  %5429 = vmatprep.subr.bf16.mxu0 %v7804_v53  ;;  %v7855_v49 = vld [vmem:[%s11144_s1 + $0x10c] ss:$16 sps:$4 sm:$0xff]   ;;  %v7856_v53 = vld [vmem:[%s11144_s1 + $0x388] ss:$16 sps:$4 sm:$0xff]  }
 0x199   :  { %5396 = vmatprep.subr.bf16.mxu1 %v7801_v52  ;;  %v7853_v52 = vld [vmem:[%s11144_s1 + $0x108] ss:$16 sps:$4 sm:$0xff]  }
 0x19b   :  { %5430 = vmatpush1.bf16.msra.mxu0 %v7802_v56  ;;  %v7864_v56 = vld [vmem:[%s11144_s1 + $0x4ec] ss:$16 sps:$4 sm:$0xff]  }
 0x19c   :  { %5397 = vmatpush1.bf16.msra.mxu1 %v7799_v55  ;;  %5431 = vmatprep.subr.bf16.mxu0 %v7810_v51  ;;  %v7861_v55 = vld [vmem:[%s11144_s1 + $0x36c] ss:$16 sps:$4 sm:$0xff]   ;;  %v7862_v51 = vld [vmem:[%s11144_s1 + $0x4e8] ss:$16 sps:$4 sm:$0xff]  }
 0x19d   :  { %5398 = vmatprep.subr.bf16.mxu1 %v7807_v59  ;;  %v7859_v59 = vld [vmem:[%s11144_s1 + $0x368] ss:$16 sps:$4 sm:$0xff]  }
 0x19f   :  { %5432 = vmatpush1.bf16.msra.mxu0 %v7808_v2  ;;  %v7870_v2 = vld [vmem:[%s11144_s1 + $0x4cc] ss:$16 sps:$4 sm:$0xff]  }
 0x1a0   :  { %5399 = vmatpush1.bf16.msra.mxu1 %v7805_v60  ;;  %5433 = vmatprep.subr.bf16.mxu0 %v7816_v57  ;;  %v7867_v60 = vld [vmem:[%s11144_s1 + $0x34c] ss:$16 sps:$4 sm:$0xff]   ;;  %v7868_v57 = vld [vmem:[%s11144_s1 + $0x4c8] ss:$16 sps:$4 sm:$0xff]  }
 0x1a1   :  { %5400 = vmatprep.subr.bf16.mxu1 %v7813_v3  ;;  %v7865_v3 = vld [vmem:[%s11144_s1 + $0x348] ss:$16 sps:$4 sm:$0xff]  }
 0x1a3   :  { %5434 = vmatpush1.bf16.msra.mxu0 %v7814_v5 }
 0x1a4   :  { %5401 = vmatpush2.bf16.msra.mxu1 %v7811_v58  ;;  %5435 = vmatprep.subr.bf16.mxu0 %v7822_v11 }
 0x1a5   :  { %5402 = vmatprep.subr.bf16.mxu1 %v7819_v8 }
 0x1a7   :  { %5436 = vmatpush1.bf16.msra.mxu0 %v7820_v13  ;;  %v7873_v13 = vld [vmem:[%s11144_s1 + $0x32c] ss:$16 sps:$4 sm:$0xff]  }
 0x1a8   :  { %5403 = vmatpush2.bf16.msra.mxu1 %v7817_v12  ;;  %5437 = vmatprep.subr.bf16.mxu0 %v7828_v15 }
 0x1a9   :  { %5404 = vmatprep.subr.bf16.mxu1 %v7825_v14  ;;  %v7876_v14 = vld [vmem:[%s11144_s1 + $0x4ac] ss:$16 sps:$4 sm:$0xff]  }
 0x1ab   :  { %5438 = vmatpush1.bf16.msra.mxu0 %v7826_v18 }
 0x1ac   :  { %5405 = vmatpush2.bf16.msra.mxu1 %v7823_v26  ;;  %5439 = vmatprep.subr.bf16.mxu0 %v7834_v27  ;;  %v7874_v26 = vld [vmem:[%s11144_s1 + $0x4a8] ss:$16 sps:$4 sm:$0xff]  }
 0x1ad   :  { %5406 = vmatprep.subr.bf16.mxu1 %v7831_v20 }
 0x1af   :  { %5440 = vmatpush1.bf16.msra.mxu0 %v7832_v28 }
 0x1b0   :  { %5407 = vmatpush2.bf16.msra.mxu1 %v7829_v29  ;;  %5441 = vmatprep.subr.bf16.mxu0 %v7840_v32  ;;  %v7880_v32 = vld [vmem:[%s11144_s1 + $0x488] ss:$16 sps:$4 sm:$0xff]  }
 0x1b1   :  { %5408 = vmatprep.subr.bf16.mxu1 %v7837_v30  ;;  %v7882_v30 = vld [vmem:[%s11144_s1 + $0x48c] ss:$16 sps:$4 sm:$0xff]  }
 0x1b3   :  { %5442 = vmatpush2.bf16.msra.mxu0 %v7838_v47  ;;  %v7888_v47 = vld [vmem:[%s11144_s1 + $0x6ec] ss:$16 sps:$4 sm:$0xff]  }
 0x1b4   :  { %5409 = vmatpush2.bf16.msra.mxu1 %v7835_v33  ;;  %5443 = vmatprep.subr.bf16.mxu0 %v7846_v41  ;;  %v7885_v33 = vld [vmem:[%s11144_s1 + $0x46c] ss:$16 sps:$4 sm:$0xff]   ;;  %v7886_v41 = vld [vmem:[%s11144_s1 + $0x6e8] ss:$16 sps:$4 sm:$0xff]  }
 0x1b5   :  { %5410 = vmatprep.subr.bf16.mxu1 %v7843_v34  ;;  %v7883_v34 = vld [vmem:[%s11144_s1 + $0x468] ss:$16 sps:$4 sm:$0xff]  }
 0x1b7   :  { %5444 = vmatpush2.bf16.msra.mxu0 %v7844_v23  ;;  %v7894_v23 = vld [vmem:[%s11144_s1 + $0x6cc] ss:$16 sps:$4 sm:$0xff]  }
 0x1b8   :  { %5411 = vmatpush2.bf16.msra.mxu1 %v7841_v22  ;;  %5445 = vmatprep.subr.bf16.mxu0 %v7852_v45  ;;  %v7891_v22 = vld [vmem:[%s11144_s1 + $0x44c] ss:$16 sps:$4 sm:$0xff]   ;;  %v7892_v45 = vld [vmem:[%s11144_s1 + $0x6c8] ss:$16 sps:$4 sm:$0xff]  }
 0x1b9   :  { %5412 = vmatprep.subr.bf16.mxu1 %v7849_v44  ;;  %v7889_v44 = vld [vmem:[%s11144_s1 + $0x448] ss:$16 sps:$4 sm:$0xff]  }
 0x1bb   :  { %5446 = vmatpush2.bf16.msra.mxu0 %v7850_v48  ;;  %v7895_v48 = vld [vmem:[%s11144_s1 + $0x428] ss:$16 sps:$4 sm:$0xff]  }
 0x1bc   :  { %5413 = vmatpush2.bf16.msra.mxu1 %v7847_v46  ;;  %5447 = vmatprep.subr.bf16.mxu0 %v7858_v50  ;;  %v7897_v46 = vld [vmem:[%s11144_s1 + $0x42c] ss:$16 sps:$4 sm:$0xff]  }
 0x1bd   :  { %5414 = vmatprep.subr.bf16.mxu1 %v7855_v49  ;;  %v7898_v49 = vld [vmem:[%s11144_s1 + $0x6a8] ss:$16 sps:$4 sm:$0xff]   ;;  %v7903_v50 = vld [vmem:[%s11144_s1 + $0x40c] ss:$16 sps:$4 sm:$0xff]  }
 0x1bf   :  { %5448 = vmatpush2.bf16.msra.mxu0 %v7856_v53  ;;  %v7904_v53 = vld [vmem:[%s11144_s1 + $0x688] ss:$16 sps:$4 sm:$0xff]  }
 0x1c0   :  { %5415 = vmatpush2.bf16.msra.mxu1 %v7853_v52  ;;  %5449 = vmatprep.subr.bf16.mxu0 %v7861_v55  ;;  %v7901_v52 = vld [vmem:[%s11144_s1 + $0x408] ss:$16 sps:$4 sm:$0xff]   ;;  %v7909_v55 = vld [vmem:[%s11144_s1 + $0x5ec] ss:$16 sps:$4 sm:$0xff]  }
 0x1c1   :  { %5466 = vmatprep.subr.bf16.mxu1 %v7864_v56  ;;  %v7912_v56 = vld [vmem:[%s11144_s1 + $0x66c] ss:$16 sps:$4 sm:$0xff]  }
 0x1c2   :  { %v5131_v58 = vpop.f32.mrf.mxu0 }
 0x1c3   :  { %v5172_v5 = vpop.f32.mrf.mxu1  ;;  %5417 = vmatmul.mubr.bf16.vlgmr.msra.gmra.mxu1 %v8638_v6  ;;  %v5132_v8 = vadd.f32 %v5131_v58, %v9796_v19  ;;  %5450 = vmatpush2.bf16.msra.mxu0 %v7859_v59  ;;  %v7871_v19 = vld [vmem:[%s11144_s1 + $0x328] ss:$16 sps:$4 sm:$0xff]   ;;  %v7921_v58 = vld [vmem:[%s11144_s1 + $0x5ac] ss:$16 sps:$4 sm:$0xff]  }
 0x1c4   :  { %5467 = vmatpush1.bf16.msra.mxu1 %v7862_v51  ;;  %v5133_v11 = vpop.f32.mrf.mxu0  ;;  %5451 = vmatprep.subr.bf16.mxu0 %v7867_v60  ;;  %v7907_v59 = vld [vmem:[%s11144_s1 + $0x5e8] ss:$16 sps:$4 sm:$0xff]   ;;  %v7915_v60 = vld [vmem:[%s11144_s1 + $0x5cc] ss:$16 sps:$4 sm:$0xff]  }
 0x1c5   :  { %v5174_v12 = vpop.f32.mrf.mxu1  ;;  %5468 = vmatprep.subr.bf16.mxu1 %v7870_v2  ;;  %v10002_v15 = vadd.f32 %v5172_v5, %v5132_v8  ;;  %v5134_v6 = vadd.f32 %v5133_v11, %v9807_v31  ;;  %5498 = vmatprep.mubr.bf16.mxu1 %v8734_v36  ;;  %v7879_v31 = vld [vmem:[%s11144_s1 + $0x30c] ss:$16 sps:$4 sm:$0xff]   ;;  %v7877_v36 = vld [vmem:[%s11144_s1 + $0x308] ss:$16 sps:$4 sm:$0xff]  }
 0x1c6   :  { %v5135_v18 = vpop.f32.mrf.mxu0  ;;  %v7910_v51 = vld [vmem:[%s11144_s1 + $0x668] ss:$16 sps:$4 sm:$0xff]   ;;  %v7918_v2 = vld [vmem:[%s11144_s1 + $0x64c] ss:$16 sps:$4 sm:$0xff]  }
 0x1c7   :  { %v5176_v20 = vpop.f32.mrf.mxu1  ;;  %v10012_v27 = vadd.f32 %v5174_v12, %v5134_v6  ;;  %5452 = vmatpush2.bf16.msra.mxu0 %v7865_v3  ;;  %v7913_v3 = vld [vmem:[%s11144_s1 + $0x5c8] ss:$16 sps:$4 sm:$0xff]   ;;  %v7924_v5 = vld [vmem:[%s11144_s1 + $0x62c] ss:$16 sps:$4 sm:$0xff]  }
 0x1c8   :  { %5469 = vmatpush1.bf16.msra.mxu1 %v7868_v57  ;;  %v5136_v29 = vpop.f32.mrf.mxu0  ;;  %5453 = vmatprep.subr.bf16.mxu0 %v7873_v13  ;;  %v7916_v57 = vld [vmem:[%s11144_s1 + $0x648] ss:$16 sps:$4 sm:$0xff]   ;;  %v7927_v12 = vld [vmem:[%s11144_s1 + $0x58c] ss:$16 sps:$4 sm:$0xff]  }
 0x1c9   :  { %v5177_v28 = vpop.f32.mrf.mxu1  ;;  %5470 = vmatprep.subr.bf16.mxu1 %v7876_v14  ;;  %v7919_v8 = vld [vmem:[%s11144_s1 + $0x5a8] ss:$16 sps:$4 sm:$0xff]   ;;  %v7930_v13 = vld [vmem:[%s11144_s1 + $0x60c] ss:$16 sps:$4 sm:$0xff]  }
 0x1ca   :  { %v7922_v11 = vld [vmem:[%s11144_s1 + $0x628] ss:$16 sps:$4 sm:$0xff]   ;;  %v7939_v29 = vld [vmem:[%s11144_s1 + $0x54c] ss:$16 sps:$4 sm:$0xff]  }
 0x1cb   :  { %5454 = vmatpush2.bf16.msra.mxu0 %v7871_v19  ;;  %v7925_v14 = vld [vmem:[%s11144_s1 + $0x588] ss:$16 sps:$4 sm:$0xff]   ;;  %v7933_v19 = vld [vmem:[%s11144_s1 + $0x56c] ss:$16 sps:$4 sm:$0xff]  }
 0x1cc   :  { %5471 = vmatpush1.bf16.msra.mxu1 %v7874_v26  ;;  %5455 = vmatprep.subr.bf16.mxu0 %v7879_v31  ;;  %v7928_v6 = vld [vmem:[%s11144_s1 + $0x608] ss:$16 sps:$4 sm:$0xff]   ;;  %v7936_v26 = vld [vmem:[%s11144_s1 + $0x7ec] ss:$16 sps:$4 sm:$0xff]  }
 0x1cd   :  { %5472 = vmatprep.subr.bf16.mxu1 %v7882_v30  ;;  %v7931_v18 = vld [vmem:[%s11144_s1 + $0x568] ss:$16 sps:$4 sm:$0xff]   ;;  %v7942_v28 = vld [vmem:[%s11144_s1 + $0x7cc] ss:$16 sps:$4 sm:$0xff]  }
 0x1ce   :  { %v7934_v20 = vld [vmem:[%s11144_s1 + $0x7e8] ss:$16 sps:$4 sm:$0xff]  }
 0x1cf   :  { %5456 = vmatpush2.bf16.msra.mxu0 %v7877_v36  ;;  %v7937_v31 = vld [vmem:[%s11144_s1 + $0x548] ss:$16 sps:$4 sm:$0xff]   ;;  %v7945_v36 = vld [vmem:[%s11144_s1 + $0x52c] ss:$16 sps:$4 sm:$0xff]  }
 0x1d0   :  { %5473 = vmatpush1.bf16.msra.mxu1 %v7880_v32  ;;  %5507 = vmatprep.subr.bf16.mxu0 %v7888_v47  ;;  %v7940_v30 = vld [vmem:[%s11144_s1 + $0x7c8] ss:$16 sps:$4 sm:$0xff]   ;;  %v7948_v32 = vld [vmem:[%s11144_s1 + $0x7ac] ss:$16 sps:$4 sm:$0xff]  }
 0x1d1   :  { %5474 = vmatprep.subr.bf16.mxu1 %v7885_v33  ;;  %v7943_v33 = vld [vmem:[%s11144_s1 + $0x528] ss:$16 sps:$4 sm:$0xff]  }
 0x1d2   :  { %5458 = vmatmul.mubr.bf16.vlgmr.msra.gmra.mxu0 %v8640_v7  ;;  %v7900_v7 = vld [vmem:[%s11144_s1 + $0x6ac] ss:$16 sps:$4 sm:$0xff]   ;;  %v7946_v47 = vld [vmem:[%s11144_s1 + $0x7a8] ss:$16 sps:$4 sm:$0xff]  }
 0x1d3   :  { %5508 = vmatpush1.bf16.msra.mxu0 %v7886_v41  ;;  %5539 = vmatprep.mubr.bf16.mxu0 %v8738_v37  ;;  %v7906_v37 = vld [vmem:[%s11144_s1 + $0x68c] ss:$16 sps:$4 sm:$0xff]  }
 0x1d4   :  { %5475 = vmatpush1.bf16.msra.mxu1 %v7883_v34  ;;  %5509 = vmatprep.subr.bf16.mxu0 %v7894_v23  ;;  %v7951_v34 = vld [vmem:[%s11144_s1 + $0x50c] ss:$16 sps:$4 sm:$0xff]   ;;  %v7952_v23 = vld [vmem:[%s11144_s1 + $0x788] ss:$16 sps:$4 sm:$0xff]  }
 0x1d5   :  { %5476 = vmatprep.subr.bf16.mxu1 %v7891_v22  ;;  %v7954_v41 = vld [vmem:[%s11144_s1 + $0x78c] ss:$16 sps:$4 sm:$0xff]   ;;  %v7949_v22 = vld [vmem:[%s11144_s1 + $0x508] ss:$16 sps:$4 sm:$0xff]  }
 0x1d7   :  { %5510 = vmatpush1.bf16.msra.mxu0 %v7892_v45  ;;  %v7960_v45 = vld [vmem:[%s11144_s1 + $0x8ec] ss:$16 sps:$4 sm:$0xff]  }
 0x1d8   :  { %5477 = vmatpush1.bf16.msra.mxu1 %v7889_v44  ;;  %5511 = vmatprep.subr.bf16.mxu0 %v7900_v7  ;;  %v7957_v44 = vld [vmem:[%s11144_s1 + $0x76c] ss:$16 sps:$4 sm:$0xff]   ;;  %v7958_v7 = vld [vmem:[%s11144_s1 + $0x8e8] ss:$16 sps:$4 sm:$0xff]  }
 0x1d9   :  { %5478 = vmatprep.subr.bf16.mxu1 %v7897_v46  ;;  %v7955_v46 = vld [vmem:[%s11144_s1 + $0x768] ss:$16 sps:$4 sm:$0xff]  }
 0x1db   :  { %5512 = vmatpush1.bf16.msra.mxu0 %v7898_v49  ;;  %v7966_v49 = vld [vmem:[%s11144_s1 + $0x8cc] ss:$16 sps:$4 sm:$0xff]  }
 0x1dc   :  { %5479 = vmatpush1.bf16.msra.mxu1 %v7895_v48  ;;  %5513 = vmatprep.subr.bf16.mxu0 %v7906_v37  ;;  %v7963_v48 = vld [vmem:[%s11144_s1 + $0x74c] ss:$16 sps:$4 sm:$0xff]  }
 0x1dd   :  { %5480 = vmatprep.subr.bf16.mxu1 %v7903_v50 }
 0x1df   :  { %5514 = vmatpush1.bf16.msra.mxu0 %v7904_v53  ;;  %v7961_v53 = vld [vmem:[%s11144_s1 + $0x748] ss:$16 sps:$4 sm:$0xff]  }
 0x1e0   :  { %5481 = vmatpush1.bf16.msra.mxu1 %v7901_v52  ;;  %5515 = vmatprep.subr.bf16.mxu0 %v7912_v56 }
 0x1e1   :  { %5482 = vmatprep.subr.bf16.mxu1 %v7909_v55  ;;  %v7964_v55 = vld [vmem:[%s11144_s1 + $0x8c8] ss:$16 sps:$4 sm:$0xff]  }
 0x1e3   :  { %5516 = vmatpush1.bf16.msra.mxu0 %v7910_v51 }
 0x1e4   :  { %5483 = vmatpush2.bf16.msra.mxu1 %v7907_v59  ;;  %5517 = vmatprep.subr.bf16.mxu0 %v7918_v2 }
 0x1e5   :  { %5484 = vmatprep.subr.bf16.mxu1 %v7915_v60 }
 0x1e7   :  { %5518 = vmatpush1.bf16.msra.mxu0 %v7916_v57 }
 0x1e8   :  { %5485 = vmatpush2.bf16.msra.mxu1 %v7913_v3  ;;  %5519 = vmatprep.subr.bf16.mxu0 %v7924_v5  ;;  %v7970_v5 = vld [vmem:[%s11144_s1 + $0x8a8] ss:$16 sps:$4 sm:$0xff]  }
 0x1e9   :  { %5486 = vmatprep.subr.bf16.mxu1 %v7921_v58  ;;  %v7967_v58 = vld [vmem:[%s11144_s1 + $0x728] ss:$16 sps:$4 sm:$0xff]  }
 0x1eb   :  { %5520 = vmatpush1.bf16.msra.mxu0 %v7922_v11 }
 0x1ec   :  { %5487 = vmatpush2.bf16.msra.mxu1 %v7919_v8  ;;  %5521 = vmatprep.subr.bf16.mxu0 %v7930_v13  ;;  %v7976_v13 = vld [vmem:[%s11144_s1 + $0x888] ss:$16 sps:$4 sm:$0xff]  }
 0x1ed   :  { %5488 = vmatprep.subr.bf16.mxu1 %v7927_v12  ;;  %v7973_v12 = vld [vmem:[%s11144_s1 + $0x708] ss:$16 sps:$4 sm:$0xff]  }
 0x1ef   :  { %5522 = vmatpush1.bf16.msra.mxu0 %v7928_v6  ;;  %v7984_v6 = vld [vmem:[%s11144_s1 + $0xaec] ss:$16 sps:$4 sm:$0xff]  }
 0x1f0   :  { %5489 = vmatpush2.bf16.msra.mxu1 %v7925_v14  ;;  %5523 = vmatprep.subr.bf16.mxu0 %v7936_v26  ;;  %v7981_v14 = vld [vmem:[%s11144_s1 + $0x86c] ss:$16 sps:$4 sm:$0xff]   ;;  %v7982_v26 = vld [vmem:[%s11144_s1 + $0xae8] ss:$16 sps:$4 sm:$0xff]  }
 0x1f1   :  { %5490 = vmatprep.subr.bf16.mxu1 %v7933_v19  ;;  %v7979_v19 = vld [vmem:[%s11144_s1 + $0x868] ss:$16 sps:$4 sm:$0xff]  }
 0x1f3   :  { %5524 = vmatpush2.bf16.msra.mxu0 %v7934_v20  ;;  %v7990_v20 = vld [vmem:[%s11144_s1 + $0xacc] ss:$16 sps:$4 sm:$0xff]  }
 0x1f4   :  { %5491 = vmatpush2.bf16.msra.mxu1 %v7931_v18  ;;  %5525 = vmatprep.subr.bf16.mxu0 %v7942_v28  ;;  %v7987_v18 = vld [vmem:[%s11144_s1 + $0x84c] ss:$16 sps:$4 sm:$0xff]   ;;  %v7988_v28 = vld [vmem:[%s11144_s1 + $0xac8] ss:$16 sps:$4 sm:$0xff]  }
 0x1f5   :  { %5492 = vmatprep.subr.bf16.mxu1 %v7939_v29  ;;  %v7985_v29 = vld [vmem:[%s11144_s1 + $0x848] ss:$16 sps:$4 sm:$0xff]  }
 0x1f7   :  { %5526 = vmatpush2.bf16.msra.mxu0 %v7940_v30  ;;  %v7991_v30 = vld [vmem:[%s11144_s1 + $0x828] ss:$16 sps:$4 sm:$0xff]  }
 0x1f8   :  { %5493 = vmatpush2.bf16.msra.mxu1 %v7937_v31  ;;  %5527 = vmatprep.subr.bf16.mxu0 %v7948_v32  ;;  %v7993_v31 = vld [vmem:[%s11144_s1 + $0x82c] ss:$16 sps:$4 sm:$0xff]  }
 0x1f9   :  { %5494 = vmatprep.subr.bf16.mxu1 %v7945_v36  ;;  %v7994_v36 = vld [vmem:[%s11144_s1 + $0xaa8] ss:$16 sps:$4 sm:$0xff]   ;;  %v7999_v32 = vld [vmem:[%s11144_s1 + $0x80c] ss:$16 sps:$4 sm:$0xff]  }
 0x1fb   :  { %5528 = vmatpush2.bf16.msra.mxu0 %v7946_v47  ;;  %v8000_v47 = vld [vmem:[%s11144_s1 + $0xa88] ss:$16 sps:$4 sm:$0xff]  }
 0x1fc   :  { %5495 = vmatpush2.bf16.msra.mxu1 %v7943_v33  ;;  %5529 = vmatprep.subr.bf16.mxu0 %v7954_v41  ;;  %v7997_v33 = vld [vmem:[%s11144_s1 + $0x808] ss:$16 sps:$4 sm:$0xff]   ;;  %v8008_v41 = vld [vmem:[%s11144_s1 + $0xa6c] ss:$16 sps:$4 sm:$0xff]  }
 0x1fd   :  { %5496 = vmatprep.subr.bf16.mxu1 %v7951_v34  ;;  %v8005_v34 = vld [vmem:[%s11144_s1 + $0x9ec] ss:$16 sps:$4 sm:$0xff]  }
 0x1ff   :  { %5530 = vmatpush2.bf16.msra.mxu0 %v7952_v23  ;;  %v8006_v23 = vld [vmem:[%s11144_s1 + $0xa68] ss:$16 sps:$4 sm:$0xff]  }
 0x200   :  { %5497 = vmatpush2.bf16.msra.mxu1 %v7949_v22  ;;  %5531 = vmatprep.subr.bf16.mxu0 %v7957_v44  ;;  %v8003_v22 = vld [vmem:[%s11144_s1 + $0x9e8] ss:$16 sps:$4 sm:$0xff]   ;;  %v8011_v44 = vld [vmem:[%s11144_s1 + $0x9cc] ss:$16 sps:$4 sm:$0xff]  }
 0x201   :  { %5548 = vmatprep.subr.bf16.mxu1 %v7960_v45  ;;  %v8014_v45 = vld [vmem:[%s11144_s1 + $0xa4c] ss:$16 sps:$4 sm:$0xff]  }
 0x202   :  { %v5213_v50 = vpop.f32.mrf.mxu0 }
 0x203   :  { %v5254_v37 = vpop.f32.mrf.mxu1  ;;  %5499 = vmatmul.mubr.bf16.vlgmr.msra.gmra.mxu1 %v8858_v16  ;;  %v5214_v52 = vadd.f32 %v5213_v50, %v10002_v15  ;;  %5532 = vmatpush2.bf16.msra.mxu0 %v7955_v46  ;;  %v7969_v16 = vld [vmem:[%s11144_s1 + $0x72c] ss:$16 sps:$4 sm:$0xff]   ;;  %v8009_v46 = vld [vmem:[%s11144_s1 + $0x9c8] ss:$16 sps:$4 sm:$0xff]  }
 0x204   :  { %5549 = vmatpush1.bf16.msra.mxu1 %v7958_v7  ;;  %v5215_v56 = vpop.f32.mrf.mxu0  ;;  %5533 = vmatprep.subr.bf16.mxu0 %v7963_v48  ;;  %v7972_v15 = vld [vmem:[%s11144_s1 + $0x8ac] ss:$16 sps:$4 sm:$0xff]   ;;  %v8012_v7 = vld [vmem:[%s11144_s1 + $0xa48] ss:$16 sps:$4 sm:$0xff]  }
 0x205   :  { %v5256_v59 = vpop.f32.mrf.mxu1  ;;  %5550 = vmatprep.subr.bf16.mxu1 %v7966_v49  ;;  %v10204_v51 = vadd.f32 %v5254_v37, %v5214_v52  ;;  %v5216_v60 = vadd.f32 %v5215_v56, %v10012_v27  ;;  %5580 = vmatprep.mubr.bf16.mxu1 %v8888_v24  ;;  %v7975_v24 = vld [vmem:[%s11144_s1 + $0x70c] ss:$16 sps:$4 sm:$0xff]   ;;  %v8015_v50 = vld [vmem:[%s11144_s1 + $0x9a8] ss:$16 sps:$4 sm:$0xff]  }
 0x206   :  { %v5217_v2 = vpop.f32.mrf.mxu0  ;;  %v7978_v27 = vld [vmem:[%s11144_s1 + $0x88c] ss:$16 sps:$4 sm:$0xff]   ;;  %v8018_v37 = vld [vmem:[%s11144_s1 + $0xa28] ss:$16 sps:$4 sm:$0xff]  }
 0x207   :  { %v5258_v3 = vpop.f32.mrf.mxu1  ;;  %v10208_v57 = vadd.f32 %v5256_v59, %v5216_v60  ;;  %5534 = vmatpush2.bf16.msra.mxu0 %v7961_v53  ;;  %v8017_v48 = vld [vmem:[%s11144_s1 + $0x9ac] ss:$16 sps:$4 sm:$0xff]   ;;  %v8024_v56 = vld [vmem:[%s11144_s1 + $0xa08] ss:$16 sps:$4 sm:$0xff]  }
 0x208   :  { %5551 = vmatpush1.bf16.msra.mxu1 %v7964_v55  ;;  %v5218_v8 = vpop.f32.mrf.mxu0  ;;  %5535 = vmatprep.subr.bf16.mxu0 %v7969_v16  ;;  %v8020_v49 = vld [vmem:[%s11144_s1 + $0xa2c] ss:$16 sps:$4 sm:$0xff]   ;;  %v8021_v55 = vld [vmem:[%s11144_s1 + $0x988] ss:$16 sps:$4 sm:$0xff]  }
 0x209   :  { %v5259_v11 = vpop.f32.mrf.mxu1  ;;  %5552 = vmatprep.subr.bf16.mxu1 %v7972_v15  ;;  %v8023_v52 = vld [vmem:[%s11144_s1 + $0x98c] ss:$16 sps:$4 sm:$0xff]   ;;  %v8027_v15 = vld [vmem:[%s11144_s1 + $0x968] ss:$16 sps:$4 sm:$0xff]  }
 0x20a   :  { %v8026_v53 = vld [vmem:[%s11144_s1 + $0xa0c] ss:$16 sps:$4 sm:$0xff]   ;;  %v8030_v60 = vld [vmem:[%s11144_s1 + $0xbe8] ss:$16 sps:$4 sm:$0xff]  }
 0x20b   :  { %5536 = vmatpush2.bf16.msra.mxu0 %v7967_v58  ;;  %v8029_v59 = vld [vmem:[%s11144_s1 + $0x96c] ss:$16 sps:$4 sm:$0xff]   ;;  %v8033_v58 = vld [vmem:[%s11144_s1 + $0x948] ss:$16 sps:$4 sm:$0xff]  }
 0x20c   :  { %5553 = vmatpush1.bf16.msra.mxu1 %v7970_v5  ;;  %5537 = vmatprep.subr.bf16.mxu0 %v7975_v24  ;;  %v8032_v16 = vld [vmem:[%s11144_s1 + $0xbec] ss:$16 sps:$4 sm:$0xff]   ;;  %v8036_v5 = vld [vmem:[%s11144_s1 + $0xbc8] ss:$16 sps:$4 sm:$0xff]  }
 0x20d   :  { %5554 = vmatprep.subr.bf16.mxu1 %v7978_v27  ;;  %v8035_v2 = vld [vmem:[%s11144_s1 + $0x94c] ss:$16 sps:$4 sm:$0xff]   ;;  %v8039_v24 = vld [vmem:[%s11144_s1 + $0x928] ss:$16 sps:$4 sm:$0xff]  }
 0x20e   :  { %v8038_v3 = vld [vmem:[%s11144_s1 + $0xbcc] ss:$16 sps:$4 sm:$0xff]   ;;  %v8042_v27 = vld [vmem:[%s11144_s1 + $0xba8] ss:$16 sps:$4 sm:$0xff]  }
 0x20f   :  { %5538 = vmatpush2.bf16.msra.mxu0 %v7973_v12  ;;  %v8041_v8 = vld [vmem:[%s11144_s1 + $0x92c] ss:$16 sps:$4 sm:$0xff]  }
 0x210   :  { %5555 = vmatpush1.bf16.msra.mxu1 %v7976_v13  ;;  %5589 = vmatprep.subr.bf16.mxu0 %v7984_v6  ;;  %v8044_v11 = vld [vmem:[%s11144_s1 + $0xbac] ss:$16 sps:$4 sm:$0xff]   ;;  %v8048_v6 = vld [vmem:[%s11144_s1 + $0xb88] ss:$16 sps:$4 sm:$0xff]  }
 0x211   :  { %5556 = vmatprep.subr.bf16.mxu1 %v7981_v14  ;;  %v8047_v12 = vld [vmem:[%s11144_s1 + $0x90c] ss:$16 sps:$4 sm:$0xff]   ;;  %v8045_v14 = vld [vmem:[%s11144_s1 + $0x908] ss:$16 sps:$4 sm:$0xff]  }
 0x212   :  { %5540 = vmatmul.mubr.bf16.vlgmr.msra.gmra.mxu0 %v8862_v17  ;;  %v7996_v17 = vld [vmem:[%s11144_s1 + $0xaac] ss:$16 sps:$4 sm:$0xff]  }
 0x213   :  { %5590 = vmatpush1.bf16.msra.mxu0 %v7982_v26  ;;  %5621 = vmatprep.mubr.bf16.mxu0 %v8892_v25  ;;  %v8002_v25 = vld [vmem:[%s11144_s1 + $0xa8c] ss:$16 sps:$4 sm:$0xff]  }
 0x214   :  { %5557 = vmatpush1.bf16.msra.mxu1 %v7979_v19  ;;  %5591 = vmatprep.subr.bf16.mxu0 %v7990_v20  ;;  %v8050_v13 = vld [vmem:[%s11144_s1 + $0xb8c] ss:$16 sps:$4 sm:$0xff]   ;;  %v8054_v20 = vld [vmem:[%s11144_s1 + $0xce8] ss:$16 sps:$4 sm:$0xff]  }
 0x215   :  { %5558 = vmatprep.subr.bf16.mxu1 %v7987_v18  ;;  %v8053_v19 = vld [vmem:[%s11144_s1 + $0xb6c] ss:$16 sps:$4 sm:$0xff]   ;;  %v8051_v18 = vld [vmem:[%s11144_s1 + $0xb68] ss:$16 sps:$4 sm:$0xff]  }
 0x216   :  { %v8056_v26 = vld [vmem:[%s11144_s1 + $0xcec] ss:$16 sps:$4 sm:$0xff]  }
 0x217   :  { %5592 = vmatpush1.bf16.msra.mxu0 %v7988_v28  ;;  %v8062_v28 = vld [vmem:[%s11144_s1 + $0xccc] ss:$16 sps:$4 sm:$0xff]  }
 0x218   :  { %5559 = vmatpush1.bf16.msra.mxu1 %v7985_v29  ;;  %5593 = vmatprep.subr.bf16.mxu0 %v7996_v17  ;;  %v8059_v29 = vld [vmem:[%s11144_s1 + $0xb4c] ss:$16 sps:$4 sm:$0xff]  }
 0x219   :  { %5560 = vmatprep.subr.bf16.mxu1 %v7993_v31 }
 0x21b   :  { %5594 = vmatpush1.bf16.msra.mxu0 %v7994_v36  ;;  %v8057_v36 = vld [vmem:[%s11144_s1 + $0xb48] ss:$16 sps:$4 sm:$0xff]  }
 0x21c   :  { %5561 = vmatpush1.bf16.msra.mxu1 %v7991_v30  ;;  %5595 = vmatprep.subr.bf16.mxu0 %v8002_v25 }
 0x21d   :  { %5562 = vmatprep.subr.bf16.mxu1 %v7999_v32  ;;  %v8060_v32 = vld [vmem:[%s11144_s1 + $0xcc8] ss:$16 sps:$4 sm:$0xff]  }
 0x21f   :  { %5596 = vmatpush1.bf16.msra.mxu0 %v8000_v47 }
 0x220   :  { %5563 = vmatpush1.bf16.msra.mxu1 %v7997_v33  ;;  %5597 = vmatprep.subr.bf16.mxu0 %v8008_v41 }
 0x221   :  { %5564 = vmatprep.subr.bf16.mxu1 %v8005_v34 }
 0x223   :  { %5598 = vmatpush1.bf16.msra.mxu0 %v8006_v23 }
 0x224   :  { %5565 = vmatpush2.bf16.msra.mxu1 %v8003_v22  ;;  %5599 = vmatprep.subr.bf16.mxu0 %v8014_v45  ;;  %v8066_v45 = vld [vmem:[%s11144_s1 + $0xca8] ss:$16 sps:$4 sm:$0xff]  }
 0x225   :  { %5566 = vmatprep.subr.bf16.mxu1 %v8011_v44  ;;  %v8063_v44 = vld [vmem:[%s11144_s1 + $0xb28] ss:$16 sps:$4 sm:$0xff]  }
 0x227   :  { %5600 = vmatpush1.bf16.msra.mxu0 %v8012_v7 }
 0x228   :  { %5567 = vmatpush2.bf16.msra.mxu1 %v8009_v46  ;;  %5601 = vmatprep.subr.bf16.mxu0 %v8020_v49  ;;  %v8072_v49 = vld [vmem:[%s11144_s1 + $0xc88] ss:$16 sps:$4 sm:$0xff]  }
 0x229   :  { %5568 = vmatprep.subr.bf16.mxu1 %v8017_v48  ;;  %v8069_v48 = vld [vmem:[%s11144_s1 + $0xb08] ss:$16 sps:$4 sm:$0xff]  }
 0x22b   :  { %5602 = vmatpush1.bf16.msra.mxu0 %v8018_v37  ;;  %v8080_v37 = vld [vmem:[%s11144_s1 + $0xeec] ss:$16 sps:$4 sm:$0xff]  }
 0x22c   :  { %5569 = vmatpush2.bf16.msra.mxu1 %v8015_v50  ;;  %5603 = vmatprep.subr.bf16.mxu0 %v8026_v53  ;;  %v8077_v50 = vld [vmem:[%s11144_s1 + $0xc6c] ss:$16 sps:$4 sm:$0xff]   ;;  %v8078_v53 = vld [vmem:[%s11144_s1 + $0xee8] ss:$16 sps:$4 sm:$0xff]  }
 0x22d   :  { %5570 = vmatprep.subr.bf16.mxu1 %v8023_v52  ;;  %v8075_v52 = vld [vmem:[%s11144_s1 + $0xc68] ss:$16 sps:$4 sm:$0xff]  }
 0x22f   :  { %5604 = vmatpush1.bf16.msra.mxu0 %v8024_v56  ;;  %v8086_v56 = vld [vmem:[%s11144_s1 + $0xecc] ss:$16 sps:$4 sm:$0xff]  }
 0x230   :  { %5571 = vmatpush2.bf16.msra.mxu1 %v8021_v55  ;;  %5605 = vmatprep.subr.bf16.mxu0 %v8032_v16  ;;  %v8083_v55 = vld [vmem:[%s11144_s1 + $0xc4c] ss:$16 sps:$4 sm:$0xff]  }
 0x231   :  { %5572 = vmatprep.subr.bf16.mxu1 %v8029_v59 }
 0x233   :  { %5606 = vmatpush2.bf16.msra.mxu0 %v8030_v60  ;;  %v8084_v60 = vld [vmem:[%s11144_s1 + $0xec8] ss:$16 sps:$4 sm:$0xff]  }
 0x234   :  { %5573 = vmatpush2.bf16.msra.mxu1 %v8027_v15  ;;  %5607 = vmatprep.subr.bf16.mxu0 %v8038_v3  ;;  %v8081_v15 = vld [vmem:[%s11144_s1 + $0xc48] ss:$16 sps:$4 sm:$0xff]   ;;  %v8089_v3 = vld [vmem:[%s11144_s1 + $0xc2c] ss:$16 sps:$4 sm:$0xff]  }
 0x235   :  { %5574 = vmatprep.subr.bf16.mxu1 %v8035_v2 }
 0x237   :  { %5608 = vmatpush2.bf16.msra.mxu0 %v8036_v5 }
 0x238   :  { %5575 = vmatpush2.bf16.msra.mxu1 %v8033_v58  ;;  %5609 = vmatprep.subr.bf16.mxu0 %v8044_v11  ;;  %v8090_v11 = vld [vmem:[%s11144_s1 + $0xea8] ss:$16 sps:$4 sm:$0xff]  }
 0x239   :  { %5576 = vmatprep.subr.bf16.mxu1 %v8041_v8  ;;  %v8087_v8 = vld [vmem:[%s11144_s1 + $0xc28] ss:$16 sps:$4 sm:$0xff]  }
 0x23b   :  { %5610 = vmatpush2.bf16.msra.mxu0 %v8042_v27  ;;  %v8095_v27 = vld [vmem:[%s11144_s1 + $0xc0c] ss:$16 sps:$4 sm:$0xff]  }
 0x23c   :  { %5577 = vmatpush2.bf16.msra.mxu1 %v8039_v24  ;;  %5611 = vmatprep.subr.bf16.mxu0 %v8050_v13  ;;  %v8096_v13 = vld [vmem:[%s11144_s1 + $0xe88] ss:$16 sps:$4 sm:$0xff]  }
 0x23d   :  { %5578 = vmatprep.subr.bf16.mxu1 %v8047_v12  ;;  %v8093_v12 = vld [vmem:[%s11144_s1 + $0xc08] ss:$16 sps:$4 sm:$0xff]  }
 0x23f   :  { %5612 = vmatpush2.bf16.msra.mxu0 %v8048_v6  ;;  %v8104_v6 = vld [vmem:[%s11144_s1 + $0xe6c] ss:$16 sps:$4 sm:$0xff]  }
 0x240   :  { %5579 = vmatpush2.bf16.msra.mxu1 %v8045_v14  ;;  %5613 = vmatprep.subr.bf16.mxu0 %v8053_v19  ;;  %v8101_v14 = vld [vmem:[%s11144_s1 + $0xdec] ss:$16 sps:$4 sm:$0xff]   ;;  %v8099_v19 = vld [vmem:[%s11144_s1 + $0xde8] ss:$16 sps:$4 sm:$0xff]  }
 0x241   :  { %5630 = vmatprep.subr.bf16.mxu1 %v8056_v26  ;;  %v8102_v26 = vld [vmem:[%s11144_s1 + $0xe68] ss:$16 sps:$4 sm:$0xff]  }
 0x242   :  { %v5295_v31 = vpop.f32.mrf.mxu0 }
 0x243   :  { %v5336_v17 = vpop.f32.mrf.mxu1  ;;  %5581 = vmatmul.mubr.bf16.vlgmr.msra.gmra.mxu1 %v9088_v38  ;;  %v5296_v30 = vadd.f32 %v5295_v31, %v10204_v51  ;;  %5614 = vmatpush2.bf16.msra.mxu0 %v8051_v18  ;;  %v8065_v38 = vld [vmem:[%s11144_s1 + $0xb2c] ss:$16 sps:$4 sm:$0xff]  }
 0x244   :  { %5631 = vmatpush1.bf16.msra.mxu1 %v8054_v20  ;;  %v5297_v25 = vpop.f32.mrf.mxu0  ;;  %5615 = vmatprep.subr.bf16.mxu0 %v8059_v29  ;;  %v8068_v51 = vld [vmem:[%s11144_s1 + $0xcac] ss:$16 sps:$4 sm:$0xff]   ;;  %v8105_v29 = vld [vmem:[%s11144_s1 + $0xdc8] ss:$16 sps:$4 sm:$0xff]  }
 0x245   :  { %v5338_v33 = vpop.f32.mrf.mxu1  ;;  %5632 = vmatprep.subr.bf16.mxu1 %v8062_v28  ;;  %v5337_v47 = vadd.f32 %v5336_v17, %v5296_v30  ;;  %v5298_v34 = vadd.f32 %v5297_v25, %v10208_v57  ;;  %5662 = vmatprep.mubr.bf16.mxu1 %v9110_v42  ;;  %v8071_v42 = vld [vmem:[%s11144_s1 + $0xb0c] ss:$16 sps:$4 sm:$0xff]   ;;  %v8108_v28 = vld [vmem:[%s11144_s1 + $0xe48] ss:$16 sps:$4 sm:$0xff]  }
 0x246   :  { %v5299_v41 = vpop.f32.mrf.mxu0  ;;  %v8074_v57 = vld [vmem:[%s11144_s1 + $0xc8c] ss:$16 sps:$4 sm:$0xff]   ;;  %v8111_v30 = vld [vmem:[%s11144_s1 + $0xda8] ss:$16 sps:$4 sm:$0xff]  }
 0x247   :  { %v5340_v22 = vpop.f32.mrf.mxu1  ;;  %v5339_v23 = vadd.f32 %v5338_v33, %v5298_v34  ;;  %5616 = vmatpush2.bf16.msra.mxu0 %v8057_v36  ;;  %v8107_v18 = vld [vmem:[%s11144_s1 + $0xdcc] ss:$16 sps:$4 sm:$0xff]   ;;  %v8114_v36 = vld [vmem:[%s11144_s1 + $0xe28] ss:$16 sps:$4 sm:$0xff]  }
 0x248   :  { %5633 = vmatpush1.bf16.msra.mxu1 %v8060_v32  ;;  %v5300_v46 = vpop.f32.mrf.mxu0  ;;  %5617 = vmatprep.subr.bf16.mxu0 %v8065_v38  ;;  %v8110_v20 = vld [vmem:[%s11144_s1 + $0xe4c] ss:$16 sps:$4 sm:$0xff]   ;;  %v8117_v33 = vld [vmem:[%s11144_s1 + $0xd88] ss:$16 sps:$4 sm:$0xff]  }
 0x249   :  { %v5341_v7 = vpop.f32.mrf.mxu1  ;;  %5634 = vmatprep.subr.bf16.mxu1 %v8068_v51  ;;  %v8113_v31 = vld [vmem:[%s11144_s1 + $0xdac] ss:$16 sps:$4 sm:$0xff]   ;;  %v8120_v38 = vld [vmem:[%s11144_s1 + $0xe08] ss:$16 sps:$4 sm:$0xff]  }
 0x24a   :  { %v8116_v17 = vld [vmem:[%s11144_s1 + $0xe2c] ss:$16 sps:$4 sm:$0xff]   ;;  %v8123_v34 = vld [vmem:[%s11144_s1 + $0xd68] ss:$16 sps:$4 sm:$0xff]  }
 0x24b   :  { %5618 = vmatpush2.bf16.msra.mxu0 %v8063_v44  ;;  %v8119_v32 = vld [vmem:[%s11144_s1 + $0xd8c] ss:$16 sps:$4 sm:$0xff]   ;;  %v8126_v41 = vld [vmem:[%s11144_s1 + $0xfe8] ss:$16 sps:$4 sm:$0xff]  }
 0x24c   :  { %5635 = vmatpush1.bf16.msra.mxu1 %v8066_v45  ;;  %5619 = vmatprep.subr.bf16.mxu0 %v8071_v42  ;;  %v8122_v25 = vld [vmem:[%s11144_s1 + $0xe0c] ss:$16 sps:$4 sm:$0xff]   ;;  %v8129_v44 = vld [vmem:[%s11144_s1 + $0xd48] ss:$16 sps:$4 sm:$0xff]  }
 0x24d   :  { %5636 = vmatprep.subr.bf16.mxu1 %v8074_v57  ;;  %v8125_v51 = vld [vmem:[%s11144_s1 + $0xd6c] ss:$16 sps:$4 sm:$0xff]   ;;  %v8132_v45 = vld [vmem:[%s11144_s1 + $0xfc8] ss:$16 sps:$4 sm:$0xff]  }
 0x24e   :  { %v8131_v22 = vld [vmem:[%s11144_s1 + $0xd4c] ss:$16 sps:$4 sm:$0xff]   ;;  %v8135_v42 = vld [vmem:[%s11144_s1 + $0xd28] ss:$16 sps:$4 sm:$0xff]  }
 0x24f   :  { %5620 = vmatpush2.bf16.msra.mxu0 %v8069_v48  ;;  %v8137_v46 = vld [vmem:[%s11144_s1 + $0xd2c] ss:$16 sps:$4 sm:$0xff]   ;;  %v8138_v57 = vld [vmem:[%s11144_s1 + $0xfa8] ss:$16 sps:$4 sm:$0xff]  }
 0x250   :  { %5637 = vmatpush1.bf16.msra.mxu1 %v8072_v49  ;;  %5671 = vmatprep.subr.bf16.mxu0 %v8080_v37  ;;  %v8140_v7 = vld [vmem:[%s11144_s1 + $0xfac] ss:$16 sps:$4 sm:$0xff]   ;;  %v8144_v37 = vld [vmem:[%s11144_s1 + $0xf88] ss:$16 sps:$4 sm:$0xff]  }
 0x251   :  { %5638 = vmatprep.subr.bf16.mxu1 %v8077_v50  ;;  %v8143_v48 = vld [vmem:[%s11144_s1 + $0xd0c] ss:$16 sps:$4 sm:$0xff]   ;;  %v8141_v50 = vld [vmem:[%s11144_s1 + $0xd08] ss:$16 sps:$4 sm:$0xff]  }
 0x252   :  { %v5377_v59 = vpop.f32.mrf.mxu0  ;;  %5622 = vmatmul.mubr.bf16.vlgmr.msra.gmra.mxu0 %v9092_v39  ;;  %v8092_v39 = vld [vmem:[%s11144_s1 + $0xeac] ss:$16 sps:$4 sm:$0xff]  }
 0x253   :  { %v10445_v16 = vadd.f32 %v5377_v59, %v5337_v47  ;;  %5672 = vmatpush1.bf16.msra.mxu0 %v8078_v53  ;;  %5703 = vmatprep.mubr.bf16.mxu0 %v9114_v43  ;;  %v8098_v43 = vld [vmem:[%s11144_s1 + $0xe8c] ss:$16 sps:$4 sm:$0xff]  }
 0x254   :  { %5639 = vmatpush1.bf16.msra.mxu1 %v8075_v52  ;;  %v5379_v2 = vpop.f32.mrf.mxu0  ;;  %5673 = vmatprep.subr.bf16.mxu0 %v8086_v56  ;;  %v8128_v47 = vld [vmem:[%s11144_s1 + $0xfec] ss:$16 sps:$4 sm:$0xff]   ;;  %v8150_v56 = vld [vmem:[%s11144_s1 + $0x10e8] ss:$16 sps:$4 sm:$0xff]  }
 0x255   :  { %5640 = vmatprep.subr.bf16.mxu1 %v8083_v55  ;;  %v10459_v58 = vadd.f32 %v5379_v2, %v5339_v23  ;;  %v8134_v23 = vld [vmem:[%s11144_s1 + $0xfcc] ss:$16 sps:$4 sm:$0xff]   ;;  %v8147_v55 = vld [vmem:[%s11144_s1 + $0xf68] ss:$16 sps:$4 sm:$0xff]  }
 0x256   :  { %v5381_v5 = vpop.f32.mrf.mxu0  ;;  %v8146_v49 = vld [vmem:[%s11144_s1 + $0xf8c] ss:$16 sps:$4 sm:$0xff]   ;;  %v8153_v2 = vld [vmem:[%s11144_s1 + $0xf48] ss:$16 sps:$4 sm:$0xff]  }
 0x257   :  { %5674 = vmatpush1.bf16.msra.mxu0 %v8084_v60  ;;  %v8149_v52 = vld [vmem:[%s11144_s1 + $0xf6c] ss:$16 sps:$4 sm:$0xff]  }
 0x258   :  { %5641 = vmatpush1.bf16.msra.mxu1 %v8081_v15  ;;  %v5382_v24 = vpop.f32.mrf.mxu0  ;;  %5675 = vmatprep.subr.bf16.mxu0 %v8092_v39  ;;  %v8152_v53 = vld [vmem:[%s11144_s1 + $0x10ec] ss:$16 sps:$4 sm:$0xff]  }
 0x259   :  { %5642 = vmatprep.subr.bf16.mxu1 %v8089_v3  ;;  %v8155_v59 = vld [vmem:[%s11144_s1 + $0xf4c] ss:$16 sps:$4 sm:$0xff]   ;;  %v8156_v3 = vld [vmem:[%s11144_s1 + $0x10c8] ss:$16 sps:$4 sm:$0xff]  }
 0x25a   :  { %v8158_v15 = vld [vmem:[%s11144_s1 + $0x10cc] ss:$16 sps:$4 sm:$0xff]   ;;  %v8162_v24 = vld [vmem:[%s11144_s1 + $0x10a8] ss:$16 sps:$4 sm:$0xff]  }
 0x25b   :  { %5676 = vmatpush1.bf16.msra.mxu0 %v8090_v11  ;;  %v8161_v5 = vld [vmem:[%s11144_s1 + $0xf2c] ss:$16 sps:$4 sm:$0xff]   ;;  %v8159_v11 = vld [vmem:[%s11144_s1 + $0xf28] ss:$16 sps:$4 sm:$0xff]  }
 0x25c   :  { %5643 = vmatpush1.bf16.msra.mxu1 %v8087_v8  ;;  %5677 = vmatprep.subr.bf16.mxu0 %v8098_v43  ;;  %v8167_v43 = vld [vmem:[%s11144_s1 + $0xf0c] ss:$16 sps:$4 sm:$0xff]  }
 0x25d   :  { %5644 = vmatprep.subr.bf16.mxu1 %v8095_v27 }
 0x25f   :  { %5678 = vmatpush1.bf16.msra.mxu0 %v8096_v13  ;;  %v834_v13 = vsub.s32 3, %v9285_v54 }
 0x260   :  { %5645 = vmatpush1.bf16.msra.mxu1 %v8093_v12  ;;  %5679 = vmatprep.subr.bf16.mxu0 %v8104_v6  ;;  %v830_v12 = vsub.s32 2, %v9285_v54  ;;  %v8168_v6 = vld [vmem:[%s11144_s1 + $0x1088] ss:$16 sps:$4 sm:$0xff]   ;;  %v8176_v54 = vld [vmem:[%s11144_s1 + $0x12ec] ss:$16 sps:$4 sm:$0xff]  }
 0x261   :  { %5646 = vmatprep.subr.bf16.mxu1 %v8101_v14  ;;  %v8165_v14 = vld [vmem:[%s11144_s1 + $0xf08] ss:$16 sps:$4 sm:$0xff]  }
 0x263   :  { %5680 = vmatpush1.bf16.msra.mxu0 %v8102_v26  ;;  %v8395_v26 = vld [vmem:[%s11146_s2] sm:$0xf] }
 0x264   :  { %5647 = vmatpush2.bf16.msra.mxu1 %v8099_v19  ;;  %5681 = vmatprep.subr.bf16.mxu0 %v8110_v20  ;;  %v8173_v19 = vld [vmem:[%s11144_s1 + $0x106c] ss:$16 sps:$4 sm:$0xff]   ;;  %v835_v20 = vrot.slane %v8395_v26, %v834_v13 }
 0x265   :  { %5648 = vmatprep.subr.bf16.mxu1 %v8107_v18  ;;  %v831_v18 = vrot.slane %v8395_v26, %v830_v12  ;;  %v8233_v12 = vld [vmem:[%s11144_s1 + $0x112c] ss:$16 sps:$4 sm:$0xff]   ;;  %v8237_v26 = vld [vmem:[%s11144_s1 + $0x1108] ss:$16 sps:$4 sm:$0xff]  }
 0x266   :  { %v8236_v13 = vld [vmem:[%s11144_s1 + $0x13ac] ss:$16 sps:$4 sm:$0xff]  }
 0x267   :  { %5682 = vmatpush1.bf16.msra.mxu0 %v8108_v28  ;;  %v8174_v28 = vld [vmem:[%s11144_s1 + $0x12e8] ss:$16 sps:$4 sm:$0xff]  }
 0x268   :  { %5649 = vmatpush2.bf16.msra.mxu1 %v8105_v29  ;;  %5683 = vmatprep.subr.bf16.mxu0 %v8116_v17  ;;  %v8171_v29 = vld [vmem:[%s11144_s1 + $0x1068] ss:$16 sps:$4 sm:$0xff]   ;;  %v8182_v17 = vld [vmem:[%s11144_s1 + $0x12cc] ss:$16 sps:$4 sm:$0xff]  }
 0x269   :  { %5650 = vmatprep.subr.bf16.mxu1 %v8113_v31  ;;  %v8179_v31 = vld [vmem:[%s11144_s1 + $0x104c] ss:$16 sps:$4 sm:$0xff]  }
 0x26b   :  { %5684 = vmatpush1.bf16.msra.mxu0 %v8114_v36  ;;  %v8177_v36 = vld [vmem:[%s11144_s1 + $0x1048] ss:$16 sps:$4 sm:$0xff]  }
 0x26c   :  { %5651 = vmatpush2.bf16.msra.mxu1 %v8111_v30  ;;  %5685 = vmatprep.subr.bf16.mxu0 %v8122_v25 }
 0x26d   :  { %5652 = vmatprep.subr.bf16.mxu1 %v8119_v32  ;;  %v8180_v32 = vld [vmem:[%s11144_s1 + $0x12c8] ss:$16 sps:$4 sm:$0xff]  }
 0x26f   :  { %5686 = vmatpush1.bf16.msra.mxu0 %v8120_v38 }
 0x270   :  { %5653 = vmatpush2.bf16.msra.mxu1 %v8117_v33  ;;  %5687 = vmatprep.subr.bf16.mxu0 %v8128_v47  ;;  %v8185_v33 = vld [vmem:[%s11144_s1 + $0x102c] ss:$16 sps:$4 sm:$0xff]  }
 0x271   :  { %5654 = vmatprep.subr.bf16.mxu1 %v8125_v51 }
 0x273   :  { %5688 = vmatpush2.bf16.msra.mxu0 %v8126_v41 }
 0x274   :  { %5655 = vmatpush2.bf16.msra.mxu1 %v8123_v34  ;;  %5689 = vmatprep.subr.bf16.mxu0 %v8134_v23  ;;  %v8188_v34 = vld [vmem:[%s11144_s1 + $0x12ac] ss:$16 sps:$4 sm:$0xff]  }
 0x275   :  { %5656 = vmatprep.subr.bf16.mxu1 %v8131_v22  ;;  %v8186_v22 = vld [vmem:[%s11144_s1 + $0x12a8] ss:$16 sps:$4 sm:$0xff]  }
 0x277   :  { %5690 = vmatpush2.bf16.msra.mxu0 %v8132_v45  ;;  %v8191_v45 = vld [vmem:[%s11144_s1 + $0x100c] ss:$16 sps:$4 sm:$0xff]  }
 0x278   :  { %5657 = vmatpush2.bf16.msra.mxu1 %v8129_v44  ;;  %5691 = vmatprep.subr.bf16.mxu0 %v8140_v7  ;;  %v8189_v7 = vld [vmem:[%s11144_s1 + $0x1008] ss:$16 sps:$4 sm:$0xff]  }
 0x279   :  { %5658 = vmatprep.subr.bf16.mxu1 %v8137_v46  ;;  %v8194_v46 = vld [vmem:[%s11144_s1 + $0x128c] ss:$16 sps:$4 sm:$0xff]  }
 0x27b   :  { %5692 = vmatpush2.bf16.msra.mxu0 %v8138_v57  ;;  %v8200_v57 = vld [vmem:[%s11144_s1 + $0x126c] ss:$16 sps:$4 sm:$0xff]  }
 0x27c   :  { %5659 = vmatpush2.bf16.msra.mxu1 %v8135_v42  ;;  %5693 = vmatprep.subr.bf16.mxu0 %v8146_v49  ;;  %v8197_v42 = vld [vmem:[%s11144_s1 + $0x11ec] ss:$16 sps:$4 sm:$0xff]   ;;  %v8198_v49 = vld [vmem:[%s11144_s1 + $0x1268] ss:$16 sps:$4 sm:$0xff]  }
 0x27d   :  { %5660 = vmatprep.subr.bf16.mxu1 %v8143_v48  ;;  %v8195_v48 = vld [vmem:[%s11144_s1 + $0x11e8] ss:$16 sps:$4 sm:$0xff]  }
 0x27f   :  { %5694 = vmatpush2.bf16.msra.mxu0 %v8144_v37  ;;  %v8206_v37 = vld [vmem:[%s11144_s1 + $0x124c] ss:$16 sps:$4 sm:$0xff]  }
 0x280   :  { %5661 = vmatpush2.bf16.msra.mxu1 %v8141_v50  ;;  %5695 = vmatprep.subr.bf16.mxu0 %v8149_v52  ;;  %v8203_v50 = vld [vmem:[%s11144_s1 + $0x11cc] ss:$16 sps:$4 sm:$0xff]   ;;  %v8201_v52 = vld [vmem:[%s11144_s1 + $0x11c8] ss:$16 sps:$4 sm:$0xff]  }
 0x281   :  { %5712 = vmatprep.subr.bf16.mxu1 %v8152_v53  ;;  %v8204_v53 = vld [vmem:[%s11144_s1 + $0x1248] ss:$16 sps:$4 sm:$0xff]  }
 0x283   :  { %v5418_v60 = vpop.f32.mrf.mxu1  ;;  %5663 = vmatmul.mubr.bf16.vlgmr.msra.gmra.mxu1 %v9312_v0  ;;  %5696 = vmatpush2.bf16.msra.mxu0 %v8147_v55  ;;  %v8164_v0 = vld [vmem:[%s11144_s1 + $0x10ac] ss:$16 sps:$4 sm:$0xff]  }
 0x284   :  { %5713 = vmatpush1.bf16.msra.mxu1 %v8150_v56  ;;  %5697 = vmatprep.subr.bf16.mxu0 %v8155_v59  ;;  %v5419_v30 = vadd.f32 %v5418_v60, %v831_v18  ;;  %v8209_v55 = vld [vmem:[%s11144_s1 + $0x11ac] ss:$16 sps:$4 sm:$0xff]   ;;  %v8207_v59 = vld [vmem:[%s11144_s1 + $0x11a8] ss:$16 sps:$4 sm:$0xff]  }
 0x285   :  { %v5420_v39 = vpop.f32.mrf.mxu1  ;;  %5714 = vmatprep.subr.bf16.mxu1 %v8158_v15  ;;  %5744 = vmatprep.mubr.bf16.mxu1 %v9339_v9  ;;  %v8170_v9 = vld [vmem:[%s11144_s1 + $0x108c] ss:$16 sps:$4 sm:$0xff]   ;;  %v8210_v15 = vld [vmem:[%s11144_s1 + $0x1228] ss:$16 sps:$4 sm:$0xff]  }
 0x286   :  { %v5421_v38 = vadd.f32 %v5420_v39, %v835_v20  ;;  %v8212_v56 = vld [vmem:[%s11144_s1 + $0x122c] ss:$16 sps:$4 sm:$0xff]   ;;  %v8216_v39 = vld [vmem:[%s11144_s1 + $0x1208] ss:$16 sps:$4 sm:$0xff]  }
 0x287   :  { %v5422_v8 = vpop.f32.mrf.mxu1  ;;  %5698 = vmatpush2.bf16.msra.mxu0 %v8153_v2  ;;  %v8215_v60 = vld [vmem:[%s11144_s1 + $0x118c] ss:$16 sps:$4 sm:$0xff]   ;;  %v8240_v18 = vld [vmem:[%s11144_s1 + $0x1388] ss:$16 sps:$4 sm:$0xff]  }
 0x288   :  { %5715 = vmatpush1.bf16.msra.mxu1 %v8156_v3  ;;  %5699 = vmatprep.subr.bf16.mxu0 %v8161_v5  ;;  %v8218_v2 = vld [vmem:[%s11144_s1 + $0x120c] ss:$16 sps:$4 sm:$0xff]   ;;  %v8213_v3 = vld [vmem:[%s11144_s1 + $0x1188] ss:$16 sps:$4 sm:$0xff]  }
 0x289   :  { %v5423_v27 = vpop.f32.mrf.mxu1  ;;  %5716 = vmatprep.subr.bf16.mxu1 %v8164_v0  ;;  %v8221_v5 = vld [vmem:[%s11144_s1 + $0x116c] ss:$16 sps:$4 sm:$0xff]   ;;  %v8219_v8 = vld [vmem:[%s11144_s1 + $0x1168] ss:$16 sps:$4 sm:$0xff]  }
 0x28a   :  { %v8224_v0 = vld [vmem:[%s11144_s1 + $0x13ec] ss:$16 sps:$4 sm:$0xff]  }
 0x28b   :  { %5700 = vmatpush2.bf16.msra.mxu0 %v8159_v11  ;;  %v8222_v11 = vld [vmem:[%s11144_s1 + $0x13e8] ss:$16 sps:$4 sm:$0xff]   ;;  %v8230_v27 = vld [vmem:[%s11144_s1 + $0x13cc] ss:$16 sps:$4 sm:$0xff]  }
 0x28c   :  { %5717 = vmatpush1.bf16.msra.mxu1 %v8162_v24  ;;  %5701 = vmatprep.subr.bf16.mxu0 %v8167_v43  ;;  %v8227_v24 = vld [vmem:[%s11144_s1 + $0x114c] ss:$16 sps:$4 sm:$0xff]   ;;  %v8225_v43 = vld [vmem:[%s11144_s1 + $0x1148] ss:$16 sps:$4 sm:$0xff]  }
 0x28d   :  { %5718 = vmatprep.subr.bf16.mxu1 %v8170_v9  ;;  %v8228_v9 = vld [vmem:[%s11144_s1 + $0x13c8] ss:$16 sps:$4 sm:$0xff]   ;;  %v8245_v20 = vld [vmem:[%s11144_s1 + $0x136c] ss:$16 sps:$4 sm:$0xff]  }
 0x28f   :  { %5702 = vmatpush2.bf16.msra.mxu0 %v8165_v14  ;;  %v8231_v14 = vld [vmem:[%s11144_s1 + $0x1128] ss:$16 sps:$4 sm:$0xff]  }
 0x290   :  { %5719 = vmatpush1.bf16.msra.mxu1 %v8168_v6  ;;  %5753 = vmatprep.subr.bf16.mxu0 %v8176_v54  ;;  %v8234_v6 = vld [vmem:[%s11144_s1 + $0x13a8] ss:$16 sps:$4 sm:$0xff]   ;;  %v8242_v54 = vld [vmem:[%s11144_s1 + $0x138c] ss:$16 sps:$4 sm:$0xff]  }
 0x291   :  { %5720 = vmatprep.subr.bf16.mxu1 %v8173_v19  ;;  %v8239_v19 = vld [vmem:[%s11144_s1 + $0x110c] ss:$16 sps:$4 sm:$0xff]  }
 0x292   :  { %v5459_v25 = vpop.f32.mrf.mxu0  ;;  %5704 = vmatmul.mubr.bf16.vlgmr.msra.gmra.mxu0 %v9316_v1  ;;  %v8183_v1 = vld [vmem:[%s11144_s1 + $0x1028] ss:$16 sps:$4 sm:$0xff]  }
 0x293   :  { %v10659_v51 = vadd.f32 %v5459_v25, %v5419_v30  ;;  %5754 = vmatpush1.bf16.msra.mxu0 %v8174_v28  ;;  %5785 = vmatprep.mubr.bf16.mxu0 %v9343_v10  ;;  %v8192_v10 = vld [vmem:[%s11144_s1 + $0x1288] ss:$16 sps:$4 sm:$0xff]   ;;  %v8254_v30 = vld [vmem:[%s11144_s1 + $0x14cc] ss:$16 sps:$4 sm:$0xff]  }
 0x294   :  { %5721 = vmatpush1.bf16.msra.mxu1 %v8171_v29  ;;  %v5461_v47 = vpop.f32.mrf.mxu0  ;;  %5755 = vmatprep.subr.bf16.mxu0 %v8182_v17  ;;  %v8248_v29 = vld [vmem:[%s11144_s1 + $0x14ec] ss:$16 sps:$4 sm:$0xff]   ;;  %v8243_v28 = vld [vmem:[%s11144_s1 + $0x1368] ss:$16 sps:$4 sm:$0xff]  }
 0x295   :  { %5722 = vmatprep.subr.bf16.mxu1 %v8179_v31  ;;  %v10664_v41 = vadd.f32 %v5461_v47, %v5421_v38  ;;  %v8246_v31 = vld [vmem:[%s11144_s1 + $0x14e8] ss:$16 sps:$4 sm:$0xff]   ;;  %v8251_v17 = vld [vmem:[%s11144_s1 + $0x134c] ss:$16 sps:$4 sm:$0xff]  }
 0x296   :  { %v5463_v23 = vpop.f32.mrf.mxu0  ;;  %v8249_v25 = vld [vmem:[%s11144_s1 + $0x1348] ss:$16 sps:$4 sm:$0xff]   ;;  %v8257_v47 = vld [vmem:[%s11144_s1 + $0x132c] ss:$16 sps:$4 sm:$0xff]  }
 0x297   :  { %5756 = vmatpush1.bf16.msra.mxu0 %v8180_v32 }
 0x298   :  { %5723 = vmatpush1.bf16.msra.mxu1 %v8177_v36  ;;  %v5464_v44 = vpop.f32.mrf.mxu0  ;;  %5757 = vmatprep.subr.bf16.mxu0 %v8188_v34 }
 0x299   :  { %5724 = vmatprep.subr.bf16.mxu1 %v8185_v33  ;;  %v8252_v33 = vld [vmem:[%s11144_s1 + $0x14c8] ss:$16 sps:$4 sm:$0xff]  }
 0x29a   :  { %v8261_v44 = vld [vmem:[%s11144_s1 + $0x1308] ss:$16 sps:$4 sm:$0xff]  }
 0x29b   :  { %5758 = vmatpush1.bf16.msra.mxu0 %v8186_v22  ;;  %v8258_v22 = vld [vmem:[%s11144_s1 + $0x14a8] ss:$16 sps:$4 sm:$0xff]  }
 0x29c   :  { %5725 = vmatpush1.bf16.msra.mxu1 %v8183_v1  ;;  %5759 = vmatprep.subr.bf16.mxu0 %v8194_v46  ;;  %v8255_v1 = vld [vmem:[%s11144_s1 + $0x1328] ss:$16 sps:$4 sm:$0xff]   ;;  %v8269_v46 = vld [vmem:[%s11144_s1 + $0x146c] ss:$16 sps:$4 sm:$0xff]  }
 0x29d   :  { %5726 = vmatprep.subr.bf16.mxu1 %v8191_v45  ;;  %v8264_v45 = vld [vmem:[%s11144_s1 + $0x1488] ss:$16 sps:$4 sm:$0xff]  }
 0x29f   :  { %5760 = vmatpush1.bf16.msra.mxu0 %v8192_v10  ;;  %v8267_v10 = vld [vmem:[%s11144_s1 + $0x1468] ss:$16 sps:$4 sm:$0xff]  }
 0x2a0   :  { %5727 = vmatpush1.bf16.msra.mxu1 %v8189_v7  ;;  %5761 = vmatprep.subr.bf16.mxu0 %v8200_v57  ;;  %v8272_v7 = vld [vmem:[%s11144_s1 + $0x16ec] ss:$16 sps:$4 sm:$0xff]  }
 0x2a1   :  { %5728 = vmatprep.subr.bf16.mxu1 %v8197_v42  ;;  %v8270_v42 = vld [vmem:[%s11144_s1 + $0x16e8] ss:$16 sps:$4 sm:$0xff]   ;;  %v8275_v57 = vld [vmem:[%s11144_s1 + $0x144c] ss:$16 sps:$4 sm:$0xff]  }
 0x2a3   :  { %5762 = vmatpush1.bf16.msra.mxu0 %v8198_v49 }
 0x2a4   :  { %5729 = vmatpush2.bf16.msra.mxu1 %v8195_v48  ;;  %5763 = vmatprep.subr.bf16.mxu0 %v8206_v37  ;;  %v8278_v48 = vld [vmem:[%s11144_s1 + $0x16cc] ss:$16 sps:$4 sm:$0xff]   ;;  %v8273_v37 = vld [vmem:[%s11144_s1 + $0x1448] ss:$16 sps:$4 sm:$0xff]  }
 0x2a5   :  { %5730 = vmatprep.subr.bf16.mxu1 %v8203_v50 }
 0x2a7   :  { %5764 = vmatpush1.bf16.msra.mxu0 %v8204_v53 }
 0x2a8   :  { %5731 = vmatpush2.bf16.msra.mxu1 %v8201_v52  ;;  %5765 = vmatprep.subr.bf16.mxu0 %v8212_v56  ;;  %v8276_v52 = vld [vmem:[%s11144_s1 + $0x16c8] ss:$16 sps:$4 sm:$0xff]  }
 0x2a9   :  { %5732 = vmatprep.subr.bf16.mxu1 %v8209_v55  ;;  %v8281_v55 = vld [vmem:[%s11144_s1 + $0x142c] ss:$16 sps:$4 sm:$0xff]  }
 0x2ab   :  { %5766 = vmatpush1.bf16.msra.mxu0 %v8210_v15  ;;  %v8279_v15 = vld [vmem:[%s11144_s1 + $0x1428] ss:$16 sps:$4 sm:$0xff]  }
 0x2ac   :  { %5733 = vmatpush2.bf16.msra.mxu1 %v8207_v59  ;;  %5767 = vmatprep.subr.bf16.mxu0 %v8218_v2 }
 0x2ad   :  { %5734 = vmatprep.subr.bf16.mxu1 %v8215_v60  ;;  %v8282_v60 = vld [vmem:[%s11144_s1 + $0x16a8] ss:$16 sps:$4 sm:$0xff]  }
 0x2af   :  { %5768 = vmatpush1.bf16.msra.mxu0 %v8216_v39  ;;  %v8285_v39 = vld [vmem:[%s11144_s1 + $0x1408] ss:$16 sps:$4 sm:$0xff]  }
 0x2b0   :  { %5735 = vmatpush2.bf16.msra.mxu1 %v8213_v3  ;;  %5769 = vmatprep.subr.bf16.mxu0 %v8224_v0  ;;  %v8287_v3 = vld [vmem:[%s11144_s1 + $0x140c] ss:$16 sps:$4 sm:$0xff]  }
 0x2b1   :  { %5736 = vmatprep.subr.bf16.mxu1 %v8221_v5  ;;  %v8288_v5 = vld [vmem:[%s11144_s1 + $0x1688] ss:$16 sps:$4 sm:$0xff]   ;;  %v8293_v0 = vld [vmem:[%s11144_s1 + $0x15ec] ss:$16 sps:$4 sm:$0xff]  }
 0x2b3   :  { %5770 = vmatpush2.bf16.msra.mxu0 %v8222_v11  ;;  %v8291_v11 = vld [vmem:[%s11144_s1 + $0x15e8] ss:$16 sps:$4 sm:$0xff]  }
 0x2b4   :  { %5737 = vmatpush2.bf16.msra.mxu1 %v8219_v8  ;;  %5771 = vmatprep.subr.bf16.mxu0 %v8230_v27  ;;  %v8296_v8 = vld [vmem:[%s11144_s1 + $0x166c] ss:$16 sps:$4 sm:$0xff]  }
 0x2b5   :  { %5738 = vmatprep.subr.bf16.mxu1 %v8227_v24  ;;  %v8294_v24 = vld [vmem:[%s11144_s1 + $0x1668] ss:$16 sps:$4 sm:$0xff]   ;;  %v8299_v27 = vld [vmem:[%s11144_s1 + $0x15cc] ss:$16 sps:$4 sm:$0xff]  }
 0x2b7   :  { %5772 = vmatpush2.bf16.msra.mxu0 %v8228_v9  ;;  %v8297_v9 = vld [vmem:[%s11144_s1 + $0x15c8] ss:$16 sps:$4 sm:$0xff]  }
 0x2b8   :  { %5739 = vmatpush2.bf16.msra.mxu1 %v8225_v43  ;;  %5773 = vmatprep.subr.bf16.mxu0 %v8236_v13  ;;  %v8302_v43 = vld [vmem:[%s11144_s1 + $0x164c] ss:$16 sps:$4 sm:$0xff]  }
 0x2b9   :  { %5740 = vmatprep.subr.bf16.mxu1 %v8233_v12  ;;  %v8300_v12 = vld [vmem:[%s11144_s1 + $0x1648] ss:$16 sps:$4 sm:$0xff]   ;;  %v8305_v13 = vld [vmem:[%s11144_s1 + $0x15ac] ss:$16 sps:$4 sm:$0xff]  }
 0x2bb   :  { %5774 = vmatpush2.bf16.msra.mxu0 %v8234_v6  ;;  %v8303_v6 = vld [vmem:[%s11144_s1 + $0x15a8] ss:$16 sps:$4 sm:$0xff]  }
 0x2bc   :  { %5741 = vmatpush2.bf16.msra.mxu1 %v8231_v14  ;;  %5775 = vmatprep.subr.bf16.mxu0 %v8242_v54  ;;  %v8308_v14 = vld [vmem:[%s11144_s1 + $0x162c] ss:$16 sps:$4 sm:$0xff]  }
 0x2bd   :  { %5742 = vmatprep.subr.bf16.mxu1 %v8239_v19  ;;  %v8306_v19 = vld [vmem:[%s11144_s1 + $0x1628] ss:$16 sps:$4 sm:$0xff]   ;;  %v8311_v54 = vld [vmem:[%s11144_s1 + $0x158c] ss:$16 sps:$4 sm:$0xff]  }
 0x2bf   :  { %5776 = vmatpush2.bf16.msra.mxu0 %v8240_v18  ;;  %v8309_v18 = vld [vmem:[%s11144_s1 + $0x1588] ss:$16 sps:$4 sm:$0xff]  }
 0x2c0   :  { %5743 = vmatpush2.bf16.msra.mxu1 %v8237_v26  ;;  %5777 = vmatprep.subr.bf16.mxu0 %v8245_v20  ;;  %v8314_v26 = vld [vmem:[%s11144_s1 + $0x160c] ss:$16 sps:$4 sm:$0xff]   ;;  %v8312_v20 = vld [vmem:[%s11144_s1 + $0x1608] ss:$16 sps:$4 sm:$0xff]  }
 0x2c1   :  { %5794 = vmatprep.subr.bf16.mxu1 %v8248_v29  ;;  %v8317_v29 = vld [vmem:[%s11144_s1 + $0x156c] ss:$16 sps:$4 sm:$0xff]  }
 0x2c3   :  { %v5500_v36 = vpop.f32.mrf.mxu1  ;;  %5745 = vmatmul.mubr.bf16.vlgmr.msra.gmra.mxu1 %v9551_v61  ;;  %5778 = vmatpush2.bf16.msra.mxu0 %v8243_v28  ;;  %v8260_v61 = vld [vmem:[%s11144_s1 + $0x14ac] ss:$16 sps:$4 sm:$0xff]  }
 0x2c4   :  { %v5501_v32 = vadd.f32 %v5500_v36, %v10659_v51  ;;  %5795 = vmatpush1.bf16.msra.mxu1 %v8246_v31  ;;  %5779 = vmatprep.subr.bf16.mxu0 %v8251_v17  ;;  %v8320_v28 = vld [vmem:[%s11144_s1 + $0x17ec] ss:$16 sps:$4 sm:$0xff]   ;;  %v8315_v31 = vld [vmem:[%s11144_s1 + $0x1568] ss:$16 sps:$4 sm:$0xff]  }
 0x2c5   :  { %v5502_v38 = vpop.f32.mrf.mxu1  ;;  %5796 = vmatprep.subr.bf16.mxu1 %v8254_v30  ;;  %5826 = vmatprep.mubr.bf16.mxu1 %v9571_v35  ;;  %v8266_v35 = vld [vmem:[%s11144_s1 + $0x148c] ss:$16 sps:$4 sm:$0xff]   ;;  %v8318_v17 = vld [vmem:[%s11144_s1 + $0x17e8] ss:$16 sps:$4 sm:$0xff]  }
 0x2c6   :  { %v5503_v51 = vadd.f32 %v5502_v38, %v10664_v41  ;;  %v8263_v41 = vld [vmem:[%s11144_s1 + $0x130c] ss:$16 sps:$4 sm:$0xff]  }
 0x2c7   :  { %v5504_v34 = vpop.f32.mrf.mxu1  ;;  %5780 = vmatpush2.bf16.msra.mxu0 %v8249_v25  ;;  %v8323_v30 = vld [vmem:[%s11144_s1 + $0x154c] ss:$16 sps:$4 sm:$0xff]   ;;  %v8324_v25 = vld [vmem:[%s11144_s1 + $0x17c8] ss:$16 sps:$4 sm:$0xff]  }
 0x2c8   :  { %5797 = vmatpush1.bf16.msra.mxu1 %v8252_v33  ;;  %5781 = vmatprep.subr.bf16.mxu0 %v8257_v47  ;;  %v8326_v36 = vld [vmem:[%s11144_s1 + $0x17cc] ss:$16 sps:$4 sm:$0xff]   ;;  %v8327_v47 = vld [vmem:[%s11144_s1 + $0x1528] ss:$16 sps:$4 sm:$0xff]  }
 0x2c9   :  { %v5505_v23 = vpop.f32.mrf.mxu1  ;;  %5798 = vmatprep.subr.bf16.mxu1 %v8260_v61  ;;  %v8329_v33 = vld [vmem:[%s11144_s1 + $0x152c] ss:$16 sps:$4 sm:$0xff]   ;;  %v8330_v61 = vld [vmem:[%s11144_s1 + $0x17a8] ss:$16 sps:$4 sm:$0xff]  }
 0x2ca   :  { %v8332_v38 = vld [vmem:[%s11144_s1 + $0x17ac] ss:$16 sps:$4 sm:$0xff]  }
 0x2cb   :  { %5782 = vmatpush2.bf16.msra.mxu0 %v8255_v1  ;;  %v8338_v34 = vld [vmem:[%s11144_s1 + $0x178c] ss:$16 sps:$4 sm:$0xff]   ;;  %v8333_v1 = vld [vmem:[%s11144_s1 + $0x1508] ss:$16 sps:$4 sm:$0xff]  }
 0x2cc   :  { %5799 = vmatpush1.bf16.msra.mxu1 %v8258_v22  ;;  %5783 = vmatprep.subr.bf16.mxu0 %v8263_v41  ;;  %v8336_v22 = vld [vmem:[%s11144_s1 + $0x1788] ss:$16 sps:$4 sm:$0xff]   ;;  %v8341_v23 = vld [vmem:[%s11144_s1 + $0x176c] ss:$16 sps:$4 sm:$0xff]  }
 0x2cd   :  { %5800 = vmatprep.subr.bf16.mxu1 %v8266_v35  ;;  %v8344_v41 = vld [vmem:[%s11144_s1 + $0x186c] ss:$16 sps:$4 sm:$0xff]   ;;  %v8339_v35 = vld [vmem:[%s11144_s1 + $0x1768] ss:$16 sps:$4 sm:$0xff]  }
 0x2cf   :  { %5784 = vmatpush2.bf16.msra.mxu0 %v8261_v44  ;;  %v8342_v44 = vld [vmem:[%s11144_s1 + $0x1868] ss:$16 sps:$4 sm:$0xff]  }
 0x2d0   :  { %5801 = vmatpush1.bf16.msra.mxu1 %v8264_v45  ;;  %5835 = vmatprep.subr.bf16.mxu0 %v8272_v7  ;;  %v8347_v45 = vld [vmem:[%s11144_s1 + $0x174c] ss:$16 sps:$4 sm:$0xff]  }
 0x2d1   :  { %5802 = vmatprep.subr.bf16.mxu1 %v8269_v46  ;;  %v8350_v46 = vld [vmem:[%s11144_s1 + $0x184c] ss:$16 sps:$4 sm:$0xff]  }
 0x2d2   :  { %v5541_v49 = vpop.f32.mrf.mxu0  ;;  %5786 = vmatmul.mubr.bf16.vlgmr.msra.gmra.mxu0 %v9555_v62  ;;  %v8284_v62 = vld [vmem:[%s11144_s1 + $0x16ac] ss:$16 sps:$4 sm:$0xff]  }
 0x2d3   :  { %v10852_v50 = vadd.f32 %v5541_v49, %v5501_v32  ;;  %5836 = vmatpush1.bf16.msra.mxu0 %v8270_v42  ;;  %5867 = vmatprep.mubr.bf16.mxu0 %v9575_v40  ;;  %v8290_v40 = vld [vmem:[%s11144_s1 + $0x168c] ss:$16 sps:$4 sm:$0xff]   ;;  %v8321_v32 = vld [vmem:[%s11144_s1 + $0x1548] ss:$16 sps:$4 sm:$0xff]  }
 0x2d4   :  { %5803 = vmatpush1.bf16.msra.mxu1 %v8267_v10  ;;  %v5543_v53 = vpop.f32.mrf.mxu0  ;;  %5837 = vmatprep.subr.bf16.mxu0 %v8278_v48  ;;  %v8345_v42 = vld [vmem:[%s11144_s1 + $0x1748] ss:$16 sps:$4 sm:$0xff]   ;;  %v8353_v49 = vld [vmem:[%s11144_s1 + $0x172c] ss:$16 sps:$4 sm:$0xff]  }
 0x2d5   :  { %5804 = vmatprep.subr.bf16.mxu1 %v8275_v57  ;;  %v10866_v56 = vadd.f32 %v5543_v53, %v5503_v51  ;;  %v8335_v51 = vld [vmem:[%s11144_s1 + $0x150c] ss:$16 sps:$4 sm:$0xff]   ;;  %v8348_v57 = vld [vmem:[%s11144_s1 + $0x1848] ss:$16 sps:$4 sm:$0xff]  }
 0x2d6   :  { %v5545_v59 = vpop.f32.mrf.mxu0  ;;  %v8354_v53 = vld [vmem:[%s11144_s1 + $0x1828] ss:$16 sps:$4 sm:$0xff]  }
 0x2d7   :  { %5838 = vmatpush1.bf16.msra.mxu0 %v8276_v52  ;;  %v8351_v52 = vld [vmem:[%s11144_s1 + $0x1728] ss:$16 sps:$4 sm:$0xff]  }
 0x2d8   :  { %5805 = vmatpush1.bf16.msra.mxu1 %v8273_v37  ;;  %v5546_v2 = vpop.f32.mrf.mxu0  ;;  %5839 = vmatprep.subr.bf16.mxu0 %v8284_v62  ;;  %v8359_v62 = vld [vmem:[%s11144_s1 + $0x170c] ss:$16 sps:$4 sm:$0xff]   ;;  %v8360_v59 = vld [vmem:[%s11144_s1 + $0x1808] ss:$16 sps:$4 sm:$0xff]  }
 0x2d9   :  { %5806 = vmatprep.subr.bf16.mxu1 %v8281_v55  ;;  %v8364_v2 = vld [vmem:[%s11147_s3 + $0x38] sm:$0xff]  }
 0x2db   :  { %5840 = vmatpush1.bf16.msra.mxu0 %v8282_v60  ;;  %v5918_v60 = vmax.f32 %v10459_v58, 0.0 }
 0x2dc   :  { %5807 = vmatpush1.bf16.msra.mxu1 %v8279_v15  ;;  %5841 = vmatprep.subr.bf16.mxu0 %v8290_v40  ;;  %v8363_v15 = vld [vmem:[%s11147_s3 + $0x78] sm:$0xff]  }
 0x2dd   :  { %5808 = vmatprep.subr.bf16.mxu1 %v8287_v3  ;;  %v8365_v3 = vld [vmem:[%s11147_s3 + $0x70] sm:$0xff]   ;;  %v5922_v40 = vpack.c.bf16 %v5918_v60, %v5918_v60 }
 0x2df   :  { %5842 = vmatpush1.bf16.msra.mxu0 %v8288_v5  ;;  %v8396_v5 = vld [vmem:[%s11145_s0 + $0x60] ss:$0 sps:$4 sm:$0xff]  }
 0x2e0   :  { %5809 = vmatpush1.bf16.msra.mxu1 %v8285_v39  ;;  %5843 = vmatprep.subr.bf16.mxu0 %v8296_v8 }
 0x2e1   :  { %5810 = vmatprep.subr.bf16.mxu1 %v8293_v0  ;;  %v8366_v0 = vld [vmem:[%s11147_s3 + $0x30] sm:$0xff]  }
 0x2e3   :  { %5844 = vmatpush1.bf16.msra.mxu0 %v8294_v24 }
 0x2e4   :  { %5811 = vmatpush2.bf16.msra.mxu1 %v8291_v11  ;;  %5845 = vmatprep.subr.bf16.mxu0 %v8302_v43  ;;  %v8367_v11 = vld [vmem:[%s11147_s3 + $0x68] sm:$0xff]  }
 0x2e5   :  { %5812 = vmatprep.subr.bf16.mxu1 %v8299_v27  ;;  %v8368_v27 = vld [vmem:[%s11147_s3 + $0x28] sm:$0xff]  }
 0x2e7   :  { %5846 = vmatpush1.bf16.msra.mxu0 %v8300_v12  ;;  %v8379_v12 = vld [vmem:[%s11147_s3 + $0xf8] sm:$0xff]  }
 0x2e8   :  { %5813 = vmatpush2.bf16.msra.mxu1 %v8297_v9  ;;  %5847 = vmatprep.subr.bf16.mxu0 %v8308_v14  ;;  %v8369_v9 = vld [vmem:[%s11147_s3 + $0x60] sm:$0xff]  }
 0x2e9   :  { %5814 = vmatprep.subr.bf16.mxu1 %v8305_v13  ;;  %v8380_v13 = vld [vmem:[%s11147_s3 + $0xb8] sm:$0xff]   ;;  %v8370_v14 = vld [vmem:[%s11147_s3 + $0x20] sm:$0xff]  }
 0x2eb   :  { %5848 = vmatpush1.bf16.msra.mxu0 %v8306_v19  ;;  %v8372_v19 = vld [vmem:[%s11147_s3 + $0x18] sm:$0xff]  }
 0x2ec   :  { %5815 = vmatpush2.bf16.msra.mxu1 %v8303_v6  ;;  %5849 = vmatprep.subr.bf16.mxu0 %v8314_v26  ;;  %v8371_v6 = vld [vmem:[%s11147_s3 + $0x58] sm:$0xff]   ;;  %v8374_v26 = vld [vmem:[%s11147_s3 + $0x10] sm:$0xff]  }
 0x2ed   :  { %5816 = vmatprep.subr.bf16.mxu1 %v8311_v54  ;;  %v8373_v54 = vld [vmem:[%s11147_s3 + $0x50] sm:$0xff]  }
 0x2ef   :  { %5850 = vmatpush1.bf16.msra.mxu0 %v8312_v20  ;;  %v8376_v20 = vld [vmem:[%s11147_s3 + $0x8] sm:$0xff]  }
 0x2f0   :  { %5817 = vmatpush2.bf16.msra.mxu1 %v8309_v18  ;;  %5851 = vmatprep.subr.bf16.mxu0 %v8320_v28  ;;  %v8375_v18 = vld [vmem:[%s11147_s3 + $0x48] sm:$0xff]   ;;  %v8378_v28 = vld [vmem:[%s11147_s3] sm:$0xff]  }
 0x2f1   :  { %5818 = vmatprep.subr.bf16.mxu1 %v8317_v29  ;;  %v8377_v29 = vld [vmem:[%s11147_s3 + $0x40] sm:$0xff]  }
 0x2f3   :  { %5852 = vmatpush2.bf16.msra.mxu0 %v8318_v17 }
 0x2f4   :  { %5819 = vmatpush2.bf16.msra.mxu1 %v8315_v31  ;;  %5853 = vmatprep.subr.bf16.mxu0 %v8326_v36  ;;  %v5917_v31 = vmax.f32 %v10445_v16, 0.0  ;;  %v8382_v36 = vld [vmem:[%s11147_s3 + $0xb0] sm:$0xff]   ;;  %v8383_v16 = vld [vmem:[%s11147_s3 + $0xe8] sm:$0xff]  }
 0x2f5   :  { %5820 = vmatprep.subr.bf16.mxu1 %v8323_v30  ;;  %v8381_v30 = vld [vmem:[%s11147_s3 + $0xf0] sm:$0xff]  }
 0x2f6   :  { %v5921_v17 = vpack.c.bf16 %v5917_v31, %v5917_v31 }
 0x2f7   :  { %5854 = vmatpush2.bf16.msra.mxu0 %v8324_v25 }
 0x2f8   :  { %5821 = vmatpush2.bf16.msra.mxu1 %v8321_v32  ;;  %5855 = vmatprep.subr.bf16.mxu0 %v8332_v38 }
 0x2f9   :  { %5822 = vmatprep.subr.bf16.mxu1 %v8329_v33 }
 0x2fb   :  { %5856 = vmatpush2.bf16.msra.mxu0 %v8330_v61 }
 0x2fc   :  { %5823 = vmatpush2.bf16.msra.mxu1 %v8327_v47  ;;  %5857 = vmatprep.subr.bf16.mxu0 %v8338_v34  ;;  %v8384_v47 = vld [vmem:[%s11147_s3 + $0xa8] sm:$0xff]   ;;  %v8385_v34 = vld [vmem:[%s11147_s3 + $0xe0] sm:$0xff]  }
 0x2fd   :  { %5824 = vmatprep.subr.bf16.mxu1 %v8335_v51 }
 0x2ff   :  { %5858 = vmatpush2.bf16.msra.mxu0 %v8336_v22  ;;  %v8387_v22 = vld [vmem:[%s11147_s3 + $0xd8] sm:$0xff]  }
 0x300   :  { %5825 = vmatpush2.bf16.msra.mxu1 %v8333_v1  ;;  %5859 = vmatprep.subr.bf16.mxu0 %v8341_v23  ;;  %v8386_v1 = vld [vmem:[%s11147_s3 + $0xa0] sm:$0xff]   ;;  %v8388_v23 = vld [vmem:[%s11147_s3 + $0x98] sm:$0xff]  }
 0x301   :  { %5884 = vmatprep.subr.bf16.mxu1 %v8344_v41  ;;  %v8389_v41 = vld [vmem:[%s11147_s3 + $0xd0] sm:$0xff]  }
 0x303   :  { %v5582_v7 = vpop.f32.mrf.mxu1  ;;  %5827 = vmatmul.mubr.bf16.vlgmr.msra.gmra.mxu1 %v9769_v63  ;;  %5860 = vmatpush2.bf16.msra.mxu0 %v8339_v35  ;;  %v8356_v63 = vld [vmem:[%s11144_s1 + $0x182c] ss:$16 sps:$4 sm:$0xff]   ;;  %v8390_v35 = vld [vmem:[%s11147_s3 + $0x90] sm:$0xff]  }
 0x304   :  { %v5583_v10 = vadd.f32 %v5582_v7, %v10852_v50  ;;  %5885 = vmatpush1.bf16.msra.mxu1 %v8342_v44  ;;  %5861 = vmatprep.subr.bf16.mxu0 %v8347_v45  ;;  %v8391_v7 = vld [vmem:[%s11147_s3 + $0xc8] sm:$0xff]  }
 0x305   :  { %v5584_v48 = vpop.f32.mrf.mxu1  ;;  %5886 = vmatprep.subr.bf16.mxu1 %v8350_v46  ;;  %5908 = vmatprep.mubr.bf16.mxu1 %v8397_v21  ;;  %v8362_v21 = vld [vmem:[%s11144_s1 + $0x180c] ss:$16 sps:$4 sm:$0xff]  }
 0x306   :  { %v5585_v50 = vadd.f32 %v5584_v48, %v10866_v56  ;;  %v8357_v56 = vld [vmem:[%s11144_s1 + $0x1708] ss:$16 sps:$4 sm:$0xff]  }
 0x307   :  { %v5586_v37 = vpop.f32.mrf.mxu1  ;;  %5862 = vmatpush2.bf16.msra.mxu0 %v8345_v42  ;;  %v8392_v42 = vld [vmem:[%s11147_s3 + $0x88] sm:$0xff]  }
 0x308   :  { %5887 = vmatpush1.bf16.msra.mxu1 %v8348_v57  ;;  %5863 = vmatprep.subr.bf16.mxu0 %v8353_v49  ;;  %v8393_v49 = vld [vmem:[%s11147_s3 + $0xc0] sm:$0xff]  }
 0x309   :  { %v5587_v55 = vpop.f32.mrf.mxu1  ;;  %5888 = vmatprep.subr.bf16.mxu1 %v8356_v63  ;;  %v8394_v63 = vld [vmem:[%s11147_s3 + $0x80] sm:$0xff]  }
 0x30b   :  { %5864 = vmatpush2.bf16.msra.mxu0 %v8351_v52 }
 0x30c   :  { %5889 = vmatpush1.bf16.msra.mxu1 %v8354_v53  ;;  %5865 = vmatprep.subr.bf16.mxu0 %v8359_v62 }
 0x30d   :  { %5890 = vmatprep.subr.bf16.mxu1 %v8362_v21 }
 0x30f   :  { %5866 = vmatpush2.bf16.msra.mxu0 %v8357_v56 }
 0x310   :  { %5891 = vmatpush1.bf16.msra.mxu1 %v8360_v59  ;;  %7117 = vmatprep.subr.bf16.mxu0 %v8363_v15 }
 0x311   :  { %7139 = vmatprep.subr.bf16.mxu1 %v8379_v12 }
 0x312   :  { %v5623_v39 = vpop.f32.mrf.mxu0  ;;  %5868 = vmatmul.mubr.bf16.vlgmr.msra.gmra.mxu0 %v9773_v4 }
 0x313   :  { %7083 = vmatmul.mubr.msk.bf16.vlgmr.msra.gmra.mxu1 %vm4847_vm0, %v8396_v5  ;;  %v5624_v58 = vadd.f32 %v5623_v39, %v5583_v10  ;;  %7118 = vmatpush3.bf16.msra.mxu0 %v8364_v2 }
 0x314   :  { %6220 = vmatprep.mubr.bf16.mxu0 %v5922_v40  ;;  %v5625_v8 = vpop.f32.mrf.mxu0  ;;  %7119 = vmatprep.subr.bf16.mxu0 %v8365_v3 }
 0x315   :  { %v5626_v4 = vadd.f32 %v5625_v8, %v5585_v50  ;;  %7140 = vmatpush3.bf16.msra.mxu1 %v8380_v13 }
 0x316   :  { %v5627_v24 = vpop.f32.mrf.mxu0  ;;  %7141 = vmatprep.subr.bf16.mxu1 %v8381_v30 }
 0x317   :  { %7120 = vmatpush3.bf16.msra.mxu0 %v8366_v0 }
 0x318   :  { %v5628_v43 = vpop.f32.mrf.mxu0  ;;  %7121 = vmatprep.subr.bf16.mxu0 %v8367_v11 }
 0x319   :  { %7142 = vmatpush3.bf16.msra.mxu1 %v8382_v36  ;;  %v7084_v36 = vld [vmem:[%s11148_s4] ss:$0 sm:$0xff] }
 0x31a   :  { %7143 = vmatprep.subr.bf16.mxu1 %v8383_v16 }
 0x31b   :  { %7122 = vmatpush3.bf16.msra.mxu0 %v8368_v27 }
 0x31c   :  { %7123 = vmatprep.subr.bf16.mxu0 %v8369_v9 }
 0x31d   :  { %7144 = vmatpush3.bf16.msra.mxu1 %v8384_v47 }
 0x31e   :  { %7145 = vmatprep.subr.bf16.mxu1 %v8385_v34 }
 0x31f   :  { %7124 = vmatpush3.bf16.msra.mxu0 %v8370_v14 }
 0x320   :  { %7125 = vmatprep.subr.bf16.mxu0 %v8371_v6 }
 0x321   :  { %7146 = vmatpush3.bf16.msra.mxu1 %v8386_v1 }
 0x322   :  { %7147 = vmatprep.subr.bf16.mxu1 %v8387_v22 }
 0x323   :  { %7126 = vmatpush3.bf16.msra.mxu0 %v8372_v19 }
 0x324   :  { %7127 = vmatprep.subr.bf16.mxu0 %v8373_v54 }
 0x325   :  { %7148 = vmatpush3.bf16.msra.mxu1 %v8388_v23 }
 0x326   :  { %7149 = vmatprep.subr.bf16.mxu1 %v8389_v41 }
 0x327   :  { %7128 = vmatpush3.bf16.msra.mxu0 %v8374_v26 }
 0x328   :  { %7129 = vmatprep.subr.bf16.mxu0 %v8375_v18 }
 0x329   :  { %7150 = vmatpush3.bf16.msra.mxu1 %v8390_v35 }
 0x32a   :  { %7151 = vmatprep.subr.bf16.mxu1 %v8391_v7 }
 0x32b   :  { %7130 = vmatpush3.bf16.msra.mxu0 %v8376_v20 }
 0x32c   :  { %7131 = vmatprep.subr.bf16.mxu0 %v8377_v29 }
 0x32d   :  { %7152 = vmatpush3.bf16.msra.mxu1 %v8392_v42 }
 0x32e   :  { %7153 = vmatprep.subr.bf16.mxu1 %v8393_v49 }
 0x32f   :  { %7132 = vmatpush3.bf16.msra.mxu0 %v8378_v28 }
 0x331   :  { %7154 = vmatpush3.bf16.msra.mxu1 %v8394_v63 }
 0x332   :  { %6221 = vmatmul.mubr.bf16.vlgmr.msra.gmra.mxu0 %v5921_v17 }
 0x343   :  { %v5664_v32 = vpop.f32.mrf.mxu1 }
 0x344   :  { %v5665_v25 = vadd.f32 %v5664_v32, %v5624_v58 }
 0x345   :  { %v5666_v33 = vpop.f32.mrf.mxu1 }
 0x346   :  { %v5667_v38 = vadd.f32 %v5666_v33, %v5626_v4 }
 0x347   :  { %v5668_v61 = vpop.f32.mrf.mxu1 }
 0x349   :  { %v5669_v51 = vpop.f32.mrf.mxu1 }
 0x352   :  { %v5705_v44 = vpop.f32.mrf.mxu0 }
 0x353   :  { %v5706_v45 = vadd.f32 %v5705_v44, %v5665_v25 }
 0x354   :  { %v5707_v46 = vpop.f32.mrf.mxu0 }
 0x355   :  { %v5708_v10 = vadd.f32 %v5707_v46, %v5667_v38 }
 0x356   :  { %v5709_v57 = vpop.f32.mrf.mxu0 }
 0x358   :  { %v5710_v48 = vpop.f32.mrf.mxu0 }
 0x383   :  { %v5746_v50 = vpop.f32.mrf.mxu1 }
 0x384   :  { %v5747_v37 = vadd.f32 %v5746_v50, %v5706_v45 }
 0x385   :  { %v5748_v52 = vpop.f32.mrf.mxu1 }
 0x386   :  { %v5749_v53 = vadd.f32 %v5748_v52, %v5708_v10 }
 0x387   :  { %v5750_v55 = vpop.f32.mrf.mxu1 }
 0x389   :  { %v5751_v62 = vpop.f32.mrf.mxu1 }
 0x392   :  { %v5787_v21 = vpop.f32.mrf.mxu0 }
 0x393   :  { %v5788_v39 = vadd.f32 %v5787_v21, %v5747_v37 }
 0x394   :  { %v5789_v56 = vpop.f32.mrf.mxu0 }
 0x395   :  { %v5790_v5 = vadd.f32 %v5789_v56, %v5749_v53 }
 0x396   :  { %v5791_v59 = vpop.f32.mrf.mxu0 }
 0x398   :  { %v5792_v15 = vpop.f32.mrf.mxu0 }
 0x3c3   :  { %v5828_v60 = vpop.f32.mrf.mxu1 }
 0x3c4   :  { %v5829_v58 = vadd.f32 %v5828_v60, %v5788_v39 }
 0x3c5   :  { %v5830_v2 = vpop.f32.mrf.mxu1 }
 0x3c6   :  { %v5831_v11 = vadd.f32 %v5830_v2, %v5790_v5 }
 0x3c7   :  { %v5832_v3 = vpop.f32.mrf.mxu1 }
 0x3c9   :  { %v5833_v40 = vpop.f32.mrf.mxu1 }
 0x3d2   :  { %v5869_v0 = vpop.f32.mrf.mxu0 }
 0x3d3   :  { %v5910_v8 = vpop.f32.mrf.mxu1  ;;  %v5870_v4 = vadd.f32 %v5869_v0, %v5829_v58 }
 0x3d4   :  { %v5871_v24 = vpop.f32.mrf.mxu0 }
 0x3d5   :  { %v5912_v27 = vpop.f32.mrf.mxu1  ;;  %v5911_v43 = vadd.f32 %v5910_v8, %v5870_v4  ;;  %v5872_v9 = vadd.f32 %v5871_v24, %v5831_v11 }
 0x3d6   :  { %v5873_v12 = vpop.f32.mrf.mxu0 }
 0x3d7   :  { %v5914_v13 = vpop.f32.mrf.mxu1  ;;  %v5913_v14 = vadd.f32 %v5912_v27, %v5872_v9  ;;  %v5919_v6 = vmax.f32 %v5911_v43, 0.0 }
 0x3d8   :  { %v5874_v19 = vpop.f32.mrf.mxu0 }
 0x3d9   :  { %v5915_v54 = vpop.f32.mrf.mxu1  ;;  %v5920_v26 = vmax.f32 %v5913_v14, 0.0  ;;  %v5923_v20 = vpack.c.bf16 %v5919_v6, %v5919_v6 }
 0x3db   :  { %v5924_v18 = vpack.c.bf16 %v5920_v26, %v5920_v26 }
 0x3dd   :  { %6260 = vmatprep.mubr.bf16.mxu1 %v5924_v18 }
 0x3de   :  { %6261 = vmatmul.mubr.bf16.vlgmr.msra.gmra.mxu1 %v5923_v20 }
 0x3f2   :  { %v7133_v29 = vpop.f32.mrf.mxu0 }
 0x3f4   :  { %v7134_v28 = vpop.f32.mrf.mxu0 }
 0x3f5   :  { %v7135_v31 = vadd.f32 %v7134_v28, %v7133_v29 }
 0x3f6   :  { %v7136_v17 = vpop.f32.mrf.mxu0 }
 0x3f7   :  { %v6223_v33 = vadd.f32 %v7135_v31, %v7084_v36 }
 0x3f8   :  { %v7137_v30 = vpop.f32.mrf.mxu0 }
 0x49e   :  { %v7155_v32 = vpop.f32.mrf.mxu1 }
 0x4a0   :  { %v7156_v25 = vpop.f32.mrf.mxu1 }
 0x4a1   :  { %v7157_v16 = vadd.f32 %v7156_v25, %v7155_v32 }
 0x4a2   :  { %v7158_v38 = vpop.f32.mrf.mxu1 }
 0x4a3   :  { %v6263_v47 = vadd.f32 %v7157_v16, %v6223_v33 }
 0x4a4   :  { %v7159_v61 = vpop.f32.mrf.mxu1 }
 0x4a5   :  { %6268 = vst [vmem:[%s11149_s5] sm:$0xff] %v6263_v47 }

</bundles_post_ra>
